<compile_context>
chip_gen: v7x
topology: tpu7x:2x2x1
jax: 0.10.0
libtpu: 0.0.40
codegen_flags: <defaults>
</compile_context>

<pallas_src>
import functools

import numpy as np
import jax
import jax.numpy as jnp
from jax.experimental import pallas as pl
from jax.experimental.pallas import tpu as pltpu

# Fixed geometry (ViZDoom-style 30x45 input resolution -> 64*2*4 = 512 flat)
IN_H, IN_W = 30, 45
H1, W1 = 13, 21          # conv1 output (k=5, s=2)
W1E, W1O = 11, 10        # even / odd output columns of conv1
H2, W2 = 6, 10           # conv2 output (k=3, s=2)
H3, W3 = 2, 4            # conv3 output (k=3, s=2)
C1, C2, C3 = 32, 64, 64
FC1_IN = C3 * H3 * W3    # 512
FC1_OUT = 128


# ------------------------- fused Pallas kernel -------------------------

def _fused_forward_kernel(pe_ref, po_ref, w1_ref, b1_ref, w2_ref, b2_ref,
                          w3_ref, b3_ref, w4_ref, b4_ref, w5_ref, b5_ref,
                          o_ref, h1e_ref, h1o_ref, h2_ref, *, n_batch):
    f32 = jnp.float32

    def mm(a, b):
        return jnp.dot(a, b, preferred_element_type=f32)

    def relu(v):
        return jnp.maximum(v, 0.0)

    # ---- conv1: two GEMMs over the parity-split patch matrices ----
    # h1e row index = (n*H1 + y)*W1E + (even col)/2 ; h1o analogous for odd cols.
    h1e_ref[...] = relu(mm(pe_ref[...], w1_ref[...]) + b1_ref[...])   # (N*13*11, 32)
    h1o_ref[...] = relu(mm(po_ref[...], w1_ref[...]) + b1_ref[...])   # (N*13*10, 32)

    # ---- conv2: one GEMM per output row (all tap slices are contiguous) ----
    w2 = w2_ref[...]
    b2 = b2_ref[...]
    for oy in range(H2):
        blocks = []
        for n in range(n_batch):
            taps = []
            for i in range(3):
                y = 2 * oy + i
                for j in range(3):
                    # conv1 column 2*ox + j -> parity j%2, half index ox + j//2
                    if j % 2 == 0:
                        base = (n * H1 + y) * W1E + j // 2
                        taps.append(h1e_ref[base:base + W2, :])        # (10, 32)
                    else:
                        base = (n * H1 + y) * W1O + j // 2
                        taps.append(h1o_ref[base:base + W2, :])        # (10, 32)
            blocks.append(jnp.concatenate(taps, axis=-1))              # (10, 288)
        patch = jnp.concatenate(blocks, axis=0)                        # (N*10, 288)
        h2_ref[oy] = relu(mm(patch, w2) + b2)                          # (N*10, 64)

    # ---- conv3: single GEMM over all (batch x 2 x 4) output positions ----
    rows = []
    for n in range(n_batch):
        for oy in range(H3):
            for ox in range(W3):
                taps = []
                for i in range(3):
                    y = 2 * oy + i
                    for j in range(3):
                        r = n * W2 + 2 * ox + j
                        taps.append(h2_ref[y, r:r + 1, :])             # (1, 64)
                rows.append(jnp.concatenate(taps, axis=-1))            # (1, 576)
    patch3 = jnp.concatenate(rows, axis=0)                             # (N*8, 576)
    c3 = relu(mm(patch3, w3_ref[...]) + b3_ref[...])                   # (N*8, 64)

    # ---- flatten (NCHW permutation already folded into w4) + fc1 + fc2 ----
    npos = H3 * W3
    feat_rows = []
    for n in range(n_batch):
        feats = [c3[n * npos + p:n * npos + p + 1, :] for p in range(npos)]
        feat_rows.append(jnp.concatenate(feats, axis=-1))              # (1, 512)
    feat = jnp.concatenate(feat_rows, axis=0)                          # (N, 512)

    h = relu(mm(feat, w4_ref[...]) + b4_ref[...])                      # (N, 128)
    o_ref[...] = (mm(h, w5_ref[...]) + b5_ref[...]).astype(o_ref.dtype)


# ------------------------- wrapper -------------------------

def _conv1_patches(xs, parity, w_out):
    """im2col for conv1 restricted to output columns of a given parity.
    xs: (N, 30, 45).  Returns (N*13*w_out, 25), feature index = 5*i + j."""
    n = xs.shape[0]
    taps = []
    for i in range(5):
        for j in range(5):
            c0 = 2 * parity + j
            taps.append(xs[:, i:i + 2 * (H1 - 1) + 1:2,
                            c0:c0 + 4 * (w_out - 1) + 1:4])
    p = jnp.stack(taps, axis=-1)                 # (N, 13, w_out, 25)
    return p.reshape(n * H1 * w_out, 25)


def net_forward(x_nchw, kp):
    n = x_nchw.shape[0]
    actions = kp["w5"].shape[1]
    xs = x_nchw[:, 0, :, :].astype(jnp.float32)              # (N, 30, 45)
    pe = _conv1_patches(xs, 0, W1E)                          # (N*143, 25)
    po = _conv1_patches(xs, 1, W1O)                          # (N*130, 25)

    vmem = pl.BlockSpec(memory_space=pltpu.MemorySpace.VMEM)
    kernel = functools.partial(_fused_forward_kernel, n_batch=n)
    return pl.pallas_call(
        kernel,
        out_shape=jax.ShapeDtypeStruct((n, actions), jnp.float32),
        in_specs=[vmem] * 12,
        out_specs=vmem,
        scratch_shapes=[
            pltpu.VMEM((n * H1 * W1E, C1), jnp.float32),     # conv1 (even cols)
            pltpu.VMEM((n * H1 * W1O, C1), jnp.float32),     # conv1 (odd cols)
            pltpu.VMEM((H2, n * W2, C2), jnp.float32),       # conv2 output
        ],
    )(pe, po, kp["w1"], kp["b1"], kp["w2"], kp["b2"], kp["w3"], kp["b3"],
      kp["w4"], kp["b4"], kp["w5"], kp["b5"])


def prepare_params(params):
    """One-time repack of PyTorch-layout weights into the kernel's GEMM layouts."""
    w1 = jnp.transpose(params["conv1_w"], (2, 3, 1, 0)).reshape(5 * 5 * 1, C1)
    w2 = jnp.transpose(params["conv2_w"], (2, 3, 1, 0)).reshape(3 * 3 * C1, C2)
    w3 = jnp.transpose(params["conv3_w"], (2, 3, 1, 0)).reshape(3 * 3 * C2, C3)
    # Fold the NCHW .view(-1, 512) into fc1:
    # kernel feature index = p*64 + c  <->  torch flat index = c*8 + p
    w4 = jnp.transpose(params["fc1_w"].reshape(FC1_OUT, C3, H3 * W3),
                       (2, 1, 0)).reshape(FC1_IN, FC1_OUT)
    w5 = jnp.transpose(params["fc2_w"])                      # (128, A)
    return {
        "w1": w1, "b1": params["conv1_b"].reshape(1, C1),
        "w2": w2, "b2": params["conv2_b"].reshape(1, C2),
        "w3": w3, "b3": params["conv3_b"].reshape(1, C3),
        "w4": w4, "b4": params["fc1_b"].reshape(1, FC1_OUT),
        "w5": w5, "b5": params["fc2_b"].reshape(1, params["fc2_w"].shape[0]),
    }


# ------------------------- reference + params -------------------------

def reference_forward(x, params):
    hi = jax.lax.Precision.HIGHEST
    dn = ("NCHW", "OIHW", "NCHW")
    y = jax.lax.conv_general_dilated(x, params["conv1_w"], (2, 2), "VALID",
                                     dimension_numbers=dn, precision=hi)
    y = jax.nn.relu(y + params["conv1_b"].reshape(1, -1, 1, 1))
    y = jax.lax.conv_general_dilated(y, params["conv2_w"], (2, 2), "VALID",
                                     dimension_numbers=dn, precision=hi)
    y = jax.nn.relu(y + params["conv2_b"].reshape(1, -1, 1, 1))
    y = jax.lax.conv_general_dilated(y, params["conv3_w"], (2, 2), "VALID",
                                     dimension_numbers=dn, precision=hi)
    y = jax.nn.relu(y + params["conv3_b"].reshape(1, -1, 1, 1))
    y = y.reshape(y.shape[0], -1)                            # NCHW flatten -> (N, 512)
    y = jax.nn.relu(jnp.dot(y, params["fc1_w"].T, precision=hi) + params["fc1_b"])
    return jnp.dot(y, params["fc2_w"].T, precision=hi) + params["fc2_b"]


def init_params(key, actions):
    ks = jax.random.split(key, 10)

    def u(k, shape, fan_in):
        bound = 1.0 / np.sqrt(fan_in)
        return jax.random.uniform(k, shape, jnp.float32, -bound, bound)

    return {
        "conv1_w": u(ks[0], (C1, 1, 5, 5), 1 * 5 * 5),
        "conv1_b": u(ks[1], (C1,),          1 * 5 * 5),
        "conv2_w": u(ks[2], (C2, C1, 3, 3), C1 * 3 * 3),
        "conv2_b": u(ks[3], (C2,),          C1 * 3 * 3),
        "conv3_w": u(ks[4], (C3, C2, 3, 3), C2 * 3 * 3),
        "conv3_b": u(ks[5], (C3,),          C2 * 3 * 3),
        "fc1_w":   u(ks[6], (FC1_OUT, FC1_IN), FC1_IN),
        "fc1_b":   u(ks[7], (FC1_OUT,),        FC1_IN),
        "fc2_w":   u(ks[8], (actions, FC1_OUT), FC1_OUT),
        "fc2_b":   u(ks[9], (actions,),         FC1_OUT),
    }


if __name__ == "__main__":
    key = jax.random.PRNGKey(0)
    k_x, k_p = jax.random.split(key)

    # 30x45 -> conv1 13x21 -> conv2 6x10 -> conv3 2x4 ; 64*2*4 = 512 flat feats
    batch, actions = 2, 8
    x = jax.random.uniform(k_x, (batch, 1, IN_H, IN_W), jnp.float32)
    params = init_params(k_p, actions)
    kparams = prepare_params(params)          # one-time weight repack (not per call)

    fwd = jax.jit(net_forward)
    out = jax.block_until_ready(fwd(x, kparams))
    assert out.shape == (batch, actions), out.shape

    # numerical check against a plain-JAX version of the PyTorch forward
    ref = jax.block_until_ready(reference_forward(x, params))
    np.testing.assert_allclose(np.asarray(out), np.asarray(ref),
                               rtol=1e-2, atol=1e-2)

    print("KERNEL_OK")
</pallas_src>

<mosaic_0001>
module attributes {stable_mosaic.version = 11 : i64} {
  func.func @_fused_forward_kernel(%arg0: memref<286x25xf32, #tpu.memory_space<vmem>>, %arg1: memref<260x25xf32, #tpu.memory_space<vmem>>, %arg2: memref<25x32xf32, #tpu.memory_space<vmem>>, %arg3: memref<1x32xf32, #tpu.memory_space<vmem>>, %arg4: memref<288x64xf32, #tpu.memory_space<vmem>>, %arg5: memref<1x64xf32, #tpu.memory_space<vmem>>, %arg6: memref<576x64xf32, #tpu.memory_space<vmem>>, %arg7: memref<1x64xf32, #tpu.memory_space<vmem>>, %arg8: memref<512x128xf32, #tpu.memory_space<vmem>>, %arg9: memref<1x128xf32, #tpu.memory_space<vmem>>, %arg10: memref<128x8xf32, #tpu.memory_space<vmem>>, %arg11: memref<1x8xf32, #tpu.memory_space<vmem>>, %arg12: memref<2x8xf32, #tpu.memory_space<vmem>>, %arg13: memref<286x32xf32, #tpu.memory_space<vmem>>, %arg14: memref<260x32xf32, #tpu.memory_space<vmem>>, %arg15: memref<6x20x64xf32, #tpu.memory_space<vmem>>) attributes {dimension_semantics = [], scalar_prefetch = 0 : i64, scratch_operands = 3 : i64, tpu.core_type = #tpu.core_type<tc>} {
    %c0 = arith.constant 0 : index
    %c0_0 = arith.constant 0 : index
    %0 = vector.load %arg0[%c0, %c0_0] : memref<286x25xf32, #tpu.memory_space<vmem>>, vector<286x25xf32>
    %c0_1 = arith.constant 0 : index
    %c0_2 = arith.constant 0 : index
    %1 = vector.load %arg2[%c0_1, %c0_2] : memref<25x32xf32, #tpu.memory_space<vmem>>, vector<25x32xf32>
    %cst = arith.constant dense<0.000000e+00> : vector<286x32xf32>
    %2 = tpu.matmul %0, %1, %cst {dimension_numbers = #tpu.dot_dimension_numbers<[1], [0], [0], [1], [0, 0, 1, 1], [], []>} : vector<286x25xf32>, vector<25x32xf32>, vector<286x32xf32> -> vector<286x32xf32>
    %c0_3 = arith.constant 0 : index
    %c0_4 = arith.constant 0 : index
    %3 = vector.load %arg3[%c0_3, %c0_4] : memref<1x32xf32, #tpu.memory_space<vmem>>, vector<1x32xf32>
    %4 = vector.broadcast %3 : vector<1x32xf32> to vector<286x32xf32>
    %5 = arith.addf %2, %4 : vector<286x32xf32>
    %cst_5 = arith.constant 0.000000e+00 : f32
    %6 = vector.broadcast %cst_5 : f32 to vector<286x32xf32>
    %7 = arith.maximumf %5, %6 : vector<286x32xf32>
    %c0_6 = arith.constant 0 : index
    %c0_7 = arith.constant 0 : index
    %8 = vector.load %arg13[%c0_6, %c0_7] : memref<286x32xf32, #tpu.memory_space<vmem>>, vector<286x32xf32>
    tpu.vector_store %arg13[%c0_6, %c0_7], %7 {strides = array<i32>} : memref<286x32xf32, #tpu.memory_space<vmem>>, vector<286x32xf32>,
    %c0_8 = arith.constant 0 : index
    %c0_9 = arith.constant 0 : index
    %9 = vector.load %arg1[%c0_8, %c0_9] : memref<260x25xf32, #tpu.memory_space<vmem>>, vector<260x25xf32>
    %c0_10 = arith.constant 0 : index
    %c0_11 = arith.constant 0 : index
    %10 = vector.load %arg2[%c0_10, %c0_11] : memref<25x32xf32, #tpu.memory_space<vmem>>, vector<25x32xf32>
    %cst_12 = arith.constant dense<0.000000e+00> : vector<260x32xf32>
    %11 = tpu.matmul %9, %10, %cst_12 {dimension_numbers = #tpu.dot_dimension_numbers<[1], [0], [0], [1], [0, 0, 1, 1], [], []>} : vector<260x25xf32>, vector<25x32xf32>, vector<260x32xf32> -> vector<260x32xf32>
    %c0_13 = arith.constant 0 : index
    %c0_14 = arith.constant 0 : index
    %12 = vector.load %arg3[%c0_13, %c0_14] : memref<1x32xf32, #tpu.memory_space<vmem>>, vector<1x32xf32>
    %13 = vector.broadcast %12 : vector<1x32xf32> to vector<260x32xf32>
    %14 = arith.addf %11, %13 : vector<260x32xf32>
    %cst_15 = arith.constant 0.000000e+00 : f32
    %15 = vector.broadcast %cst_15 : f32 to vector<260x32xf32>
    %16 = arith.maximumf %14, %15 : vector<260x32xf32>
    %c0_16 = arith.constant 0 : index
    %c0_17 = arith.constant 0 : index
    %17 = vector.load %arg14[%c0_16, %c0_17] : memref<260x32xf32, #tpu.memory_space<vmem>>, vector<260x32xf32>
    tpu.vector_store %arg14[%c0_16, %c0_17], %16 {strides = array<i32>} : memref<260x32xf32, #tpu.memory_space<vmem>>, vector<260x32xf32>,
    %c0_18 = arith.constant 0 : index
    %c0_19 = arith.constant 0 : index
    %18 = vector.load %arg4[%c0_18, %c0_19] : memref<288x64xf32, #tpu.memory_space<vmem>>, vector<288x64xf32>
    %c0_20 = arith.constant 0 : index
    %c0_21 = arith.constant 0 : index
    %19 = vector.load %arg5[%c0_20, %c0_21] : memref<1x64xf32, #tpu.memory_space<vmem>>, vector<1x64xf32>
    %c0_22 = arith.constant 0 : index
    %c0_23 = arith.constant 0 : index
    %20 = vector.load %arg13[%c0_22, %c0_23] : memref<286x32xf32, #tpu.memory_space<vmem>>, vector<10x32xf32>
    %c0_24 = arith.constant 0 : index
    %c0_25 = arith.constant 0 : index
    %21 = vector.load %arg14[%c0_24, %c0_25] : memref<260x32xf32, #tpu.memory_space<vmem>>, vector<10x32xf32>
    %c1 = arith.constant 1 : index
    %c0_26 = arith.constant 0 : index
    %22 = vector.load %arg13[%c1, %c0_26] : memref<286x32xf32, #tpu.memory_space<vmem>>, vector<10x32xf32>
    %c11 = arith.constant 11 : index
    %c0_27 = arith.constant 0 : index
    %23 = vector.load %arg13[%c11, %c0_27] : memref<286x32xf32, #tpu.memory_space<vmem>>, vector<10x32xf32>
    %c10 = arith.constant 10 : index
    %c0_28 = arith.constant 0 : index
    %24 = vector.load %arg14[%c10, %c0_28] : memref<260x32xf32, #tpu.memory_space<vmem>>, vector<10x32xf32>
    %c12 = arith.constant 12 : index
    %c0_29 = arith.constant 0 : index
    %25 = vector.load %arg13[%c12, %c0_29] : memref<286x32xf32, #tpu.memory_space<vmem>>, vector<10x32xf32>
    %c22 = arith.constant 22 : index
    %c0_30 = arith.constant 0 : index
    %26 = vector.load %arg13[%c22, %c0_30] : memref<286x32xf32, #tpu.memory_space<vmem>>, vector<10x32xf32>
    %c20 = arith.constant 20 : index
    %c0_31 = arith.constant 0 : index
    %27 = vector.load %arg14[%c20, %c0_31] : memref<260x32xf32, #tpu.memory_space<vmem>>, vector<10x32xf32>
    %c23 = arith.constant 23 : index
    %c0_32 = arith.constant 0 : index
    %28 = vector.load %arg13[%c23, %c0_32] : memref<286x32xf32, #tpu.memory_space<vmem>>, vector<10x32xf32>
    %29 = tpu.concatenate %20, %21, %22, %23, %24, %25, %26, %27, %28 in 1 : vector<10x32xf32>, vector<10x32xf32>, vector<10x32xf32>, vector<10x32xf32>, vector<10x32xf32>, vector<10x32xf32>, vector<10x32xf32>, vector<10x32xf32>, vector<10x32xf32> -> vector<10x288xf32>
    %c143 = arith.constant 143 : index
    %c0_33 = arith.constant 0 : index
    %30 = vector.load %arg13[%c143, %c0_33] : memref<286x32xf32, #tpu.memory_space<vmem>>, vector<10x32xf32>
    %c130 = arith.constant 130 : index
    %c0_34 = arith.constant 0 : index
    %31 = vector.load %arg14[%c130, %c0_34] : memref<260x32xf32, #tpu.memory_space<vmem>>, vector<10x32xf32>
    %c144 = arith.constant 144 : index
    %c0_35 = arith.constant 0 : index
    %32 = vector.load %arg13[%c144, %c0_35] : memref<286x32xf32, #tpu.memory_space<vmem>>, vector<10x32xf32>
    %c154 = arith.constant 154 : index
    %c0_36 = arith.constant 0 : index
    %33 = vector.load %arg13[%c154, %c0_36] : memref<286x32xf32, #tpu.memory_space<vmem>>, vector<10x32xf32>
    %c140 = arith.constant 140 : index
    %c0_37 = arith.constant 0 : index
    %34 = vector.load %arg14[%c140, %c0_37] : memref<260x32xf32, #tpu.memory_space<vmem>>, vector<10x32xf32>
    %c155 = arith.constant 155 : index
    %c0_38 = arith.constant 0 : index
    %35 = vector.load %arg13[%c155, %c0_38] : memref<286x32xf32, #tpu.memory_space<vmem>>, vector<10x32xf32>
    %c165 = arith.constant 165 : index
    %c0_39 = arith.constant 0 : index
    %36 = vector.load %arg13[%c165, %c0_39] : memref<286x32xf32, #tpu.memory_space<vmem>>, vector<10x32xf32>
    %c150 = arith.constant 150 : index
    %c0_40 = arith.constant 0 : index
    %37 = vector.load %arg14[%c150, %c0_40] : memref<260x32xf32, #tpu.memory_space<vmem>>, vector<10x32xf32>
    %c166 = arith.constant 166 : index
    %c0_41 = arith.constant 0 : index
    %38 = vector.load %arg13[%c166, %c0_41] : memref<286x32xf32, #tpu.memory_space<vmem>>, vector<10x32xf32>
    %39 = tpu.concatenate %30, %31, %32, %33, %34, %35, %36, %37, %38 in 1 : vector<10x32xf32>, vector<10x32xf32>, vector<10x32xf32>, vector<10x32xf32>, vector<10x32xf32>, vector<10x32xf32>, vector<10x32xf32>, vector<10x32xf32>, vector<10x32xf32> -> vector<10x288xf32>
    %40 = tpu.concatenate %29, %39 in 0 : vector<10x288xf32>, vector<10x288xf32> -> vector<20x288xf32>
    %cst_42 = arith.constant dense<0.000000e+00> : vector<20x64xf32>
    %41 = tpu.matmul %40, %18, %cst_42 {dimension_numbers = #tpu.dot_dimension_numbers<[1], [0], [0], [1], [0, 0, 1, 1], [], []>} : vector<20x288xf32>, vector<288x64xf32>, vector<20x64xf32> -> vector<20x64xf32>
    %42 = vector.broadcast %19 : vector<1x64xf32> to vector<20x64xf32>
    %43 = arith.addf %41, %42 : vector<20x64xf32>
    %cst_43 = arith.constant 0.000000e+00 : f32
    %44 = vector.broadcast %cst_43 : f32 to vector<20x64xf32>
    %45 = arith.maximumf %43, %44 : vector<20x64xf32>
    %c0_44 = arith.constant 0 : index
    %c0_45 = arith.constant 0 : index
    %c0_46 = arith.constant 0 : index
    %46 = vector.load %arg15[%c0_44, %c0_45, %c0_46] : memref<6x20x64xf32, #tpu.memory_space<vmem>>, vector<1x20x64xf32>
    %47 = vector.shape_cast %46 : vector<1x20x64xf32> to vector<20x64xf32>
    %48 = vector.shape_cast %45 : vector<20x64xf32> to vector<1x20x64xf32>
    tpu.vector_store %arg15[%c0_44, %c0_45, %c0_46], %48 {strides = array<i32>} : memref<6x20x64xf32, #tpu.memory_space<vmem>>, vector<1x20x64xf32>,
    %c22_47 = arith.constant 22 : index
    %c0_48 = arith.constant 0 : index
    %49 = vector.load %arg13[%c22_47, %c0_48] : memref<286x32xf32, #tpu.memory_space<vmem>>, vector<10x32xf32>
    %c20_49 = arith.constant 20 : index
    %c0_50 = arith.constant 0 : index
    %50 = vector.load %arg14[%c20_49, %c0_50] : memref<260x32xf32, #tpu.memory_space<vmem>>, vector<10x32xf32>
    %c23_51 = arith.constant 23 : index
    %c0_52 = arith.constant 0 : index
    %51 = vector.load %arg13[%c23_51, %c0_52] : memref<286x32xf32, #tpu.memory_space<vmem>>, vector<10x32xf32>
    %c33 = arith.constant 33 : index
    %c0_53 = arith.constant 0 : index
    %52 = vector.load %arg13[%c33, %c0_53] : memref<286x32xf32, #tpu.memory_space<vmem>>, vector<10x32xf32>
    %c30 = arith.constant 30 : index
    %c0_54 = arith.constant 0 : index
    %53 = vector.load %arg14[%c30, %c0_54] : memref<260x32xf32, #tpu.memory_space<vmem>>, vector<10x32xf32>
    %c34 = arith.constant 34 : index
    %c0_55 = arith.constant 0 : index
    %54 = vector.load %arg13[%c34, %c0_55] : memref<286x32xf32, #tpu.memory_space<vmem>>, vector<10x32xf32>
    %c44 = arith.constant 44 : index
    %c0_56 = arith.constant 0 : index
    %55 = vector.load %arg13[%c44, %c0_56] : memref<286x32xf32, #tpu.memory_space<vmem>>, vector<10x32xf32>
    %c40 = arith.constant 40 : index
    %c0_57 = arith.constant 0 : index
    %56 = vector.load %arg14[%c40, %c0_57] : memref<260x32xf32, #tpu.memory_space<vmem>>, vector<10x32xf32>
    %c45 = arith.constant 45 : index
    %c0_58 = arith.constant 0 : index
    %57 = vector.load %arg13[%c45, %c0_58] : memref<286x32xf32, #tpu.memory_space<vmem>>, vector<10x32xf32>
    %58 = tpu.concatenate %49, %50, %51, %52, %53, %54, %55, %56, %57 in 1 : vector<10x32xf32>, vector<10x32xf32>, vector<10x32xf32>, vector<10x32xf32>, vector<10x32xf32>, vector<10x32xf32>, vector<10x32xf32>, vector<10x32xf32>, vector<10x32xf32> -> vector<10x288xf32>
    %c165_59 = arith.constant 165 : index
    %c0_60 = arith.constant 0 : index
    %59 = vector.load %arg13[%c165_59, %c0_60] : memref<286x32xf32, #tpu.memory_space<vmem>>, vector<10x32xf32>
    %c150_61 = arith.constant 150 : index
    %c0_62 = arith.constant 0 : index
    %60 = vector.load %arg14[%c150_61, %c0_62] : memref<260x32xf32, #tpu.memory_space<vmem>>, vector<10x32xf32>
    %c166_63 = arith.constant 166 : index
    %c0_64 = arith.constant 0 : index
    %61 = vector.load %arg13[%c166_63, %c0_64] : memref<286x32xf32, #tpu.memory_space<vmem>>, vector<10x32xf32>
    %c176 = arith.constant 176 : index
    %c0_65 = arith.constant 0 : index
    %62 = vector.load %arg13[%c176, %c0_65] : memref<286x32xf32, #tpu.memory_space<vmem>>, vector<10x32xf32>
    %c160 = arith.constant 160 : index
    %c0_66 = arith.constant 0 : index
    %63 = vector.load %arg14[%c160, %c0_66] : memref<260x32xf32, #tpu.memory_space<vmem>>, vector<10x32xf32>
    %c177 = arith.constant 177 : index
    %c0_67 = arith.constant 0 : index
    %64 = vector.load %arg13[%c177, %c0_67] : memref<286x32xf32, #tpu.memory_space<vmem>>, vector<10x32xf32>
    %c187 = arith.constant 187 : index
    %c0_68 = arith.constant 0 : index
    %65 = vector.load %arg13[%c187, %c0_68] : memref<286x32xf32, #tpu.memory_space<vmem>>, vector<10x32xf32>
    %c170 = arith.constant 170 : index
    %c0_69 = arith.constant 0 : index
    %66 = vector.load %arg14[%c170, %c0_69] : memref<260x32xf32, #tpu.memory_space<vmem>>, vector<10x32xf32>
    %c188 = arith.constant 188 : index
    %c0_70 = arith.constant 0 : index
    %67 = vector.load %arg13[%c188, %c0_70] : memref<286x32xf32, #tpu.memory_space<vmem>>, vector<10x32xf32>
    %68 = tpu.concatenate %59, %60, %61, %62, %63, %64, %65, %66, %67 in 1 : vector<10x32xf32>, vector<10x32xf32>, vector<10x32xf32>, vector<10x32xf32>, vector<10x32xf32>, vector<10x32xf32>, vector<10x32xf32>, vector<10x32xf32>, vector<10x32xf32> -> vector<10x288xf32>
    %69 = tpu.concatenate %58, %68 in 0 : vector<10x288xf32>, vector<10x288xf32> -> vector<20x288xf32>
    %cst_71 = arith.constant dense<0.000000e+00> : vector<20x64xf32>
    %70 = tpu.matmul %69, %18, %cst_71 {dimension_numbers = #tpu.dot_dimension_numbers<[1], [0], [0], [1], [0, 0, 1, 1], [], []>} : vector<20x288xf32>, vector<288x64xf32>, vector<20x64xf32> -> vector<20x64xf32>
    %71 = vector.broadcast %19 : vector<1x64xf32> to vector<20x64xf32>
    %72 = arith.addf %70, %71 : vector<20x64xf32>
    %cst_72 = arith.constant 0.000000e+00 : f32
    %73 = vector.broadcast %cst_72 : f32 to vector<20x64xf32>
    %74 = arith.maximumf %72, %73 : vector<20x64xf32>
    %c1_73 = arith.constant 1 : index
    %c0_74 = arith.constant 0 : index
    %c0_75 = arith.constant 0 : index
    %75 = vector.load %arg15[%c1_73, %c0_74, %c0_75] : memref<6x20x64xf32, #tpu.memory_space<vmem>>, vector<1x20x64xf32>
    %76 = vector.shape_cast %75 : vector<1x20x64xf32> to vector<20x64xf32>
    %77 = vector.shape_cast %74 : vector<20x64xf32> to vector<1x20x64xf32>
    tpu.vector_store %arg15[%c1_73, %c0_74, %c0_75], %77 {strides = array<i32>} : memref<6x20x64xf32, #tpu.memory_space<vmem>>, vector<1x20x64xf32>,
    %c44_76 = arith.constant 44 : index
    %c0_77 = arith.constant 0 : index
    %78 = vector.load %arg13[%c44_76, %c0_77] : memref<286x32xf32, #tpu.memory_space<vmem>>, vector<10x32xf32>
    %c40_78 = arith.constant 40 : index
    %c0_79 = arith.constant 0 : index
    %79 = vector.load %arg14[%c40_78, %c0_79] : memref<260x32xf32, #tpu.memory_space<vmem>>, vector<10x32xf32>
    %c45_80 = arith.constant 45 : index
    %c0_81 = arith.constant 0 : index
    %80 = vector.load %arg13[%c45_80, %c0_81] : memref<286x32xf32, #tpu.memory_space<vmem>>, vector<10x32xf32>
    %c55 = arith.constant 55 : index
    %c0_82 = arith.constant 0 : index
    %81 = vector.load %arg13[%c55, %c0_82] : memref<286x32xf32, #tpu.memory_space<vmem>>, vector<10x32xf32>
    %c50 = arith.constant 50 : index
    %c0_83 = arith.constant 0 : index
    %82 = vector.load %arg14[%c50, %c0_83] : memref<260x32xf32, #tpu.memory_space<vmem>>, vector<10x32xf32>
    %c56 = arith.constant 56 : index
    %c0_84 = arith.constant 0 : index
    %83 = vector.load %arg13[%c56, %c0_84] : memref<286x32xf32, #tpu.memory_space<vmem>>, vector<10x32xf32>
    %c66 = arith.constant 66 : index
    %c0_85 = arith.constant 0 : index
    %84 = vector.load %arg13[%c66, %c0_85] : memref<286x32xf32, #tpu.memory_space<vmem>>, vector<10x32xf32>
    %c60 = arith.constant 60 : index
    %c0_86 = arith.constant 0 : index
    %85 = vector.load %arg14[%c60, %c0_86] : memref<260x32xf32, #tpu.memory_space<vmem>>, vector<10x32xf32>
    %c67 = arith.constant 67 : index
    %c0_87 = arith.constant 0 : index
    %86 = vector.load %arg13[%c67, %c0_87] : memref<286x32xf32, #tpu.memory_space<vmem>>, vector<10x32xf32>
    %87 = tpu.concatenate %78, %79, %80, %81, %82, %83, %84, %85, %86 in 1 : vector<10x32xf32>, vector<10x32xf32>, vector<10x32xf32>, vector<10x32xf32>, vector<10x32xf32>, vector<10x32xf32>, vector<10x32xf32>, vector<10x32xf32>, vector<10x32xf32> -> vector<10x288xf32>
    %c187_88 = arith.constant 187 : index
    %c0_89 = arith.constant 0 : index
    %88 = vector.load %arg13[%c187_88, %c0_89] : memref<286x32xf32, #tpu.memory_space<vmem>>, vector<10x32xf32>
    %c170_90 = arith.constant 170 : index
    %c0_91 = arith.constant 0 : index
    %89 = vector.load %arg14[%c170_90, %c0_91] : memref<260x32xf32, #tpu.memory_space<vmem>>, vector<10x32xf32>
    %c188_92 = arith.constant 188 : index
    %c0_93 = arith.constant 0 : index
    %90 = vector.load %arg13[%c188_92, %c0_93] : memref<286x32xf32, #tpu.memory_space<vmem>>, vector<10x32xf32>
    %c198 = arith.constant 198 : index
    %c0_94 = arith.constant 0 : index
    %91 = vector.load %arg13[%c198, %c0_94] : memref<286x32xf32, #tpu.memory_space<vmem>>, vector<10x32xf32>
    %c180 = arith.constant 180 : index
    %c0_95 = arith.constant 0 : index
    %92 = vector.load %arg14[%c180, %c0_95] : memref<260x32xf32, #tpu.memory_space<vmem>>, vector<10x32xf32>
    %c199 = arith.constant 199 : index
    %c0_96 = arith.constant 0 : index
    %93 = vector.load %arg13[%c199, %c0_96] : memref<286x32xf32, #tpu.memory_space<vmem>>, vector<10x32xf32>
    %c209 = arith.constant 209 : index
    %c0_97 = arith.constant 0 : index
    %94 = vector.load %arg13[%c209, %c0_97] : memref<286x32xf32, #tpu.memory_space<vmem>>, vector<10x32xf32>
    %c190 = arith.constant 190 : index
    %c0_98 = arith.constant 0 : index
    %95 = vector.load %arg14[%c190, %c0_98] : memref<260x32xf32, #tpu.memory_space<vmem>>, vector<10x32xf32>
    %c210 = arith.constant 210 : index
    %c0_99 = arith.constant 0 : index
    %96 = vector.load %arg13[%c210, %c0_99] : memref<286x32xf32, #tpu.memory_space<vmem>>, vector<10x32xf32>
    %97 = tpu.concatenate %88, %89, %90, %91, %92, %93, %94, %95, %96 in 1 : vector<10x32xf32>, vector<10x32xf32>, vector<10x32xf32>, vector<10x32xf32>, vector<10x32xf32>, vector<10x32xf32>, vector<10x32xf32>, vector<10x32xf32>, vector<10x32xf32> -> vector<10x288xf32>
    %98 = tpu.concatenate %87, %97 in 0 : vector<10x288xf32>, vector<10x288xf32> -> vector<20x288xf32>
    %cst_100 = arith.constant dense<0.000000e+00> : vector<20x64xf32>
    %99 = tpu.matmul %98, %18, %cst_100 {dimension_numbers = #tpu.dot_dimension_numbers<[1], [0], [0], [1], [0, 0, 1, 1], [], []>} : vector<20x288xf32>, vector<288x64xf32>, vector<20x64xf32> -> vector<20x64xf32>
    %100 = vector.broadcast %19 : vector<1x64xf32> to vector<20x64xf32>
    %101 = arith.addf %99, %100 : vector<20x64xf32>
    %cst_101 = arith.constant 0.000000e+00 : f32
    %102 = vector.broadcast %cst_101 : f32 to vector<20x64xf32>
    %103 = arith.maximumf %101, %102 : vector<20x64xf32>
    %c2 = arith.constant 2 : index
    %c0_102 = arith.constant 0 : index
    %c0_103 = arith.constant 0 : index
    %104 = vector.load %arg15[%c2, %c0_102, %c0_103] : memref<6x20x64xf32, #tpu.memory_space<vmem>>, vector<1x20x64xf32>
    %105 = vector.shape_cast %104 : vector<1x20x64xf32> to vector<20x64xf32>
    %106 = vector.shape_cast %103 : vector<20x64xf32> to vector<1x20x64xf32>
    tpu.vector_store %arg15[%c2, %c0_102, %c0_103], %106 {strides = array<i32>} : memref<6x20x64xf32, #tpu.memory_space<vmem>>, vector<1x20x64xf32>,
    %c66_104 = arith.constant 66 : index
    %c0_105 = arith.constant 0 : index
    %107 = vector.load %arg13[%c66_104, %c0_105] : memref<286x32xf32, #tpu.memory_space<vmem>>, vector<10x32xf32>
    %c60_106 = arith.constant 60 : index
    %c0_107 = arith.constant 0 : index
    %108 = vector.load %arg14[%c60_106, %c0_107] : memref<260x32xf32, #tpu.memory_space<vmem>>, vector<10x32xf32>
    %c67_108 = arith.constant 67 : index
    %c0_109 = arith.constant 0 : index
    %109 = vector.load %arg13[%c67_108, %c0_109] : memref<286x32xf32, #tpu.memory_space<vmem>>, vector<10x32xf32>
    %c77 = arith.constant 77 : index
    %c0_110 = arith.constant 0 : index
    %110 = vector.load %arg13[%c77, %c0_110] : memref<286x32xf32, #tpu.memory_space<vmem>>, vector<10x32xf32>
    %c70 = arith.constant 70 : index
    %c0_111 = arith.constant 0 : index
    %111 = vector.load %arg14[%c70, %c0_111] : memref<260x32xf32, #tpu.memory_space<vmem>>, vector<10x32xf32>
    %c78 = arith.constant 78 : index
    %c0_112 = arith.constant 0 : index
    %112 = vector.load %arg13[%c78, %c0_112] : memref<286x32xf32, #tpu.memory_space<vmem>>, vector<10x32xf32>
    %c88 = arith.constant 88 : index
    %c0_113 = arith.constant 0 : index
    %113 = vector.load %arg13[%c88, %c0_113] : memref<286x32xf32, #tpu.memory_space<vmem>>, vector<10x32xf32>
    %c80 = arith.constant 80 : index
    %c0_114 = arith.constant 0 : index
    %114 = vector.load %arg14[%c80, %c0_114] : memref<260x32xf32, #tpu.memory_space<vmem>>, vector<10x32xf32>
    %c89 = arith.constant 89 : index
    %c0_115 = arith.constant 0 : index
    %115 = vector.load %arg13[%c89, %c0_115] : memref<286x32xf32, #tpu.memory_space<vmem>>, vector<10x32xf32>
    %116 = tpu.concatenate %107, %108, %109, %110, %111, %112, %113, %114, %115 in 1 : vector<10x32xf32>, vector<10x32xf32>, vector<10x32xf32>, vector<10x32xf32>, vector<10x32xf32>, vector<10x32xf32>, vector<10x32xf32>, vector<10x32xf32>, vector<10x32xf32> -> vector<10x288xf32>
    %c209_116 = arith.constant 209 : index
    %c0_117 = arith.constant 0 : index
    %117 = vector.load %arg13[%c209_116, %c0_117] : memref<286x32xf32, #tpu.memory_space<vmem>>, vector<10x32xf32>
    %c190_118 = arith.constant 190 : index
    %c0_119 = arith.constant 0 : index
    %118 = vector.load %arg14[%c190_118, %c0_119] : memref<260x32xf32, #tpu.memory_space<vmem>>, vector<10x32xf32>
    %c210_120 = arith.constant 210 : index
    %c0_121 = arith.constant 0 : index
    %119 = vector.load %arg13[%c210_120, %c0_121] : memref<286x32xf32, #tpu.memory_space<vmem>>, vector<10x32xf32>
    %c220 = arith.constant 220 : index
    %c0_122 = arith.constant 0 : index
    %120 = vector.load %arg13[%c220, %c0_122] : memref<286x32xf32, #tpu.memory_space<vmem>>, vector<10x32xf32>
    %c200 = arith.constant 200 : index
    %c0_123 = arith.constant 0 : index
    %121 = vector.load %arg14[%c200, %c0_123] : memref<260x32xf32, #tpu.memory_space<vmem>>, vector<10x32xf32>
    %c221 = arith.constant 221 : index
    %c0_124 = arith.constant 0 : index
    %122 = vector.load %arg13[%c221, %c0_124] : memref<286x32xf32, #tpu.memory_space<vmem>>, vector<10x32xf32>
    %c231 = arith.constant 231 : index
    %c0_125 = arith.constant 0 : index
    %123 = vector.load %arg13[%c231, %c0_125] : memref<286x32xf32, #tpu.memory_space<vmem>>, vector<10x32xf32>
    %c210_126 = arith.constant 210 : index
    %c0_127 = arith.constant 0 : index
    %124 = vector.load %arg14[%c210_126, %c0_127] : memref<260x32xf32, #tpu.memory_space<vmem>>, vector<10x32xf32>
    %c232 = arith.constant 232 : index
    %c0_128 = arith.constant 0 : index
    %125 = vector.load %arg13[%c232, %c0_128] : memref<286x32xf32, #tpu.memory_space<vmem>>, vector<10x32xf32>
    %126 = tpu.concatenate %117, %118, %119, %120, %121, %122, %123, %124, %125 in 1 : vector<10x32xf32>, vector<10x32xf32>, vector<10x32xf32>, vector<10x32xf32>, vector<10x32xf32>, vector<10x32xf32>, vector<10x32xf32>, vector<10x32xf32>, vector<10x32xf32> -> vector<10x288xf32>
    %127 = tpu.concatenate %116, %126 in 0 : vector<10x288xf32>, vector<10x288xf32> -> vector<20x288xf32>
    %cst_129 = arith.constant dense<0.000000e+00> : vector<20x64xf32>
    %128 = tpu.matmul %127, %18, %cst_129 {dimension_numbers = #tpu.dot_dimension_numbers<[1], [0], [0], [1], [0, 0, 1, 1], [], []>} : vector<20x288xf32>, vector<288x64xf32>, vector<20x64xf32> -> vector<20x64xf32>
    %129 = vector.broadcast %19 : vector<1x64xf32> to vector<20x64xf32>
    %130 = arith.addf %128, %129 : vector<20x64xf32>
    %cst_130 = arith.constant 0.000000e+00 : f32
    %131 = vector.broadcast %cst_130 : f32 to vector<20x64xf32>
    %132 = arith.maximumf %130, %131 : vector<20x64xf32>
    %c3 = arith.constant 3 : index
    %c0_131 = arith.constant 0 : index
    %c0_132 = arith.constant 0 : index
    %133 = vector.load %arg15[%c3, %c0_131, %c0_132] : memref<6x20x64xf32, #tpu.memory_space<vmem>>, vector<1x20x64xf32>
    %134 = vector.shape_cast %133 : vector<1x20x64xf32> to vector<20x64xf32>
    %135 = vector.shape_cast %132 : vector<20x64xf32> to vector<1x20x64xf32>
    tpu.vector_store %arg15[%c3, %c0_131, %c0_132], %135 {strides = array<i32>} : memref<6x20x64xf32, #tpu.memory_space<vmem>>, vector<1x20x64xf32>,
    %c88_133 = arith.constant 88 : index
    %c0_134 = arith.constant 0 : index
    %136 = vector.load %arg13[%c88_133, %c0_134] : memref<286x32xf32, #tpu.memory_space<vmem>>, vector<10x32xf32>
    %c80_135 = arith.constant 80 : index
    %c0_136 = arith.constant 0 : index
    %137 = vector.load %arg14[%c80_135, %c0_136] : memref<260x32xf32, #tpu.memory_space<vmem>>, vector<10x32xf32>
    %c89_137 = arith.constant 89 : index
    %c0_138 = arith.constant 0 : index
    %138 = vector.load %arg13[%c89_137, %c0_138] : memref<286x32xf32, #tpu.memory_space<vmem>>, vector<10x32xf32>
    %c99 = arith.constant 99 : index
    %c0_139 = arith.constant 0 : index
    %139 = vector.load %arg13[%c99, %c0_139] : memref<286x32xf32, #tpu.memory_space<vmem>>, vector<10x32xf32>
    %c90 = arith.constant 90 : index
    %c0_140 = arith.constant 0 : index
    %140 = vector.load %arg14[%c90, %c0_140] : memref<260x32xf32, #tpu.memory_space<vmem>>, vector<10x32xf32>
    %c100 = arith.constant 100 : index
    %c0_141 = arith.constant 0 : index
    %141 = vector.load %arg13[%c100, %c0_141] : memref<286x32xf32, #tpu.memory_space<vmem>>, vector<10x32xf32>
    %c110 = arith.constant 110 : index
    %c0_142 = arith.constant 0 : index
    %142 = vector.load %arg13[%c110, %c0_142] : memref<286x32xf32, #tpu.memory_space<vmem>>, vector<10x32xf32>
    %c100_143 = arith.constant 100 : index
    %c0_144 = arith.constant 0 : index
    %143 = vector.load %arg14[%c100_143, %c0_144] : memref<260x32xf32, #tpu.memory_space<vmem>>, vector<10x32xf32>
    %c111 = arith.constant 111 : index
    %c0_145 = arith.constant 0 : index
    %144 = vector.load %arg13[%c111, %c0_145] : memref<286x32xf32, #tpu.memory_space<vmem>>, vector<10x32xf32>
    %145 = tpu.concatenate %136, %137, %138, %139, %140, %141, %142, %143, %144 in 1 : vector<10x32xf32>, vector<10x32xf32>, vector<10x32xf32>, vector<10x32xf32>, vector<10x32xf32>, vector<10x32xf32>, vector<10x32xf32>, vector<10x32xf32>, vector<10x32xf32> -> vector<10x288xf32>
    %c231_146 = arith.constant 231 : index
    %c0_147 = arith.constant 0 : index
    %146 = vector.load %arg13[%c231_146, %c0_147] : memref<286x32xf32, #tpu.memory_space<vmem>>, vector<10x32xf32>
    %c210_148 = arith.constant 210 : index
    %c0_149 = arith.constant 0 : index
    %147 = vector.load %arg14[%c210_148, %c0_149] : memref<260x32xf32, #tpu.memory_space<vmem>>, vector<10x32xf32>
    %c232_150 = arith.constant 232 : index
    %c0_151 = arith.constant 0 : index
    %148 = vector.load %arg13[%c232_150, %c0_151] : memref<286x32xf32, #tpu.memory_space<vmem>>, vector<10x32xf32>
    %c242 = arith.constant 242 : index
    %c0_152 = arith.constant 0 : index
    %149 = vector.load %arg13[%c242, %c0_152] : memref<286x32xf32, #tpu.memory_space<vmem>>, vector<10x32xf32>
    %c220_153 = arith.constant 220 : index
    %c0_154 = arith.constant 0 : index
    %150 = vector.load %arg14[%c220_153, %c0_154] : memref<260x32xf32, #tpu.memory_space<vmem>>, vector<10x32xf32>
    %c243 = arith.constant 243 : index
    %c0_155 = arith.constant 0 : index
    %151 = vector.load %arg13[%c243, %c0_155] : memref<286x32xf32, #tpu.memory_space<vmem>>, vector<10x32xf32>
    %c253 = arith.constant 253 : index
    %c0_156 = arith.constant 0 : index
    %152 = vector.load %arg13[%c253, %c0_156] : memref<286x32xf32, #tpu.memory_space<vmem>>, vector<10x32xf32>
    %c230 = arith.constant 230 : index
    %c0_157 = arith.constant 0 : index
    %153 = vector.load %arg14[%c230, %c0_157] : memref<260x32xf32, #tpu.memory_space<vmem>>, vector<10x32xf32>
    %c254 = arith.constant 254 : index
    %c0_158 = arith.constant 0 : index
    %154 = vector.load %arg13[%c254, %c0_158] : memref<286x32xf32, #tpu.memory_space<vmem>>, vector<10x32xf32>
    %155 = tpu.concatenate %146, %147, %148, %149, %150, %151, %152, %153, %154 in 1 : vector<10x32xf32>, vector<10x32xf32>, vector<10x32xf32>, vector<10x32xf32>, vector<10x32xf32>, vector<10x32xf32>, vector<10x32xf32>, vector<10x32xf32>, vector<10x32xf32> -> vector<10x288xf32>
    %156 = tpu.concatenate %145, %155 in 0 : vector<10x288xf32>, vector<10x288xf32> -> vector<20x288xf32>
    %cst_159 = arith.constant dense<0.000000e+00> : vector<20x64xf32>
    %157 = tpu.matmul %156, %18, %cst_159 {dimension_numbers = #tpu.dot_dimension_numbers<[1], [0], [0], [1], [0, 0, 1, 1], [], []>} : vector<20x288xf32>, vector<288x64xf32>, vector<20x64xf32> -> vector<20x64xf32>
    %158 = vector.broadcast %19 : vector<1x64xf32> to vector<20x64xf32>
    %159 = arith.addf %157, %158 : vector<20x64xf32>
    %cst_160 = arith.constant 0.000000e+00 : f32
    %160 = vector.broadcast %cst_160 : f32 to vector<20x64xf32>
    %161 = arith.maximumf %159, %160 : vector<20x64xf32>
    %c4 = arith.constant 4 : index
    %c0_161 = arith.constant 0 : index
    %c0_162 = arith.constant 0 : index
    %162 = vector.load %arg15[%c4, %c0_161, %c0_162] : memref<6x20x64xf32, #tpu.memory_space<vmem>>, vector<1x20x64xf32>
    %163 = vector.shape_cast %162 : vector<1x20x64xf32> to vector<20x64xf32>
    %164 = vector.shape_cast %161 : vector<20x64xf32> to vector<1x20x64xf32>
    tpu.vector_store %arg15[%c4, %c0_161, %c0_162], %164 {strides = array<i32>} : memref<6x20x64xf32, #tpu.memory_space<vmem>>, vector<1x20x64xf32>,
    %c110_163 = arith.constant 110 : index
    %c0_164 = arith.constant 0 : index
    %165 = vector.load %arg13[%c110_163, %c0_164] : memref<286x32xf32, #tpu.memory_space<vmem>>, vector<10x32xf32>
    %c100_165 = arith.constant 100 : index
    %c0_166 = arith.constant 0 : index
    %166 = vector.load %arg14[%c100_165, %c0_166] : memref<260x32xf32, #tpu.memory_space<vmem>>, vector<10x32xf32>
    %c111_167 = arith.constant 111 : index
    %c0_168 = arith.constant 0 : index
    %167 = vector.load %arg13[%c111_167, %c0_168] : memref<286x32xf32, #tpu.memory_space<vmem>>, vector<10x32xf32>
    %c121 = arith.constant 121 : index
    %c0_169 = arith.constant 0 : index
    %168 = vector.load %arg13[%c121, %c0_169] : memref<286x32xf32, #tpu.memory_space<vmem>>, vector<10x32xf32>
    %c110_170 = arith.constant 110 : index
    %c0_171 = arith.constant 0 : index
    %169 = vector.load %arg14[%c110_170, %c0_171] : memref<260x32xf32, #tpu.memory_space<vmem>>, vector<10x32xf32>
    %c122 = arith.constant 122 : index
    %c0_172 = arith.constant 0 : index
    %170 = vector.load %arg13[%c122, %c0_172] : memref<286x32xf32, #tpu.memory_space<vmem>>, vector<10x32xf32>
    %c132 = arith.constant 132 : index
    %c0_173 = arith.constant 0 : index
    %171 = vector.load %arg13[%c132, %c0_173] : memref<286x32xf32, #tpu.memory_space<vmem>>, vector<10x32xf32>
    %c120 = arith.constant 120 : index
    %c0_174 = arith.constant 0 : index
    %172 = vector.load %arg14[%c120, %c0_174] : memref<260x32xf32, #tpu.memory_space<vmem>>, vector<10x32xf32>
    %c133 = arith.constant 133 : index
    %c0_175 = arith.constant 0 : index
    %173 = vector.load %arg13[%c133, %c0_175] : memref<286x32xf32, #tpu.memory_space<vmem>>, vector<10x32xf32>
    %174 = tpu.concatenate %165, %166, %167, %168, %169, %170, %171, %172, %173 in 1 : vector<10x32xf32>, vector<10x32xf32>, vector<10x32xf32>, vector<10x32xf32>, vector<10x32xf32>, vector<10x32xf32>, vector<10x32xf32>, vector<10x32xf32>, vector<10x32xf32> -> vector<10x288xf32>
    %c253_176 = arith.constant 253 : index
    %c0_177 = arith.constant 0 : index
    %175 = vector.load %arg13[%c253_176, %c0_177] : memref<286x32xf32, #tpu.memory_space<vmem>>, vector<10x32xf32>
    %c230_178 = arith.constant 230 : index
    %c0_179 = arith.constant 0 : index
    %176 = vector.load %arg14[%c230_178, %c0_179] : memref<260x32xf32, #tpu.memory_space<vmem>>, vector<10x32xf32>
    %c254_180 = arith.constant 254 : index
    %c0_181 = arith.constant 0 : index
    %177 = vector.load %arg13[%c254_180, %c0_181] : memref<286x32xf32, #tpu.memory_space<vmem>>, vector<10x32xf32>
    %c264 = arith.constant 264 : index
    %c0_182 = arith.constant 0 : index
    %178 = vector.load %arg13[%c264, %c0_182] : memref<286x32xf32, #tpu.memory_space<vmem>>, vector<10x32xf32>
    %c240 = arith.constant 240 : index
    %c0_183 = arith.constant 0 : index
    %179 = vector.load %arg14[%c240, %c0_183] : memref<260x32xf32, #tpu.memory_space<vmem>>, vector<10x32xf32>
    %c265 = arith.constant 265 : index
    %c0_184 = arith.constant 0 : index
    %180 = vector.load %arg13[%c265, %c0_184] : memref<286x32xf32, #tpu.memory_space<vmem>>, vector<10x32xf32>
    %c275 = arith.constant 275 : index
    %c0_185 = arith.constant 0 : index
    %181 = vector.load %arg13[%c275, %c0_185] : memref<286x32xf32, #tpu.memory_space<vmem>>, vector<10x32xf32>
    %c250 = arith.constant 250 : index
    %c0_186 = arith.constant 0 : index
    %182 = vector.load %arg14[%c250, %c0_186] : memref<260x32xf32, #tpu.memory_space<vmem>>, vector<10x32xf32>
    %c276 = arith.constant 276 : index
    %c0_187 = arith.constant 0 : index
    %183 = vector.load %arg13[%c276, %c0_187] : memref<286x32xf32, #tpu.memory_space<vmem>>, vector<10x32xf32>
    %184 = tpu.concatenate %175, %176, %177, %178, %179, %180, %181, %182, %183 in 1 : vector<10x32xf32>, vector<10x32xf32>, vector<10x32xf32>, vector<10x32xf32>, vector<10x32xf32>, vector<10x32xf32>, vector<10x32xf32>, vector<10x32xf32>, vector<10x32xf32> -> vector<10x288xf32>
    %185 = tpu.concatenate %174, %184 in 0 : vector<10x288xf32>, vector<10x288xf32> -> vector<20x288xf32>
    %cst_188 = arith.constant dense<0.000000e+00> : vector<20x64xf32>
    %186 = tpu.matmul %185, %18, %cst_188 {dimension_numbers = #tpu.dot_dimension_numbers<[1], [0], [0], [1], [0, 0, 1, 1], [], []>} : vector<20x288xf32>, vector<288x64xf32>, vector<20x64xf32> -> vector<20x64xf32>
    %187 = vector.broadcast %19 : vector<1x64xf32> to vector<20x64xf32>
    %188 = arith.addf %186, %187 : vector<20x64xf32>
    %cst_189 = arith.constant 0.000000e+00 : f32
    %189 = vector.broadcast %cst_189 : f32 to vector<20x64xf32>
    %190 = arith.maximumf %188, %189 : vector<20x64xf32>
    %c5 = arith.constant 5 : index
    %c0_190 = arith.constant 0 : index
    %c0_191 = arith.constant 0 : index
    %191 = vector.load %arg15[%c5, %c0_190, %c0_191] : memref<6x20x64xf32, #tpu.memory_space<vmem>>, vector<1x20x64xf32>
    %192 = vector.shape_cast %191 : vector<1x20x64xf32> to vector<20x64xf32>
    %193 = vector.shape_cast %190 : vector<20x64xf32> to vector<1x20x64xf32>
    tpu.vector_store %arg15[%c5, %c0_190, %c0_191], %193 {strides = array<i32>} : memref<6x20x64xf32, #tpu.memory_space<vmem>>, vector<1x20x64xf32>,
    %c0_192 = arith.constant 0 : index
    %c0_193 = arith.constant 0 : index
    %c0_194 = arith.constant 0 : index
    %194 = vector.load %arg15[%c0_192, %c0_193, %c0_194] : memref<6x20x64xf32, #tpu.memory_space<vmem>>, vector<1x1x64xf32>
    %195 = vector.shape_cast %194 : vector<1x1x64xf32> to vector<1x64xf32>
    %c0_195 = arith.constant 0 : index
    %c1_196 = arith.constant 1 : index
    %c0_197 = arith.constant 0 : index
    %196 = vector.load %arg15[%c0_195, %c1_196, %c0_197] : memref<6x20x64xf32, #tpu.memory_space<vmem>>, vector<1x1x64xf32>
    %197 = vector.shape_cast %196 : vector<1x1x64xf32> to vector<1x64xf32>
    %c0_198 = arith.constant 0 : index
    %c2_199 = arith.constant 2 : index
    %c0_200 = arith.constant 0 : index
    %198 = vector.load %arg15[%c0_198, %c2_199, %c0_200] : memref<6x20x64xf32, #tpu.memory_space<vmem>>, vector<1x1x64xf32>
    %199 = vector.shape_cast %198 : vector<1x1x64xf32> to vector<1x64xf32>
    %c1_201 = arith.constant 1 : index
    %c0_202 = arith.constant 0 : index
    %c0_203 = arith.constant 0 : index
    %200 = vector.load %arg15[%c1_201, %c0_202, %c0_203] : memref<6x20x64xf32, #tpu.memory_space<vmem>>, vector<1x1x64xf32>
    %201 = vector.shape_cast %200 : vector<1x1x64xf32> to vector<1x64xf32>
    %c1_204 = arith.constant 1 : index
    %c1_205 = arith.constant 1 : index
    %c0_206 = arith.constant 0 : index
    %202 = vector.load %arg15[%c1_204, %c1_205, %c0_206] : memref<6x20x64xf32, #tpu.memory_space<vmem>>, vector<1x1x64xf32>
    %203 = vector.shape_cast %202 : vector<1x1x64xf32> to vector<1x64xf32>
    %c1_207 = arith.constant 1 : index
    %c2_208 = arith.constant 2 : index
    %c0_209 = arith.constant 0 : index
    %204 = vector.load %arg15[%c1_207, %c2_208, %c0_209] : memref<6x20x64xf32, #tpu.memory_space<vmem>>, vector<1x1x64xf32>
    %205 = vector.shape_cast %204 : vector<1x1x64xf32> to vector<1x64xf32>
    %c2_210 = arith.constant 2 : index
    %c0_211 = arith.constant 0 : index
    %c0_212 = arith.constant 0 : index
    %206 = vector.load %arg15[%c2_210, %c0_211, %c0_212] : memref<6x20x64xf32, #tpu.memory_space<vmem>>, vector<1x1x64xf32>
    %207 = vector.shape_cast %206 : vector<1x1x64xf32> to vector<1x64xf32>
    %c2_213 = arith.constant 2 : index
    %c1_214 = arith.constant 1 : index
    %c0_215 = arith.constant 0 : index
    %208 = vector.load %arg15[%c2_213, %c1_214, %c0_215] : memref<6x20x64xf32, #tpu.memory_space<vmem>>, vector<1x1x64xf32>
    %209 = vector.shape_cast %208 : vector<1x1x64xf32> to vector<1x64xf32>
    %c2_216 = arith.constant 2 : index
    %c2_217 = arith.constant 2 : index
    %c0_218 = arith.constant 0 : index
    %210 = vector.load %arg15[%c2_216, %c2_217, %c0_218] : memref<6x20x64xf32, #tpu.memory_space<vmem>>, vector<1x1x64xf32>
    %211 = vector.shape_cast %210 : vector<1x1x64xf32> to vector<1x64xf32>
    %212 = tpu.concatenate %195, %197, %199, %201, %203, %205, %207, %209, %211 in 1 : vector<1x64xf32>, vector<1x64xf32>, vector<1x64xf32>, vector<1x64xf32>, vector<1x64xf32>, vector<1x64xf32>, vector<1x64xf32>, vector<1x64xf32>, vector<1x64xf32> -> vector<1x576xf32>
    %c0_219 = arith.constant 0 : index
    %c2_220 = arith.constant 2 : index
    %c0_221 = arith.constant 0 : index
    %213 = vector.load %arg15[%c0_219, %c2_220, %c0_221] : memref<6x20x64xf32, #tpu.memory_space<vmem>>, vector<1x1x64xf32>
    %214 = vector.shape_cast %213 : vector<1x1x64xf32> to vector<1x64xf32>
    %c0_222 = arith.constant 0 : index
    %c3_223 = arith.constant 3 : index
    %c0_224 = arith.constant 0 : index
    %215 = vector.load %arg15[%c0_222, %c3_223, %c0_224] : memref<6x20x64xf32, #tpu.memory_space<vmem>>, vector<1x1x64xf32>
    %216 = vector.shape_cast %215 : vector<1x1x64xf32> to vector<1x64xf32>
    %c0_225 = arith.constant 0 : index
    %c4_226 = arith.constant 4 : index
    %c0_227 = arith.constant 0 : index
    %217 = vector.load %arg15[%c0_225, %c4_226, %c0_227] : memref<6x20x64xf32, #tpu.memory_space<vmem>>, vector<1x1x64xf32>
    %218 = vector.shape_cast %217 : vector<1x1x64xf32> to vector<1x64xf32>
    %c1_228 = arith.constant 1 : index
    %c2_229 = arith.constant 2 : index
    %c0_230 = arith.constant 0 : index
    %219 = vector.load %arg15[%c1_228, %c2_229, %c0_230] : memref<6x20x64xf32, #tpu.memory_space<vmem>>, vector<1x1x64xf32>
    %220 = vector.shape_cast %219 : vector<1x1x64xf32> to vector<1x64xf32>
    %c1_231 = arith.constant 1 : index
    %c3_232 = arith.constant 3 : index
    %c0_233 = arith.constant 0 : index
    %221 = vector.load %arg15[%c1_231, %c3_232, %c0_233] : memref<6x20x64xf32, #tpu.memory_space<vmem>>, vector<1x1x64xf32>
    %222 = vector.shape_cast %221 : vector<1x1x64xf32> to vector<1x64xf32>
    %c1_234 = arith.constant 1 : index
    %c4_235 = arith.constant 4 : index
    %c0_236 = arith.constant 0 : index
    %223 = vector.load %arg15[%c1_234, %c4_235, %c0_236] : memref<6x20x64xf32, #tpu.memory_space<vmem>>, vector<1x1x64xf32>
    %224 = vector.shape_cast %223 : vector<1x1x64xf32> to vector<1x64xf32>
    %c2_237 = arith.constant 2 : index
    %c2_238 = arith.constant 2 : index
    %c0_239 = arith.constant 0 : index
    %225 = vector.load %arg15[%c2_237, %c2_238, %c0_239] : memref<6x20x64xf32, #tpu.memory_space<vmem>>, vector<1x1x64xf32>
    %226 = vector.shape_cast %225 : vector<1x1x64xf32> to vector<1x64xf32>
    %c2_240 = arith.constant 2 : index
    %c3_241 = arith.constant 3 : index
    %c0_242 = arith.constant 0 : index
    %227 = vector.load %arg15[%c2_240, %c3_241, %c0_242] : memref<6x20x64xf32, #tpu.memory_space<vmem>>, vector<1x1x64xf32>
    %228 = vector.shape_cast %227 : vector<1x1x64xf32> to vector<1x64xf32>
    %c2_243 = arith.constant 2 : index
    %c4_244 = arith.constant 4 : index
    %c0_245 = arith.constant 0 : index
    %229 = vector.load %arg15[%c2_243, %c4_244, %c0_245] : memref<6x20x64xf32, #tpu.memory_space<vmem>>, vector<1x1x64xf32>
    %230 = vector.shape_cast %229 : vector<1x1x64xf32> to vector<1x64xf32>
    %231 = tpu.concatenate %214, %216, %218, %220, %222, %224, %226, %228, %230 in 1 : vector<1x64xf32>, vector<1x64xf32>, vector<1x64xf32>, vector<1x64xf32>, vector<1x64xf32>, vector<1x64xf32>, vector<1x64xf32>, vector<1x64xf32>, vector<1x64xf32> -> vector<1x576xf32>
    %c0_246 = arith.constant 0 : index
    %c4_247 = arith.constant 4 : index
    %c0_248 = arith.constant 0 : index
    %232 = vector.load %arg15[%c0_246, %c4_247, %c0_248] : memref<6x20x64xf32, #tpu.memory_space<vmem>>, vector<1x1x64xf32>
    %233 = vector.shape_cast %232 : vector<1x1x64xf32> to vector<1x64xf32>
    %c0_249 = arith.constant 0 : index
    %c5_250 = arith.constant 5 : index
    %c0_251 = arith.constant 0 : index
    %234 = vector.load %arg15[%c0_249, %c5_250, %c0_251] : memref<6x20x64xf32, #tpu.memory_space<vmem>>, vector<1x1x64xf32>
    %235 = vector.shape_cast %234 : vector<1x1x64xf32> to vector<1x64xf32>
    %c0_252 = arith.constant 0 : index
    %c6 = arith.constant 6 : index
    %c0_253 = arith.constant 0 : index
    %236 = vector.load %arg15[%c0_252, %c6, %c0_253] : memref<6x20x64xf32, #tpu.memory_space<vmem>>, vector<1x1x64xf32>
    %237 = vector.shape_cast %236 : vector<1x1x64xf32> to vector<1x64xf32>
    %c1_254 = arith.constant 1 : index
    %c4_255 = arith.constant 4 : index
    %c0_256 = arith.constant 0 : index
    %238 = vector.load %arg15[%c1_254, %c4_255, %c0_256] : memref<6x20x64xf32, #tpu.memory_space<vmem>>, vector<1x1x64xf32>
    %239 = vector.shape_cast %238 : vector<1x1x64xf32> to vector<1x64xf32>
    %c1_257 = arith.constant 1 : index
    %c5_258 = arith.constant 5 : index
    %c0_259 = arith.constant 0 : index
    %240 = vector.load %arg15[%c1_257, %c5_258, %c0_259] : memref<6x20x64xf32, #tpu.memory_space<vmem>>, vector<1x1x64xf32>
    %241 = vector.shape_cast %240 : vector<1x1x64xf32> to vector<1x64xf32>
    %c1_260 = arith.constant 1 : index
    %c6_261 = arith.constant 6 : index
    %c0_262 = arith.constant 0 : index
    %242 = vector.load %arg15[%c1_260, %c6_261, %c0_262] : memref<6x20x64xf32, #tpu.memory_space<vmem>>, vector<1x1x64xf32>
    %243 = vector.shape_cast %242 : vector<1x1x64xf32> to vector<1x64xf32>
    %c2_263 = arith.constant 2 : index
    %c4_264 = arith.constant 4 : index
    %c0_265 = arith.constant 0 : index
    %244 = vector.load %arg15[%c2_263, %c4_264, %c0_265] : memref<6x20x64xf32, #tpu.memory_space<vmem>>, vector<1x1x64xf32>
    %245 = vector.shape_cast %244 : vector<1x1x64xf32> to vector<1x64xf32>
    %c2_266 = arith.constant 2 : index
    %c5_267 = arith.constant 5 : index
    %c0_268 = arith.constant 0 : index
    %246 = vector.load %arg15[%c2_266, %c5_267, %c0_268] : memref<6x20x64xf32, #tpu.memory_space<vmem>>, vector<1x1x64xf32>
    %247 = vector.shape_cast %246 : vector<1x1x64xf32> to vector<1x64xf32>
    %c2_269 = arith.constant 2 : index
    %c6_270 = arith.constant 6 : index
    %c0_271 = arith.constant 0 : index
    %248 = vector.load %arg15[%c2_269, %c6_270, %c0_271] : memref<6x20x64xf32, #tpu.memory_space<vmem>>, vector<1x1x64xf32>
    %249 = vector.shape_cast %248 : vector<1x1x64xf32> to vector<1x64xf32>
    %250 = tpu.concatenate %233, %235, %237, %239, %241, %243, %245, %247, %249 in 1 : vector<1x64xf32>, vector<1x64xf32>, vector<1x64xf32>, vector<1x64xf32>, vector<1x64xf32>, vector<1x64xf32>, vector<1x64xf32>, vector<1x64xf32>, vector<1x64xf32> -> vector<1x576xf32>
    %c0_272 = arith.constant 0 : index
    %c6_273 = arith.constant 6 : index
    %c0_274 = arith.constant 0 : index
    %251 = vector.load %arg15[%c0_272, %c6_273, %c0_274] : memref<6x20x64xf32, #tpu.memory_space<vmem>>, vector<1x1x64xf32>
    %252 = vector.shape_cast %251 : vector<1x1x64xf32> to vector<1x64xf32>
    %c0_275 = arith.constant 0 : index
    %c7 = arith.constant 7 : index
    %c0_276 = arith.constant 0 : index
    %253 = vector.load %arg15[%c0_275, %c7, %c0_276] : memref<6x20x64xf32, #tpu.memory_space<vmem>>, vector<1x1x64xf32>
    %254 = vector.shape_cast %253 : vector<1x1x64xf32> to vector<1x64xf32>
    %c0_277 = arith.constant 0 : index
    %c8 = arith.constant 8 : index
    %c0_278 = arith.constant 0 : index
    %255 = vector.load %arg15[%c0_277, %c8, %c0_278] : memref<6x20x64xf32, #tpu.memory_space<vmem>>, vector<1x1x64xf32>
    %256 = vector.shape_cast %255 : vector<1x1x64xf32> to vector<1x64xf32>
    %c1_279 = arith.constant 1 : index
    %c6_280 = arith.constant 6 : index
    %c0_281 = arith.constant 0 : index
    %257 = vector.load %arg15[%c1_279, %c6_280, %c0_281] : memref<6x20x64xf32, #tpu.memory_space<vmem>>, vector<1x1x64xf32>
    %258 = vector.shape_cast %257 : vector<1x1x64xf32> to vector<1x64xf32>
    %c1_282 = arith.constant 1 : index
    %c7_283 = arith.constant 7 : index
    %c0_284 = arith.constant 0 : index
    %259 = vector.load %arg15[%c1_282, %c7_283, %c0_284] : memref<6x20x64xf32, #tpu.memory_space<vmem>>, vector<1x1x64xf32>
    %260 = vector.shape_cast %259 : vector<1x1x64xf32> to vector<1x64xf32>
    %c1_285 = arith.constant 1 : index
    %c8_286 = arith.constant 8 : index
    %c0_287 = arith.constant 0 : index
    %261 = vector.load %arg15[%c1_285, %c8_286, %c0_287] : memref<6x20x64xf32, #tpu.memory_space<vmem>>, vector<1x1x64xf32>
    %262 = vector.shape_cast %261 : vector<1x1x64xf32> to vector<1x64xf32>
    %c2_288 = arith.constant 2 : index
    %c6_289 = arith.constant 6 : index
    %c0_290 = arith.constant 0 : index
    %263 = vector.load %arg15[%c2_288, %c6_289, %c0_290] : memref<6x20x64xf32, #tpu.memory_space<vmem>>, vector<1x1x64xf32>
    %264 = vector.shape_cast %263 : vector<1x1x64xf32> to vector<1x64xf32>
    %c2_291 = arith.constant 2 : index
    %c7_292 = arith.constant 7 : index
    %c0_293 = arith.constant 0 : index
    %265 = vector.load %arg15[%c2_291, %c7_292, %c0_293] : memref<6x20x64xf32, #tpu.memory_space<vmem>>, vector<1x1x64xf32>
    %266 = vector.shape_cast %265 : vector<1x1x64xf32> to vector<1x64xf32>
    %c2_294 = arith.constant 2 : index
    %c8_295 = arith.constant 8 : index
    %c0_296 = arith.constant 0 : index
    %267 = vector.load %arg15[%c2_294, %c8_295, %c0_296] : memref<6x20x64xf32, #tpu.memory_space<vmem>>, vector<1x1x64xf32>
    %268 = vector.shape_cast %267 : vector<1x1x64xf32> to vector<1x64xf32>
    %269 = tpu.concatenate %252, %254, %256, %258, %260, %262, %264, %266, %268 in 1 : vector<1x64xf32>, vector<1x64xf32>, vector<1x64xf32>, vector<1x64xf32>, vector<1x64xf32>, vector<1x64xf32>, vector<1x64xf32>, vector<1x64xf32>, vector<1x64xf32> -> vector<1x576xf32>
    %c2_297 = arith.constant 2 : index
    %c0_298 = arith.constant 0 : index
    %c0_299 = arith.constant 0 : index
    %270 = vector.load %arg15[%c2_297, %c0_298, %c0_299] : memref<6x20x64xf32, #tpu.memory_space<vmem>>, vector<1x1x64xf32>
    %271 = vector.shape_cast %270 : vector<1x1x64xf32> to vector<1x64xf32>
    %c2_300 = arith.constant 2 : index
    %c1_301 = arith.constant 1 : index
    %c0_302 = arith.constant 0 : index
    %272 = vector.load %arg15[%c2_300, %c1_301, %c0_302] : memref<6x20x64xf32, #tpu.memory_space<vmem>>, vector<1x1x64xf32>
    %273 = vector.shape_cast %272 : vector<1x1x64xf32> to vector<1x64xf32>
    %c2_303 = arith.constant 2 : index
    %c2_304 = arith.constant 2 : index
    %c0_305 = arith.constant 0 : index
    %274 = vector.load %arg15[%c2_303, %c2_304, %c0_305] : memref<6x20x64xf32, #tpu.memory_space<vmem>>, vector<1x1x64xf32>
    %275 = vector.shape_cast %274 : vector<1x1x64xf32> to vector<1x64xf32>
    %c3_306 = arith.constant 3 : index
    %c0_307 = arith.constant 0 : index
    %c0_308 = arith.constant 0 : index
    %276 = vector.load %arg15[%c3_306, %c0_307, %c0_308] : memref<6x20x64xf32, #tpu.memory_space<vmem>>, vector<1x1x64xf32>
    %277 = vector.shape_cast %276 : vector<1x1x64xf32> to vector<1x64xf32>
    %c3_309 = arith.constant 3 : index
    %c1_310 = arith.constant 1 : index
    %c0_311 = arith.constant 0 : index
    %278 = vector.load %arg15[%c3_309, %c1_310, %c0_311] : memref<6x20x64xf32, #tpu.memory_space<vmem>>, vector<1x1x64xf32>
    %279 = vector.shape_cast %278 : vector<1x1x64xf32> to vector<1x64xf32>
    %c3_312 = arith.constant 3 : index
    %c2_313 = arith.constant 2 : index
    %c0_314 = arith.constant 0 : index
    %280 = vector.load %arg15[%c3_312, %c2_313, %c0_314] : memref<6x20x64xf32, #tpu.memory_space<vmem>>, vector<1x1x64xf32>
    %281 = vector.shape_cast %280 : vector<1x1x64xf32> to vector<1x64xf32>
    %c4_315 = arith.constant 4 : index
    %c0_316 = arith.constant 0 : index
    %c0_317 = arith.constant 0 : index
    %282 = vector.load %arg15[%c4_315, %c0_316, %c0_317] : memref<6x20x64xf32, #tpu.memory_space<vmem>>, vector<1x1x64xf32>
    %283 = vector.shape_cast %282 : vector<1x1x64xf32> to vector<1x64xf32>
    %c4_318 = arith.constant 4 : index
    %c1_319 = arith.constant 1 : index
    %c0_320 = arith.constant 0 : index
    %284 = vector.load %arg15[%c4_318, %c1_319, %c0_320] : memref<6x20x64xf32, #tpu.memory_space<vmem>>, vector<1x1x64xf32>
    %285 = vector.shape_cast %284 : vector<1x1x64xf32> to vector<1x64xf32>
    %c4_321 = arith.constant 4 : index
    %c2_322 = arith.constant 2 : index
    %c0_323 = arith.constant 0 : index
    %286 = vector.load %arg15[%c4_321, %c2_322, %c0_323] : memref<6x20x64xf32, #tpu.memory_space<vmem>>, vector<1x1x64xf32>
    %287 = vector.shape_cast %286 : vector<1x1x64xf32> to vector<1x64xf32>
    %288 = tpu.concatenate %271, %273, %275, %277, %279, %281, %283, %285, %287 in 1 : vector<1x64xf32>, vector<1x64xf32>, vector<1x64xf32>, vector<1x64xf32>, vector<1x64xf32>, vector<1x64xf32>, vector<1x64xf32>, vector<1x64xf32>, vector<1x64xf32> -> vector<1x576xf32>
    %c2_324 = arith.constant 2 : index
    %c2_325 = arith.constant 2 : index
    %c0_326 = arith.constant 0 : index
    %289 = vector.load %arg15[%c2_324, %c2_325, %c0_326] : memref<6x20x64xf32, #tpu.memory_space<vmem>>, vector<1x1x64xf32>
    %290 = vector.shape_cast %289 : vector<1x1x64xf32> to vector<1x64xf32>
    %c2_327 = arith.constant 2 : index
    %c3_328 = arith.constant 3 : index
    %c0_329 = arith.constant 0 : index
    %291 = vector.load %arg15[%c2_327, %c3_328, %c0_329] : memref<6x20x64xf32, #tpu.memory_space<vmem>>, vector<1x1x64xf32>
    %292 = vector.shape_cast %291 : vector<1x1x64xf32> to vector<1x64xf32>
    %c2_330 = arith.constant 2 : index
    %c4_331 = arith.constant 4 : index
    %c0_332 = arith.constant 0 : index
    %293 = vector.load %arg15[%c2_330, %c4_331, %c0_332] : memref<6x20x64xf32, #tpu.memory_space<vmem>>, vector<1x1x64xf32>
    %294 = vector.shape_cast %293 : vector<1x1x64xf32> to vector<1x64xf32>
    %c3_333 = arith.constant 3 : index
    %c2_334 = arith.constant 2 : index
    %c0_335 = arith.constant 0 : index
    %295 = vector.load %arg15[%c3_333, %c2_334, %c0_335] : memref<6x20x64xf32, #tpu.memory_space<vmem>>, vector<1x1x64xf32>
    %296 = vector.shape_cast %295 : vector<1x1x64xf32> to vector<1x64xf32>
    %c3_336 = arith.constant 3 : index
    %c3_337 = arith.constant 3 : index
    %c0_338 = arith.constant 0 : index
    %297 = vector.load %arg15[%c3_336, %c3_337, %c0_338] : memref<6x20x64xf32, #tpu.memory_space<vmem>>, vector<1x1x64xf32>
    %298 = vector.shape_cast %297 : vector<1x1x64xf32> to vector<1x64xf32>
    %c3_339 = arith.constant 3 : index
    %c4_340 = arith.constant 4 : index
    %c0_341 = arith.constant 0 : index
    %299 = vector.load %arg15[%c3_339, %c4_340, %c0_341] : memref<6x20x64xf32, #tpu.memory_space<vmem>>, vector<1x1x64xf32>
    %300 = vector.shape_cast %299 : vector<1x1x64xf32> to vector<1x64xf32>
    %c4_342 = arith.constant 4 : index
    %c2_343 = arith.constant 2 : index
    %c0_344 = arith.constant 0 : index
    %301 = vector.load %arg15[%c4_342, %c2_343, %c0_344] : memref<6x20x64xf32, #tpu.memory_space<vmem>>, vector<1x1x64xf32>
    %302 = vector.shape_cast %301 : vector<1x1x64xf32> to vector<1x64xf32>
    %c4_345 = arith.constant 4 : index
    %c3_346 = arith.constant 3 : index
    %c0_347 = arith.constant 0 : index
    %303 = vector.load %arg15[%c4_345, %c3_346, %c0_347] : memref<6x20x64xf32, #tpu.memory_space<vmem>>, vector<1x1x64xf32>
    %304 = vector.shape_cast %303 : vector<1x1x64xf32> to vector<1x64xf32>
    %c4_348 = arith.constant 4 : index
    %c4_349 = arith.constant 4 : index
    %c0_350 = arith.constant 0 : index
    %305 = vector.load %arg15[%c4_348, %c4_349, %c0_350] : memref<6x20x64xf32, #tpu.memory_space<vmem>>, vector<1x1x64xf32>
    %306 = vector.shape_cast %305 : vector<1x1x64xf32> to vector<1x64xf32>
    %307 = tpu.concatenate %290, %292, %294, %296, %298, %300, %302, %304, %306 in 1 : vector<1x64xf32>, vector<1x64xf32>, vector<1x64xf32>, vector<1x64xf32>, vector<1x64xf32>, vector<1x64xf32>, vector<1x64xf32>, vector<1x64xf32>, vector<1x64xf32> -> vector<1x576xf32>
    %c2_351 = arith.constant 2 : index
    %c4_352 = arith.constant 4 : index
    %c0_353 = arith.constant 0 : index
    %308 = vector.load %arg15[%c2_351, %c4_352, %c0_353] : memref<6x20x64xf32, #tpu.memory_space<vmem>>, vector<1x1x64xf32>
    %309 = vector.shape_cast %308 : vector<1x1x64xf32> to vector<1x64xf32>
    %c2_354 = arith.constant 2 : index
    %c5_355 = arith.constant 5 : index
    %c0_356 = arith.constant 0 : index
    %310 = vector.load %arg15[%c2_354, %c5_355, %c0_356] : memref<6x20x64xf32, #tpu.memory_space<vmem>>, vector<1x1x64xf32>
    %311 = vector.shape_cast %310 : vector<1x1x64xf32> to vector<1x64xf32>
    %c2_357 = arith.constant 2 : index
    %c6_358 = arith.constant 6 : index
    %c0_359 = arith.constant 0 : index
    %312 = vector.load %arg15[%c2_357, %c6_358, %c0_359] : memref<6x20x64xf32, #tpu.memory_space<vmem>>, vector<1x1x64xf32>
    %313 = vector.shape_cast %312 : vector<1x1x64xf32> to vector<1x64xf32>
    %c3_360 = arith.constant 3 : index
    %c4_361 = arith.constant 4 : index
    %c0_362 = arith.constant 0 : index
    %314 = vector.load %arg15[%c3_360, %c4_361, %c0_362] : memref<6x20x64xf32, #tpu.memory_space<vmem>>, vector<1x1x64xf32>
    %315 = vector.shape_cast %314 : vector<1x1x64xf32> to vector<1x64xf32>
    %c3_363 = arith.constant 3 : index
    %c5_364 = arith.constant 5 : index
    %c0_365 = arith.constant 0 : index
    %316 = vector.load %arg15[%c3_363, %c5_364, %c0_365] : memref<6x20x64xf32, #tpu.memory_space<vmem>>, vector<1x1x64xf32>
    %317 = vector.shape_cast %316 : vector<1x1x64xf32> to vector<1x64xf32>
    %c3_366 = arith.constant 3 : index
    %c6_367 = arith.constant 6 : index
    %c0_368 = arith.constant 0 : index
    %318 = vector.load %arg15[%c3_366, %c6_367, %c0_368] : memref<6x20x64xf32, #tpu.memory_space<vmem>>, vector<1x1x64xf32>
    %319 = vector.shape_cast %318 : vector<1x1x64xf32> to vector<1x64xf32>
    %c4_369 = arith.constant 4 : index
    %c4_370 = arith.constant 4 : index
    %c0_371 = arith.constant 0 : index
    %320 = vector.load %arg15[%c4_369, %c4_370, %c0_371] : memref<6x20x64xf32, #tpu.memory_space<vmem>>, vector<1x1x64xf32>
    %321 = vector.shape_cast %320 : vector<1x1x64xf32> to vector<1x64xf32>
    %c4_372 = arith.constant 4 : index
    %c5_373 = arith.constant 5 : index
    %c0_374 = arith.constant 0 : index
    %322 = vector.load %arg15[%c4_372, %c5_373, %c0_374] : memref<6x20x64xf32, #tpu.memory_space<vmem>>, vector<1x1x64xf32>
    %323 = vector.shape_cast %322 : vector<1x1x64xf32> to vector<1x64xf32>
    %c4_375 = arith.constant 4 : index
    %c6_376 = arith.constant 6 : index
    %c0_377 = arith.constant 0 : index
    %324 = vector.load %arg15[%c4_375, %c6_376, %c0_377] : memref<6x20x64xf32, #tpu.memory_space<vmem>>, vector<1x1x64xf32>
    %325 = vector.shape_cast %324 : vector<1x1x64xf32> to vector<1x64xf32>
    %326 = tpu.concatenate %309, %311, %313, %315, %317, %319, %321, %323, %325 in 1 : vector<1x64xf32>, vector<1x64xf32>, vector<1x64xf32>, vector<1x64xf32>, vector<1x64xf32>, vector<1x64xf32>, vector<1x64xf32>, vector<1x64xf32>, vector<1x64xf32> -> vector<1x576xf32>
    %c2_378 = arith.constant 2 : index
    %c6_379 = arith.constant 6 : index
    %c0_380 = arith.constant 0 : index
    %327 = vector.load %arg15[%c2_378, %c6_379, %c0_380] : memref<6x20x64xf32, #tpu.memory_space<vmem>>, vector<1x1x64xf32>
    %328 = vector.shape_cast %327 : vector<1x1x64xf32> to vector<1x64xf32>
    %c2_381 = arith.constant 2 : index
    %c7_382 = arith.constant 7 : index
    %c0_383 = arith.constant 0 : index
    %329 = vector.load %arg15[%c2_381, %c7_382, %c0_383] : memref<6x20x64xf32, #tpu.memory_space<vmem>>, vector<1x1x64xf32>
    %330 = vector.shape_cast %329 : vector<1x1x64xf32> to vector<1x64xf32>
    %c2_384 = arith.constant 2 : index
    %c8_385 = arith.constant 8 : index
    %c0_386 = arith.constant 0 : index
    %331 = vector.load %arg15[%c2_384, %c8_385, %c0_386] : memref<6x20x64xf32, #tpu.memory_space<vmem>>, vector<1x1x64xf32>
    %332 = vector.shape_cast %331 : vector<1x1x64xf32> to vector<1x64xf32>
    %c3_387 = arith.constant 3 : index
    %c6_388 = arith.constant 6 : index
    %c0_389 = arith.constant 0 : index
    %333 = vector.load %arg15[%c3_387, %c6_388, %c0_389] : memref<6x20x64xf32, #tpu.memory_space<vmem>>, vector<1x1x64xf32>
    %334 = vector.shape_cast %333 : vector<1x1x64xf32> to vector<1x64xf32>
    %c3_390 = arith.constant 3 : index
    %c7_391 = arith.constant 7 : index
    %c0_392 = arith.constant 0 : index
    %335 = vector.load %arg15[%c3_390, %c7_391, %c0_392] : memref<6x20x64xf32, #tpu.memory_space<vmem>>, vector<1x1x64xf32>
    %336 = vector.shape_cast %335 : vector<1x1x64xf32> to vector<1x64xf32>
    %c3_393 = arith.constant 3 : index
    %c8_394 = arith.constant 8 : index
    %c0_395 = arith.constant 0 : index
    %337 = vector.load %arg15[%c3_393, %c8_394, %c0_395] : memref<6x20x64xf32, #tpu.memory_space<vmem>>, vector<1x1x64xf32>
    %338 = vector.shape_cast %337 : vector<1x1x64xf32> to vector<1x64xf32>
    %c4_396 = arith.constant 4 : index
    %c6_397 = arith.constant 6 : index
    %c0_398 = arith.constant 0 : index
    %339 = vector.load %arg15[%c4_396, %c6_397, %c0_398] : memref<6x20x64xf32, #tpu.memory_space<vmem>>, vector<1x1x64xf32>
    %340 = vector.shape_cast %339 : vector<1x1x64xf32> to vector<1x64xf32>
    %c4_399 = arith.constant 4 : index
    %c7_400 = arith.constant 7 : index
    %c0_401 = arith.constant 0 : index
    %341 = vector.load %arg15[%c4_399, %c7_400, %c0_401] : memref<6x20x64xf32, #tpu.memory_space<vmem>>, vector<1x1x64xf32>
    %342 = vector.shape_cast %341 : vector<1x1x64xf32> to vector<1x64xf32>
    %c4_402 = arith.constant 4 : index
    %c8_403 = arith.constant 8 : index
    %c0_404 = arith.constant 0 : index
    %343 = vector.load %arg15[%c4_402, %c8_403, %c0_404] : memref<6x20x64xf32, #tpu.memory_space<vmem>>, vector<1x1x64xf32>
    %344 = vector.shape_cast %343 : vector<1x1x64xf32> to vector<1x64xf32>
    %345 = tpu.concatenate %328, %330, %332, %334, %336, %338, %340, %342, %344 in 1 : vector<1x64xf32>, vector<1x64xf32>, vector<1x64xf32>, vector<1x64xf32>, vector<1x64xf32>, vector<1x64xf32>, vector<1x64xf32>, vector<1x64xf32>, vector<1x64xf32> -> vector<1x576xf32>
    %c0_405 = arith.constant 0 : index
    %c10_406 = arith.constant 10 : index
    %c0_407 = arith.constant 0 : index
    %346 = vector.load %arg15[%c0_405, %c10_406, %c0_407] : memref<6x20x64xf32, #tpu.memory_space<vmem>>, vector<1x1x64xf32>
    %347 = vector.shape_cast %346 : vector<1x1x64xf32> to vector<1x64xf32>
    %c0_408 = arith.constant 0 : index
    %c11_409 = arith.constant 11 : index
    %c0_410 = arith.constant 0 : index
    %348 = vector.load %arg15[%c0_408, %c11_409, %c0_410] : memref<6x20x64xf32, #tpu.memory_space<vmem>>, vector<1x1x64xf32>
    %349 = vector.shape_cast %348 : vector<1x1x64xf32> to vector<1x64xf32>
    %c0_411 = arith.constant 0 : index
    %c12_412 = arith.constant 12 : index
    %c0_413 = arith.constant 0 : index
    %350 = vector.load %arg15[%c0_411, %c12_412, %c0_413] : memref<6x20x64xf32, #tpu.memory_space<vmem>>, vector<1x1x64xf32>
    %351 = vector.shape_cast %350 : vector<1x1x64xf32> to vector<1x64xf32>
    %c1_414 = arith.constant 1 : index
    %c10_415 = arith.constant 10 : index
    %c0_416 = arith.constant 0 : index
    %352 = vector.load %arg15[%c1_414, %c10_415, %c0_416] : memref<6x20x64xf32, #tpu.memory_space<vmem>>, vector<1x1x64xf32>
    %353 = vector.shape_cast %352 : vector<1x1x64xf32> to vector<1x64xf32>
    %c1_417 = arith.constant 1 : index
    %c11_418 = arith.constant 11 : index
    %c0_419 = arith.constant 0 : index
    %354 = vector.load %arg15[%c1_417, %c11_418, %c0_419] : memref<6x20x64xf32, #tpu.memory_space<vmem>>, vector<1x1x64xf32>
    %355 = vector.shape_cast %354 : vector<1x1x64xf32> to vector<1x64xf32>
    %c1_420 = arith.constant 1 : index
    %c12_421 = arith.constant 12 : index
    %c0_422 = arith.constant 0 : index
    %356 = vector.load %arg15[%c1_420, %c12_421, %c0_422] : memref<6x20x64xf32, #tpu.memory_space<vmem>>, vector<1x1x64xf32>
    %357 = vector.shape_cast %356 : vector<1x1x64xf32> to vector<1x64xf32>
    %c2_423 = arith.constant 2 : index
    %c10_424 = arith.constant 10 : index
    %c0_425 = arith.constant 0 : index
    %358 = vector.load %arg15[%c2_423, %c10_424, %c0_425] : memref<6x20x64xf32, #tpu.memory_space<vmem>>, vector<1x1x64xf32>
    %359 = vector.shape_cast %358 : vector<1x1x64xf32> to vector<1x64xf32>
    %c2_426 = arith.constant 2 : index
    %c11_427 = arith.constant 11 : index
    %c0_428 = arith.constant 0 : index
    %360 = vector.load %arg15[%c2_426, %c11_427, %c0_428] : memref<6x20x64xf32, #tpu.memory_space<vmem>>, vector<1x1x64xf32>
    %361 = vector.shape_cast %360 : vector<1x1x64xf32> to vector<1x64xf32>
    %c2_429 = arith.constant 2 : index
    %c12_430 = arith.constant 12 : index
    %c0_431 = arith.constant 0 : index
    %362 = vector.load %arg15[%c2_429, %c12_430, %c0_431] : memref<6x20x64xf32, #tpu.memory_space<vmem>>, vector<1x1x64xf32>
    %363 = vector.shape_cast %362 : vector<1x1x64xf32> to vector<1x64xf32>
    %364 = tpu.concatenate %347, %349, %351, %353, %355, %357, %359, %361, %363 in 1 : vector<1x64xf32>, vector<1x64xf32>, vector<1x64xf32>, vector<1x64xf32>, vector<1x64xf32>, vector<1x64xf32>, vector<1x64xf32>, vector<1x64xf32>, vector<1x64xf32> -> vector<1x576xf32>
    %c0_432 = arith.constant 0 : index
    %c12_433 = arith.constant 12 : index
    %c0_434 = arith.constant 0 : index
    %365 = vector.load %arg15[%c0_432, %c12_433, %c0_434] : memref<6x20x64xf32, #tpu.memory_space<vmem>>, vector<1x1x64xf32>
    %366 = vector.shape_cast %365 : vector<1x1x64xf32> to vector<1x64xf32>
    %c0_435 = arith.constant 0 : index
    %c13 = arith.constant 13 : index
    %c0_436 = arith.constant 0 : index
    %367 = vector.load %arg15[%c0_435, %c13, %c0_436] : memref<6x20x64xf32, #tpu.memory_space<vmem>>, vector<1x1x64xf32>
    %368 = vector.shape_cast %367 : vector<1x1x64xf32> to vector<1x64xf32>
    %c0_437 = arith.constant 0 : index
    %c14 = arith.constant 14 : index
    %c0_438 = arith.constant 0 : index
    %369 = vector.load %arg15[%c0_437, %c14, %c0_438] : memref<6x20x64xf32, #tpu.memory_space<vmem>>, vector<1x1x64xf32>
    %370 = vector.shape_cast %369 : vector<1x1x64xf32> to vector<1x64xf32>
    %c1_439 = arith.constant 1 : index
    %c12_440 = arith.constant 12 : index
    %c0_441 = arith.constant 0 : index
    %371 = vector.load %arg15[%c1_439, %c12_440, %c0_441] : memref<6x20x64xf32, #tpu.memory_space<vmem>>, vector<1x1x64xf32>
    %372 = vector.shape_cast %371 : vector<1x1x64xf32> to vector<1x64xf32>
    %c1_442 = arith.constant 1 : index
    %c13_443 = arith.constant 13 : index
    %c0_444 = arith.constant 0 : index
    %373 = vector.load %arg15[%c1_442, %c13_443, %c0_444] : memref<6x20x64xf32, #tpu.memory_space<vmem>>, vector<1x1x64xf32>
    %374 = vector.shape_cast %373 : vector<1x1x64xf32> to vector<1x64xf32>
    %c1_445 = arith.constant 1 : index
    %c14_446 = arith.constant 14 : index
    %c0_447 = arith.constant 0 : index
    %375 = vector.load %arg15[%c1_445, %c14_446, %c0_447] : memref<6x20x64xf32, #tpu.memory_space<vmem>>, vector<1x1x64xf32>
    %376 = vector.shape_cast %375 : vector<1x1x64xf32> to vector<1x64xf32>
    %c2_448 = arith.constant 2 : index
    %c12_449 = arith.constant 12 : index
    %c0_450 = arith.constant 0 : index
    %377 = vector.load %arg15[%c2_448, %c12_449, %c0_450] : memref<6x20x64xf32, #tpu.memory_space<vmem>>, vector<1x1x64xf32>
    %378 = vector.shape_cast %377 : vector<1x1x64xf32> to vector<1x64xf32>
    %c2_451 = arith.constant 2 : index
    %c13_452 = arith.constant 13 : index
    %c0_453 = arith.constant 0 : index
    %379 = vector.load %arg15[%c2_451, %c13_452, %c0_453] : memref<6x20x64xf32, #tpu.memory_space<vmem>>, vector<1x1x64xf32>
    %380 = vector.shape_cast %379 : vector<1x1x64xf32> to vector<1x64xf32>
    %c2_454 = arith.constant 2 : index
    %c14_455 = arith.constant 14 : index
    %c0_456 = arith.constant 0 : index
    %381 = vector.load %arg15[%c2_454, %c14_455, %c0_456] : memref<6x20x64xf32, #tpu.memory_space<vmem>>, vector<1x1x64xf32>
    %382 = vector.shape_cast %381 : vector<1x1x64xf32> to vector<1x64xf32>
    %383 = tpu.concatenate %366, %368, %370, %372, %374, %376, %378, %380, %382 in 1 : vector<1x64xf32>, vector<1x64xf32>, vector<1x64xf32>, vector<1x64xf32>, vector<1x64xf32>, vector<1x64xf32>, vector<1x64xf32>, vector<1x64xf32>, vector<1x64xf32> -> vector<1x576xf32>
    %c0_457 = arith.constant 0 : index
    %c14_458 = arith.constant 14 : index
    %c0_459 = arith.constant 0 : index
    %384 = vector.load %arg15[%c0_457, %c14_458, %c0_459] : memref<6x20x64xf32, #tpu.memory_space<vmem>>, vector<1x1x64xf32>
    %385 = vector.shape_cast %384 : vector<1x1x64xf32> to vector<1x64xf32>
    %c0_460 = arith.constant 0 : index
    %c15 = arith.constant 15 : index
    %c0_461 = arith.constant 0 : index
    %386 = vector.load %arg15[%c0_460, %c15, %c0_461] : memref<6x20x64xf32, #tpu.memory_space<vmem>>, vector<1x1x64xf32>
    %387 = vector.shape_cast %386 : vector<1x1x64xf32> to vector<1x64xf32>
    %c0_462 = arith.constant 0 : index
    %c16 = arith.constant 16 : index
    %c0_463 = arith.constant 0 : index
    %388 = vector.load %arg15[%c0_462, %c16, %c0_463] : memref<6x20x64xf32, #tpu.memory_space<vmem>>, vector<1x1x64xf32>
    %389 = vector.shape_cast %388 : vector<1x1x64xf32> to vector<1x64xf32>
    %c1_464 = arith.constant 1 : index
    %c14_465 = arith.constant 14 : index
    %c0_466 = arith.constant 0 : index
    %390 = vector.load %arg15[%c1_464, %c14_465, %c0_466] : memref<6x20x64xf32, #tpu.memory_space<vmem>>, vector<1x1x64xf32>
    %391 = vector.shape_cast %390 : vector<1x1x64xf32> to vector<1x64xf32>
    %c1_467 = arith.constant 1 : index
    %c15_468 = arith.constant 15 : index
    %c0_469 = arith.constant 0 : index
    %392 = vector.load %arg15[%c1_467, %c15_468, %c0_469] : memref<6x20x64xf32, #tpu.memory_space<vmem>>, vector<1x1x64xf32>
    %393 = vector.shape_cast %392 : vector<1x1x64xf32> to vector<1x64xf32>
    %c1_470 = arith.constant 1 : index
    %c16_471 = arith.constant 16 : index
    %c0_472 = arith.constant 0 : index
    %394 = vector.load %arg15[%c1_470, %c16_471, %c0_472] : memref<6x20x64xf32, #tpu.memory_space<vmem>>, vector<1x1x64xf32>
    %395 = vector.shape_cast %394 : vector<1x1x64xf32> to vector<1x64xf32>
    %c2_473 = arith.constant 2 : index
    %c14_474 = arith.constant 14 : index
    %c0_475 = arith.constant 0 : index
    %396 = vector.load %arg15[%c2_473, %c14_474, %c0_475] : memref<6x20x64xf32, #tpu.memory_space<vmem>>, vector<1x1x64xf32>
    %397 = vector.shape_cast %396 : vector<1x1x64xf32> to vector<1x64xf32>
    %c2_476 = arith.constant 2 : index
    %c15_477 = arith.constant 15 : index
    %c0_478 = arith.constant 0 : index
    %398 = vector.load %arg15[%c2_476, %c15_477, %c0_478] : memref<6x20x64xf32, #tpu.memory_space<vmem>>, vector<1x1x64xf32>
    %399 = vector.shape_cast %398 : vector<1x1x64xf32> to vector<1x64xf32>
    %c2_479 = arith.constant 2 : index
    %c16_480 = arith.constant 16 : index
    %c0_481 = arith.constant 0 : index
    %400 = vector.load %arg15[%c2_479, %c16_480, %c0_481] : memref<6x20x64xf32, #tpu.memory_space<vmem>>, vector<1x1x64xf32>
    %401 = vector.shape_cast %400 : vector<1x1x64xf32> to vector<1x64xf32>
    %402 = tpu.concatenate %385, %387, %389, %391, %393, %395, %397, %399, %401 in 1 : vector<1x64xf32>, vector<1x64xf32>, vector<1x64xf32>, vector<1x64xf32>, vector<1x64xf32>, vector<1x64xf32>, vector<1x64xf32>, vector<1x64xf32>, vector<1x64xf32> -> vector<1x576xf32>
    %c0_482 = arith.constant 0 : index
    %c16_483 = arith.constant 16 : index
    %c0_484 = arith.constant 0 : index
    %403 = vector.load %arg15[%c0_482, %c16_483, %c0_484] : memref<6x20x64xf32, #tpu.memory_space<vmem>>, vector<1x1x64xf32>
    %404 = vector.shape_cast %403 : vector<1x1x64xf32> to vector<1x64xf32>
    %c0_485 = arith.constant 0 : index
    %c17 = arith.constant 17 : index
    %c0_486 = arith.constant 0 : index
    %405 = vector.load %arg15[%c0_485, %c17, %c0_486] : memref<6x20x64xf32, #tpu.memory_space<vmem>>, vector<1x1x64xf32>
    %406 = vector.shape_cast %405 : vector<1x1x64xf32> to vector<1x64xf32>
    %c0_487 = arith.constant 0 : index
    %c18 = arith.constant 18 : index
    %c0_488 = arith.constant 0 : index
    %407 = vector.load %arg15[%c0_487, %c18, %c0_488] : memref<6x20x64xf32, #tpu.memory_space<vmem>>, vector<1x1x64xf32>
    %408 = vector.shape_cast %407 : vector<1x1x64xf32> to vector<1x64xf32>
    %c1_489 = arith.constant 1 : index
    %c16_490 = arith.constant 16 : index
    %c0_491 = arith.constant 0 : index
    %409 = vector.load %arg15[%c1_489, %c16_490, %c0_491] : memref<6x20x64xf32, #tpu.memory_space<vmem>>, vector<1x1x64xf32>
    %410 = vector.shape_cast %409 : vector<1x1x64xf32> to vector<1x64xf32>
    %c1_492 = arith.constant 1 : index
    %c17_493 = arith.constant 17 : index
    %c0_494 = arith.constant 0 : index
    %411 = vector.load %arg15[%c1_492, %c17_493, %c0_494] : memref<6x20x64xf32, #tpu.memory_space<vmem>>, vector<1x1x64xf32>
    %412 = vector.shape_cast %411 : vector<1x1x64xf32> to vector<1x64xf32>
    %c1_495 = arith.constant 1 : index
    %c18_496 = arith.constant 18 : index
    %c0_497 = arith.constant 0 : index
    %413 = vector.load %arg15[%c1_495, %c18_496, %c0_497] : memref<6x20x64xf32, #tpu.memory_space<vmem>>, vector<1x1x64xf32>
    %414 = vector.shape_cast %413 : vector<1x1x64xf32> to vector<1x64xf32>
    %c2_498 = arith.constant 2 : index
    %c16_499 = arith.constant 16 : index
    %c0_500 = arith.constant 0 : index
    %415 = vector.load %arg15[%c2_498, %c16_499, %c0_500] : memref<6x20x64xf32, #tpu.memory_space<vmem>>, vector<1x1x64xf32>
    %416 = vector.shape_cast %415 : vector<1x1x64xf32> to vector<1x64xf32>
    %c2_501 = arith.constant 2 : index
    %c17_502 = arith.constant 17 : index
    %c0_503 = arith.constant 0 : index
    %417 = vector.load %arg15[%c2_501, %c17_502, %c0_503] : memref<6x20x64xf32, #tpu.memory_space<vmem>>, vector<1x1x64xf32>
    %418 = vector.shape_cast %417 : vector<1x1x64xf32> to vector<1x64xf32>
    %c2_504 = arith.constant 2 : index
    %c18_505 = arith.constant 18 : index
    %c0_506 = arith.constant 0 : index
    %419 = vector.load %arg15[%c2_504, %c18_505, %c0_506] : memref<6x20x64xf32, #tpu.memory_space<vmem>>, vector<1x1x64xf32>
    %420 = vector.shape_cast %419 : vector<1x1x64xf32> to vector<1x64xf32>
    %421 = tpu.concatenate %404, %406, %408, %410, %412, %414, %416, %418, %420 in 1 : vector<1x64xf32>, vector<1x64xf32>, vector<1x64xf32>, vector<1x64xf32>, vector<1x64xf32>, vector<1x64xf32>, vector<1x64xf32>, vector<1x64xf32>, vector<1x64xf32> -> vector<1x576xf32>
    %c2_507 = arith.constant 2 : index
    %c10_508 = arith.constant 10 : index
    %c0_509 = arith.constant 0 : index
    %422 = vector.load %arg15[%c2_507, %c10_508, %c0_509] : memref<6x20x64xf32, #tpu.memory_space<vmem>>, vector<1x1x64xf32>
    %423 = vector.shape_cast %422 : vector<1x1x64xf32> to vector<1x64xf32>
    %c2_510 = arith.constant 2 : index
    %c11_511 = arith.constant 11 : index
    %c0_512 = arith.constant 0 : index
    %424 = vector.load %arg15[%c2_510, %c11_511, %c0_512] : memref<6x20x64xf32, #tpu.memory_space<vmem>>, vector<1x1x64xf32>
    %425 = vector.shape_cast %424 : vector<1x1x64xf32> to vector<1x64xf32>
    %c2_513 = arith.constant 2 : index
    %c12_514 = arith.constant 12 : index
    %c0_515 = arith.constant 0 : index
    %426 = vector.load %arg15[%c2_513, %c12_514, %c0_515] : memref<6x20x64xf32, #tpu.memory_space<vmem>>, vector<1x1x64xf32>
    %427 = vector.shape_cast %426 : vector<1x1x64xf32> to vector<1x64xf32>
    %c3_516 = arith.constant 3 : index
    %c10_517 = arith.constant 10 : index
    %c0_518 = arith.constant 0 : index
    %428 = vector.load %arg15[%c3_516, %c10_517, %c0_518] : memref<6x20x64xf32, #tpu.memory_space<vmem>>, vector<1x1x64xf32>
    %429 = vector.shape_cast %428 : vector<1x1x64xf32> to vector<1x64xf32>
    %c3_519 = arith.constant 3 : index
    %c11_520 = arith.constant 11 : index
    %c0_521 = arith.constant 0 : index
    %430 = vector.load %arg15[%c3_519, %c11_520, %c0_521] : memref<6x20x64xf32, #tpu.memory_space<vmem>>, vector<1x1x64xf32>
    %431 = vector.shape_cast %430 : vector<1x1x64xf32> to vector<1x64xf32>
    %c3_522 = arith.constant 3 : index
    %c12_523 = arith.constant 12 : index
    %c0_524 = arith.constant 0 : index
    %432 = vector.load %arg15[%c3_522, %c12_523, %c0_524] : memref<6x20x64xf32, #tpu.memory_space<vmem>>, vector<1x1x64xf32>
    %433 = vector.shape_cast %432 : vector<1x1x64xf32> to vector<1x64xf32>
    %c4_525 = arith.constant 4 : index
    %c10_526 = arith.constant 10 : index
    %c0_527 = arith.constant 0 : index
    %434 = vector.load %arg15[%c4_525, %c10_526, %c0_527] : memref<6x20x64xf32, #tpu.memory_space<vmem>>, vector<1x1x64xf32>
    %435 = vector.shape_cast %434 : vector<1x1x64xf32> to vector<1x64xf32>
    %c4_528 = arith.constant 4 : index
    %c11_529 = arith.constant 11 : index
    %c0_530 = arith.constant 0 : index
    %436 = vector.load %arg15[%c4_528, %c11_529, %c0_530] : memref<6x20x64xf32, #tpu.memory_space<vmem>>, vector<1x1x64xf32>
    %437 = vector.shape_cast %436 : vector<1x1x64xf32> to vector<1x64xf32>
    %c4_531 = arith.constant 4 : index
    %c12_532 = arith.constant 12 : index
    %c0_533 = arith.constant 0 : index
    %438 = vector.load %arg15[%c4_531, %c12_532, %c0_533] : memref<6x20x64xf32, #tpu.memory_space<vmem>>, vector<1x1x64xf32>
    %439 = vector.shape_cast %438 : vector<1x1x64xf32> to vector<1x64xf32>
    %440 = tpu.concatenate %423, %425, %427, %429, %431, %433, %435, %437, %439 in 1 : vector<1x64xf32>, vector<1x64xf32>, vector<1x64xf32>, vector<1x64xf32>, vector<1x64xf32>, vector<1x64xf32>, vector<1x64xf32>, vector<1x64xf32>, vector<1x64xf32> -> vector<1x576xf32>
    %c2_534 = arith.constant 2 : index
    %c12_535 = arith.constant 12 : index
    %c0_536 = arith.constant 0 : index
    %441 = vector.load %arg15[%c2_534, %c12_535, %c0_536] : memref<6x20x64xf32, #tpu.memory_space<vmem>>, vector<1x1x64xf32>
    %442 = vector.shape_cast %441 : vector<1x1x64xf32> to vector<1x64xf32>
    %c2_537 = arith.constant 2 : index
    %c13_538 = arith.constant 13 : index
    %c0_539 = arith.constant 0 : index
    %443 = vector.load %arg15[%c2_537, %c13_538, %c0_539] : memref<6x20x64xf32, #tpu.memory_space<vmem>>, vector<1x1x64xf32>
    %444 = vector.shape_cast %443 : vector<1x1x64xf32> to vector<1x64xf32>
    %c2_540 = arith.constant 2 : index
    %c14_541 = arith.constant 14 : index
    %c0_542 = arith.constant 0 : index
    %445 = vector.load %arg15[%c2_540, %c14_541, %c0_542] : memref<6x20x64xf32, #tpu.memory_space<vmem>>, vector<1x1x64xf32>
    %446 = vector.shape_cast %445 : vector<1x1x64xf32> to vector<1x64xf32>
    %c3_543 = arith.constant 3 : index
    %c12_544 = arith.constant 12 : index
    %c0_545 = arith.constant 0 : index
    %447 = vector.load %arg15[%c3_543, %c12_544, %c0_545] : memref<6x20x64xf32, #tpu.memory_space<vmem>>, vector<1x1x64xf32>
    %448 = vector.shape_cast %447 : vector<1x1x64xf32> to vector<1x64xf32>
    %c3_546 = arith.constant 3 : index
    %c13_547 = arith.constant 13 : index
    %c0_548 = arith.constant 0 : index
    %449 = vector.load %arg15[%c3_546, %c13_547, %c0_548] : memref<6x20x64xf32, #tpu.memory_space<vmem>>, vector<1x1x64xf32>
    %450 = vector.shape_cast %449 : vector<1x1x64xf32> to vector<1x64xf32>
    %c3_549 = arith.constant 3 : index
    %c14_550 = arith.constant 14 : index
    %c0_551 = arith.constant 0 : index
    %451 = vector.load %arg15[%c3_549, %c14_550, %c0_551] : memref<6x20x64xf32, #tpu.memory_space<vmem>>, vector<1x1x64xf32>
    %452 = vector.shape_cast %451 : vector<1x1x64xf32> to vector<1x64xf32>
    %c4_552 = arith.constant 4 : index
    %c12_553 = arith.constant 12 : index
    %c0_554 = arith.constant 0 : index
    %453 = vector.load %arg15[%c4_552, %c12_553, %c0_554] : memref<6x20x64xf32, #tpu.memory_space<vmem>>, vector<1x1x64xf32>
    %454 = vector.shape_cast %453 : vector<1x1x64xf32> to vector<1x64xf32>
    %c4_555 = arith.constant 4 : index
    %c13_556 = arith.constant 13 : index
    %c0_557 = arith.constant 0 : index
    %455 = vector.load %arg15[%c4_555, %c13_556, %c0_557] : memref<6x20x64xf32, #tpu.memory_space<vmem>>, vector<1x1x64xf32>
    %456 = vector.shape_cast %455 : vector<1x1x64xf32> to vector<1x64xf32>
    %c4_558 = arith.constant 4 : index
    %c14_559 = arith.constant 14 : index
    %c0_560 = arith.constant 0 : index
    %457 = vector.load %arg15[%c4_558, %c14_559, %c0_560] : memref<6x20x64xf32, #tpu.memory_space<vmem>>, vector<1x1x64xf32>
    %458 = vector.shape_cast %457 : vector<1x1x64xf32> to vector<1x64xf32>
    %459 = tpu.concatenate %442, %444, %446, %448, %450, %452, %454, %456, %458 in 1 : vector<1x64xf32>, vector<1x64xf32>, vector<1x64xf32>, vector<1x64xf32>, vector<1x64xf32>, vector<1x64xf32>, vector<1x64xf32>, vector<1x64xf32>, vector<1x64xf32> -> vector<1x576xf32>
    %c2_561 = arith.constant 2 : index
    %c14_562 = arith.constant 14 : index
    %c0_563 = arith.constant 0 : index
    %460 = vector.load %arg15[%c2_561, %c14_562, %c0_563] : memref<6x20x64xf32, #tpu.memory_space<vmem>>, vector<1x1x64xf32>
    %461 = vector.shape_cast %460 : vector<1x1x64xf32> to vector<1x64xf32>
    %c2_564 = arith.constant 2 : index
    %c15_565 = arith.constant 15 : index
    %c0_566 = arith.constant 0 : index
    %462 = vector.load %arg15[%c2_564, %c15_565, %c0_566] : memref<6x20x64xf32, #tpu.memory_space<vmem>>, vector<1x1x64xf32>
    %463 = vector.shape_cast %462 : vector<1x1x64xf32> to vector<1x64xf32>
    %c2_567 = arith.constant 2 : index
    %c16_568 = arith.constant 16 : index
    %c0_569 = arith.constant 0 : index
    %464 = vector.load %arg15[%c2_567, %c16_568, %c0_569] : memref<6x20x64xf32, #tpu.memory_space<vmem>>, vector<1x1x64xf32>
    %465 = vector.shape_cast %464 : vector<1x1x64xf32> to vector<1x64xf32>
    %c3_570 = arith.constant 3 : index
    %c14_571 = arith.constant 14 : index
    %c0_572 = arith.constant 0 : index
    %466 = vector.load %arg15[%c3_570, %c14_571, %c0_572] : memref<6x20x64xf32, #tpu.memory_space<vmem>>, vector<1x1x64xf32>
    %467 = vector.shape_cast %466 : vector<1x1x64xf32> to vector<1x64xf32>
    %c3_573 = arith.constant 3 : index
    %c15_574 = arith.constant 15 : index
    %c0_575 = arith.constant 0 : index
    %468 = vector.load %arg15[%c3_573, %c15_574, %c0_575] : memref<6x20x64xf32, #tpu.memory_space<vmem>>, vector<1x1x64xf32>
    %469 = vector.shape_cast %468 : vector<1x1x64xf32> to vector<1x64xf32>
    %c3_576 = arith.constant 3 : index
    %c16_577 = arith.constant 16 : index
    %c0_578 = arith.constant 0 : index
    %470 = vector.load %arg15[%c3_576, %c16_577, %c0_578] : memref<6x20x64xf32, #tpu.memory_space<vmem>>, vector<1x1x64xf32>
    %471 = vector.shape_cast %470 : vector<1x1x64xf32> to vector<1x64xf32>
    %c4_579 = arith.constant 4 : index
    %c14_580 = arith.constant 14 : index
    %c0_581 = arith.constant 0 : index
    %472 = vector.load %arg15[%c4_579, %c14_580, %c0_581] : memref<6x20x64xf32, #tpu.memory_space<vmem>>, vector<1x1x64xf32>
    %473 = vector.shape_cast %472 : vector<1x1x64xf32> to vector<1x64xf32>
    %c4_582 = arith.constant 4 : index
    %c15_583 = arith.constant 15 : index
    %c0_584 = arith.constant 0 : index
    %474 = vector.load %arg15[%c4_582, %c15_583, %c0_584] : memref<6x20x64xf32, #tpu.memory_space<vmem>>, vector<1x1x64xf32>
    %475 = vector.shape_cast %474 : vector<1x1x64xf32> to vector<1x64xf32>
    %c4_585 = arith.constant 4 : index
    %c16_586 = arith.constant 16 : index
    %c0_587 = arith.constant 0 : index
    %476 = vector.load %arg15[%c4_585, %c16_586, %c0_587] : memref<6x20x64xf32, #tpu.memory_space<vmem>>, vector<1x1x64xf32>
    %477 = vector.shape_cast %476 : vector<1x1x64xf32> to vector<1x64xf32>
    %478 = tpu.concatenate %461, %463, %465, %467, %469, %471, %473, %475, %477 in 1 : vector<1x64xf32>, vector<1x64xf32>, vector<1x64xf32>, vector<1x64xf32>, vector<1x64xf32>, vector<1x64xf32>, vector<1x64xf32>, vector<1x64xf32>, vector<1x64xf32> -> vector<1x576xf32>
    %c2_588 = arith.constant 2 : index
    %c16_589 = arith.constant 16 : index
    %c0_590 = arith.constant 0 : index
    %479 = vector.load %arg15[%c2_588, %c16_589, %c0_590] : memref<6x20x64xf32, #tpu.memory_space<vmem>>, vector<1x1x64xf32>
    %480 = vector.shape_cast %479 : vector<1x1x64xf32> to vector<1x64xf32>
    %c2_591 = arith.constant 2 : index
    %c17_592 = arith.constant 17 : index
    %c0_593 = arith.constant 0 : index
    %481 = vector.load %arg15[%c2_591, %c17_592, %c0_593] : memref<6x20x64xf32, #tpu.memory_space<vmem>>, vector<1x1x64xf32>
    %482 = vector.shape_cast %481 : vector<1x1x64xf32> to vector<1x64xf32>
    %c2_594 = arith.constant 2 : index
    %c18_595 = arith.constant 18 : index
    %c0_596 = arith.constant 0 : index
    %483 = vector.load %arg15[%c2_594, %c18_595, %c0_596] : memref<6x20x64xf32, #tpu.memory_space<vmem>>, vector<1x1x64xf32>
    %484 = vector.shape_cast %483 : vector<1x1x64xf32> to vector<1x64xf32>
    %c3_597 = arith.constant 3 : index
    %c16_598 = arith.constant 16 : index
    %c0_599 = arith.constant 0 : index
    %485 = vector.load %arg15[%c3_597, %c16_598, %c0_599] : memref<6x20x64xf32, #tpu.memory_space<vmem>>, vector<1x1x64xf32>
    %486 = vector.shape_cast %485 : vector<1x1x64xf32> to vector<1x64xf32>
    %c3_600 = arith.constant 3 : index
    %c17_601 = arith.constant 17 : index
    %c0_602 = arith.constant 0 : index
    %487 = vector.load %arg15[%c3_600, %c17_601, %c0_602] : memref<6x20x64xf32, #tpu.memory_space<vmem>>, vector<1x1x64xf32>
    %488 = vector.shape_cast %487 : vector<1x1x64xf32> to vector<1x64xf32>
    %c3_603 = arith.constant 3 : index
    %c18_604 = arith.constant 18 : index
    %c0_605 = arith.constant 0 : index
    %489 = vector.load %arg15[%c3_603, %c18_604, %c0_605] : memref<6x20x64xf32, #tpu.memory_space<vmem>>, vector<1x1x64xf32>
    %490 = vector.shape_cast %489 : vector<1x1x64xf32> to vector<1x64xf32>
    %c4_606 = arith.constant 4 : index
    %c16_607 = arith.constant 16 : index
    %c0_608 = arith.constant 0 : index
    %491 = vector.load %arg15[%c4_606, %c16_607, %c0_608] : memref<6x20x64xf32, #tpu.memory_space<vmem>>, vector<1x1x64xf32>
    %492 = vector.shape_cast %491 : vector<1x1x64xf32> to vector<1x64xf32>
    %c4_609 = arith.constant 4 : index
    %c17_610 = arith.constant 17 : index
    %c0_611 = arith.constant 0 : index
    %493 = vector.load %arg15[%c4_609, %c17_610, %c0_611] : memref<6x20x64xf32, #tpu.memory_space<vmem>>, vector<1x1x64xf32>
    %494 = vector.shape_cast %493 : vector<1x1x64xf32> to vector<1x64xf32>
    %c4_612 = arith.constant 4 : index
    %c18_613 = arith.constant 18 : index
    %c0_614 = arith.constant 0 : index
    %495 = vector.load %arg15[%c4_612, %c18_613, %c0_614] : memref<6x20x64xf32, #tpu.memory_space<vmem>>, vector<1x1x64xf32>
    %496 = vector.shape_cast %495 : vector<1x1x64xf32> to vector<1x64xf32>
    %497 = tpu.concatenate %480, %482, %484, %486, %488, %490, %492, %494, %496 in 1 : vector<1x64xf32>, vector<1x64xf32>, vector<1x64xf32>, vector<1x64xf32>, vector<1x64xf32>, vector<1x64xf32>, vector<1x64xf32>, vector<1x64xf32>, vector<1x64xf32> -> vector<1x576xf32>
    %498 = tpu.concatenate %212, %231, %250, %269, %288, %307, %326, %345, %364, %383, %402, %421, %440, %459, %478, %497 in 0 : vector<1x576xf32>, vector<1x576xf32>, vector<1x576xf32>, vector<1x576xf32>, vector<1x576xf32>, vector<1x576xf32>, vector<1x576xf32>, vector<1x576xf32>, vector<1x576xf32>, vector<1x576xf32>, vector<1x576xf32>, vector<1x576xf32>, vector<1x576xf32>, vector<1x576xf32>, vector<1x576xf32>, vector<1x576xf32> -> vector<16x576xf32>
    %c0_615 = arith.constant 0 : index
    %c0_616 = arith.constant 0 : index
    %499 = vector.load %arg6[%c0_615, %c0_616] : memref<576x64xf32, #tpu.memory_space<vmem>>, vector<576x64xf32>
    %cst_617 = arith.constant dense<0.000000e+00> : vector<16x64xf32>
    %500 = tpu.matmul %498, %499, %cst_617 {dimension_numbers = #tpu.dot_dimension_numbers<[1], [0], [0], [1], [0, 0, 1, 1], [], []>} : vector<16x576xf32>, vector<576x64xf32>, vector<16x64xf32> -> vector<16x64xf32>
    %c0_618 = arith.constant 0 : index
    %c0_619 = arith.constant 0 : index
    %501 = vector.load %arg7[%c0_618, %c0_619] : memref<1x64xf32, #tpu.memory_space<vmem>>, vector<1x64xf32>
    %502 = vector.broadcast %501 : vector<1x64xf32> to vector<16x64xf32>
    %503 = arith.addf %500, %502 : vector<16x64xf32>
    %cst_620 = arith.constant 0.000000e+00 : f32
    %504 = vector.broadcast %cst_620 : f32 to vector<16x64xf32>
    %505 = arith.maximumf %503, %504 : vector<16x64xf32>
    %506 = vector.extract_strided_slice %505 {offsets = [0, 0], sizes = [1, 64], strides = [1, 1]} : vector<16x64xf32> to vector<1x64xf32>
    %507 = vector.extract_strided_slice %505 {offsets = [1, 0], sizes = [1, 64], strides = [1, 1]} : vector<16x64xf32> to vector<1x64xf32>
    %508 = vector.extract_strided_slice %505 {offsets = [2, 0], sizes = [1, 64], strides = [1, 1]} : vector<16x64xf32> to vector<1x64xf32>
    %509 = vector.extract_strided_slice %505 {offsets = [3, 0], sizes = [1, 64], strides = [1, 1]} : vector<16x64xf32> to vector<1x64xf32>
    %510 = vector.extract_strided_slice %505 {offsets = [4, 0], sizes = [1, 64], strides = [1, 1]} : vector<16x64xf32> to vector<1x64xf32>
    %511 = vector.extract_strided_slice %505 {offsets = [5, 0], sizes = [1, 64], strides = [1, 1]} : vector<16x64xf32> to vector<1x64xf32>
    %512 = vector.extract_strided_slice %505 {offsets = [6, 0], sizes = [1, 64], strides = [1, 1]} : vector<16x64xf32> to vector<1x64xf32>
    %513 = vector.extract_strided_slice %505 {offsets = [7, 0], sizes = [1, 64], strides = [1, 1]} : vector<16x64xf32> to vector<1x64xf32>
    %514 = tpu.concatenate %506, %507, %508, %509, %510, %511, %512, %513 in 1 : vector<1x64xf32>, vector<1x64xf32>, vector<1x64xf32>, vector<1x64xf32>, vector<1x64xf32>, vector<1x64xf32>, vector<1x64xf32>, vector<1x64xf32> -> vector<1x512xf32>
    %515 = vector.extract_strided_slice %505 {offsets = [8, 0], sizes = [1, 64], strides = [1, 1]} : vector<16x64xf32> to vector<1x64xf32>
    %516 = vector.extract_strided_slice %505 {offsets = [9, 0], sizes = [1, 64], strides = [1, 1]} : vector<16x64xf32> to vector<1x64xf32>
    %517 = vector.extract_strided_slice %505 {offsets = [10, 0], sizes = [1, 64], strides = [1, 1]} : vector<16x64xf32> to vector<1x64xf32>
    %518 = vector.extract_strided_slice %505 {offsets = [11, 0], sizes = [1, 64], strides = [1, 1]} : vector<16x64xf32> to vector<1x64xf32>
    %519 = vector.extract_strided_slice %505 {offsets = [12, 0], sizes = [1, 64], strides = [1, 1]} : vector<16x64xf32> to vector<1x64xf32>
    %520 = vector.extract_strided_slice %505 {offsets = [13, 0], sizes = [1, 64], strides = [1, 1]} : vector<16x64xf32> to vector<1x64xf32>
    %521 = vector.extract_strided_slice %505 {offsets = [14, 0], sizes = [1, 64], strides = [1, 1]} : vector<16x64xf32> to vector<1x64xf32>
    %522 = vector.extract_strided_slice %505 {offsets = [15, 0], sizes = [1, 64], strides = [1, 1]} : vector<16x64xf32> to vector<1x64xf32>
    %523 = tpu.concatenate %515, %516, %517, %518, %519, %520, %521, %522 in 1 : vector<1x64xf32>, vector<1x64xf32>, vector<1x64xf32>, vector<1x64xf32>, vector<1x64xf32>, vector<1x64xf32>, vector<1x64xf32>, vector<1x64xf32> -> vector<1x512xf32>
    %524 = tpu.concatenate %514, %523 in 0 : vector<1x512xf32>, vector<1x512xf32> -> vector<2x512xf32>
    %c0_621 = arith.constant 0 : index
    %c0_622 = arith.constant 0 : index
    %525 = vector.load %arg8[%c0_621, %c0_622] : memref<512x128xf32, #tpu.memory_space<vmem>>, vector<512x128xf32>
    %cst_623 = arith.constant dense<0.000000e+00> : vector<2x128xf32>
    %526 = tpu.matmul %524, %525, %cst_623 {dimension_numbers = #tpu.dot_dimension_numbers<[1], [0], [0], [1], [0, 0, 1, 1], [], []>} : vector<2x512xf32>, vector<512x128xf32>, vector<2x128xf32> -> vector<2x128xf32>
    %c0_624 = arith.constant 0 : index
    %c0_625 = arith.constant 0 : index
    %527 = vector.load %arg9[%c0_624, %c0_625] : memref<1x128xf32, #tpu.memory_space<vmem>>, vector<1x128xf32>
    %528 = vector.broadcast %527 : vector<1x128xf32> to vector<2x128xf32>
    %529 = arith.addf %526, %528 : vector<2x128xf32>
    %cst_626 = arith.constant 0.000000e+00 : f32
    %530 = vector.broadcast %cst_626 : f32 to vector<2x128xf32>
    %531 = arith.maximumf %529, %530 : vector<2x128xf32>
    %c0_627 = arith.constant 0 : index
    %c0_628 = arith.constant 0 : index
    %532 = vector.load %arg10[%c0_627, %c0_628] : memref<128x8xf32, #tpu.memory_space<vmem>>, vector<128x8xf32>
    %cst_629 = arith.constant dense<0.000000e+00> : vector<2x8xf32>
    %533 = tpu.matmul %531, %532, %cst_629 {dimension_numbers = #tpu.dot_dimension_numbers<[1], [0], [0], [1], [0, 0, 1, 1], [], []>} : vector<2x128xf32>, vector<128x8xf32>, vector<2x8xf32> -> vector<2x8xf32>
    %c0_630 = arith.constant 0 : index
    %c0_631 = arith.constant 0 : index
    %534 = vector.load %arg11[%c0_630, %c0_631] : memref<1x8xf32, #tpu.memory_space<vmem>>, vector<1x8xf32>
    %535 = vector.broadcast %534 : vector<1x8xf32> to vector<2x8xf32>
    %536 = arith.addf %533, %535 : vector<2x8xf32>
    %c0_632 = arith.constant 0 : index
    %c0_633 = arith.constant 0 : index
    %537 = vector.load %arg12[%c0_632, %c0_633] : memref<2x8xf32, #tpu.memory_space<vmem>>, vector<2x8xf32>
    tpu.vector_store %arg12[%c0_632, %c0_633], %536 {strides = array<i32>} : memref<2x8xf32, #tpu.memory_space<vmem>>, vector<2x8xf32>,
    return
  }
}

</mosaic_0001>

<bundles_post_ra>
// kernel: net_forward.1
= control target key start
LH: loop header
LB: loop body
LE: loop exit
PB: predicated region body
PF: predicated region fallthrough
CT: control target
= control target key end

     0   :  { %vm198_vm0 = vcmask 1040384   ;;  %v8752_v3 = vmov 0.0|0.0   ;;  %vm6336_vm1 = vmmov 1   ;;  %vm6337_vm3 = vmmov 0   ;;  %s8739_s0 = inlined_call_operand.vmem [shape: f32[286,25], index: 0, kind: input, shape index: {}]   ;;  %s8740_s1 = inlined_call_operand.vmem [shape: f32[260,25], index: 1, kind: input, shape index: {}]   ;;  %s8741_s2 = inlined_call_operand.vmem [shape: f32[25,32], index: 2, kind: input, shape index: {}]   ;;  %s8742_s3 = inlined_call_operand.vmem [shape: f32[1,32], index: 3, kind: input, shape index: {}]   ;;  %s8743_s4 = inlined_call_operand.vmem [shape: f32[288,64], index: 4, kind: input, shape index: {}]   ;;  %s8744_s5 = inlined_call_operand.vmem [shape: f32[1,64], index: 5, kind: input, shape index: {}]   ;;  %s8745_s6 = inlined_call_operand.vmem [shape: f32[576,64], index: 6, kind: input, shape index: {}]   ;;  %s8746_s7 = inlined_call_operand.vmem [shape: f32[1,64], index: 7, kind: input, shape index: {}]   ;;  %s8747_s8 = inlined_call_operand.vmem [shape: f32[512,128], index: 8, kind: input, shape index: {}]   ;;  %s8748_s9 = inlined_call_operand.vmem [shape: f32[1,128], index: 9, kind: input, shape index: {}]   ;;  %s8749_s10 = inlined_call_operand.vmem [shape: f32[128,8], index: 10, kind: input, shape index: {}]   ;;  %s8750_s11 = inlined_call_operand.vmem [shape: f32[1,8], index: 11, kind: input, shape index: {}]   ;;  %s8751_s12 = inlined_call_operand.hbm [shape: f32[2,8], index: 12, kind: output, shape index: {}]  }
   0x1   :  { %v78_v0 = vld [vmem:[%s8741_s2] sm:$0xff]  ;;  %v79_v1 = vld [vmem:[%s8741_s2 + $0x8] sm:$0xff]  ;;  %v80_v2 = vld [vmem:[%s8741_s2 + $0x10] sm:$0xff]  ;;  %5408 = vmatprep.subr.bf16.mxu1 %v8752_v3  ;;  %v8754_v8 = vmov 0.0   ;;  %vm89_vm4 = vcmask 203776  }
   0x2   :  { %v5398_v4 = vpack.c.bf16 %v79_v1, %v78_v0  ;;  %v81_v5 = vld [vmem:[%s8741_s2 + $0x18] sm:$0x1]  ;;  %vm5403_vm2 = vmpackc.low %vm198_vm0, %vm6336_vm1  ;;  %5143 = vmatprep.mubr.msk.f32.mxu1 %vm6337_vm3, %v8754_v8  ;;  %v42_v9 = vld [vmem:[%s8739_s0] sm:$0xff] }
   0x3   :  { %v557_v6 = vld [vmem:[%s8741_s2 + $0x18] sm:$0x1]  ;;  %v5402_v7 = vpack.c.bf16 %v81_v5, %v80_v2  ;;  %5081 = vmatprep.mubr.msk.f32.mxu0 %vm89_vm4, %v42_v9  ;;  %v521_v11 = vld [vmem:[%s8740_s1] sm:$0xff]  ;;  %v43_v12 = vld [vmem:[%s8739_s0 + $0x8] sm:$0xff] }
   0x4   :  { %5399 = vmatprep.subr.bf16.mxu0 %v5398_v4  ;;  %5410 = vmatpush3.bf16.msra.mxu1 %v5398_v4  ;;  %v5412_v10 = vpack.c.bf16 %v557_v6, %v80_v2  ;;  %v44_v13 = vld [vmem:[%s8739_s0 + $0x10] sm:$0xff]  ;;  %v522_v14 = vld [vmem:[%s8740_s1 + $0x8] sm:$0xff]  ;;  %v45_v15 = vld [vmem:[%s8739_s0 + $0x18] sm:$0xff] }
   0x5   :  { %5401 = vmatpush3.bf16.msra.mxu0 %v5398_v4  ;;  %5411 = vmatprep.subr.bf16.mxu1 %v8752_v3  ;;  %v46_v16 = vld [vmem:[%s8739_s0 + $0x20] sm:$0xff]  ;;  %v523_v17 = vld [vmem:[%s8740_s1 + $0x10] sm:$0xff]  ;;  %v47_v18 = vld [vmem:[%s8739_s0 + $0x28] sm:$0xff] }
   0x6   :  { %5404 = vmatprep.subr.msk.bf16.mxu0 %vm5403_vm2, %v5402_v7  ;;  %v48_v19 = vld [vmem:[%s8739_s0 + $0x30] sm:$0xff]  ;;  %v524_v20 = vld [vmem:[%s8740_s1 + $0x18] sm:$0xff]  ;;  %v50_v22 = vld [vmem:[%s8739_s0 + $0x40] sm:$0xff] }
   0x7   :  { %v49_v21 = vld [vmem:[%s8739_s0 + $0x38] sm:$0xff]  ;;  %v525_v23 = vld [vmem:[%s8740_s1 + $0x20] sm:$0xff]  ;;  %v51_v24 = vld [vmem:[%s8739_s0 + $0x48] sm:$0xff] }
   0x8   :  { %5414 = vmatpush3.bf16.msk.msra.mxu1 %vm5403_vm2, %v5412_v10  ;;  %v52_v25 = vld [vmem:[%s8739_s0 + $0x50] sm:$0xff] }
   0x9   :  { %5407 = vmatpush3.bf16.msk.msra.mxu0 %vm5403_vm2, %v5402_v7 }
   0xb   :  { %5144 = vmatmul.mubr.msk.f32.vlgmr.msra.gmra.mrb[0].mxu1 %vm89_vm4, %v521_v11 }
   0xc   :  { %5082 = vmatmul.mubr.msk.f32.vlgmr.msra.gmra.mrb[0].mxu0 %vm89_vm4, %v43_v12  ;;  %5146 = vmatprep.mubr.msk.f32.mxu1 %vm6337_vm3, %v8754_v8 }
   0xd   :  { %5084 = vmatprep.mubr.msk.f32.mxu0 %vm89_vm4, %v44_v13 }
   0xf   :  { %5147 = vmatmul.mubr.msk.f32.gmra.mrb[2].mxu1 %vm89_vm4, %v522_v14 }
  0x10   :  { %5085 = vmatmul.mubr.msk.f32.gmra.mrb[2].mxu0 %vm89_vm4, %v45_v15  ;;  %5149 = vmatprep.mubr.msk.f32.mxu1 %vm6337_vm3, %v8754_v8 }
  0x11   :  { %5087 = vmatprep.mubr.msk.f32.mxu0 %vm89_vm4, %v46_v16 }
  0x13   :  { %5150 = vmatmul.mubr.msk.f32.gmra.mrb[4].mxu1 %vm89_vm4, %v523_v17 }
  0x14   :  { %5088 = vmatmul.mubr.msk.f32.gmra.mrb[4].mxu0 %vm89_vm4, %v47_v18  ;;  %5152 = vmatprep.mubr.msk.f32.mxu1 %vm6337_vm3, %v8754_v8 }
  0x15   :  { %5090 = vmatprep.mubr.msk.f32.mxu0 %vm89_vm4, %v48_v19 }
  0x17   :  { %5153 = vmatmul.mubr.msk.f32.gmra.mrb[6].mxu1 %vm89_vm4, %v524_v20 }
  0x18   :  { %5091 = vmatmul.mubr.msk.f32.gmra.mrb[6].mxu0 %vm89_vm4, %v49_v21  ;;  %5155 = vmatprep.mubr.msk.f32.mxu1 %vm6337_vm3, %v8754_v8 }
  0x19   :  { %5093 = vmatprep.mubr.msk.f32.mxu0 %vm89_vm4, %v50_v22 }
  0x1a   :  { %17 = vsyncpa [#allocation6], 0  ;;  %v526_v26 = vld [vmem:[%s8740_s1 + $0x28] sm:$0xff]  ;;  %v53_v27 = vld [vmem:[%s8739_s0 + $0x58] sm:$0xff]  ;;  %vm483_vm5 = vcmask 261120   ;;  %s6339_s16 = smov 64  }
  0x1b   :  { %5156 = vmatmul.mubr.msk.f32.gmra.mrb[8].mxu1 %vm89_vm4, %v525_v23  ;;  %v54_v28 = vld [vmem:[%s8739_s0 + $0x60] sm:$0xff]  ;;  %v527_v29 = vld [vmem:[%s8740_s1 + $0x30] sm:$0xff]  ;;  %v55_v30 = vld [vmem:[%s8739_s0 + $0x68] sm:$0xff]  ;;  %s6340_s17 = smov 32   ;;  %s6341_s18 = smov 96   ;;  %vm519_vm6 = vcmask 259072  }
  0x1c   :  { %5094 = vmatmul.mubr.msk.f32.gmra.mrb[8].mxu0 %vm89_vm4, %v51_v24  ;;  %5158 = vmatprep.mubr.msk.f32.mxu1 %vm6337_vm3, %v8754_v8  ;;  %v56_v31 = vld [vmem:[%s8739_s0 + $0x70] sm:$0xff]  ;;  %v528_v32 = vld [vmem:[%s8740_s1 + $0x38] sm:$0xff]  ;;  %v58_v34 = vld [vmem:[%s8739_s0 + $0x80] sm:$0xff]  ;;  %vm962_vm7 = vcmask 257024   ;;  %vm1069_vm8 = vcmask 523264   ;;  %vm1072_vm9 = vcmask 785408  }
  0x1d   :  { %5096 = vmatprep.mubr.msk.f32.mxu0 %vm89_vm4, %v52_v25  ;;  %v57_v33 = vld [vmem:[%s8739_s0 + $0x78] sm:$0xff]  ;;  %v529_v35 = vld [vmem:[%s8740_s1 + $0x40] sm:$0xff]  ;;  %v59_v36 = vld [vmem:[%s8739_s0 + $0x88] sm:$0xff]  ;;  %vm1165_vm10 = vcmask 1041408   ;;  %vm1362_vm11 = vcmask 519168   ;;  %vm3670_vm12 = vcmask 1042432  }
  0x1e   :  { %v60_v37 = vld [vmem:[%s8739_s0 + $0x90] sm:$0xff]  ;;  %v530_v38 = vld [vmem:[%s8740_s1 + $0x48] sm:$0xff]  ;;  %v61_v39 = vld [vmem:[%s8739_s0 + $0x98] sm:$0xff]  ;;  %vm3676_vm13 = vcmask 1043456   ;;  %vm3682_vm14 = vcmask 1044480   ;;  %vm3688_vm15 = vcmask 1045504  }
  0x1f   :  { %5159 = vmatmul.mubr.msk.f32.gmra.mrb[10].mxu1 %vm89_vm4, %v526_v26  ;;  %v62_v40 = vld [vmem:[%s8739_s0 + $0xa0] sm:$0xff]  ;;  %v531_v41 = vld [vmem:[%s8740_s1 + $0x50] sm:$0xff]  ;;  %v63_v42 = vld [vmem:[%s8739_s0 + $0xa8] sm:$0xff]  ;;  %vm3694_vm1 = vcmask 1046528   ;;  %s6342_s24 = smov [#allocation5]  }
  0x20   :  { %5097 = vmatmul.mubr.msk.f32.gmra.mrb[10].mxu0 %vm89_vm4, %v53_v27  ;;  %5161 = vmatprep.mubr.msk.f32.mxu1 %vm6337_vm3, %v8754_v8  ;;  %v64_v43 = vld [vmem:[%s8739_s0 + $0xb0] sm:$0xff]  ;;  %v532_v44 = vld [vmem:[%s8740_s1 + $0x58] sm:$0xff]  ;;  %v66_v46 = vld [vmem:[%s8739_s0 + $0xc0] sm:$0xff]  ;;  %s4430_s25 = sshll.u32 %s6342_s24, 4  ;;  %s4431_s25 = int_to_ptr.vmem [resolvable:$true] %s4430_s25 }
  0x21   :  { %5099 = vmatprep.mubr.msk.f32.mxu0 %vm89_vm4, %v54_v28  ;;  %v65_v45 = vld [vmem:[%s8739_s0 + $0xb8] sm:$0xff]  ;;  %v533_v47 = vld [vmem:[%s8740_s1 + $0x60] sm:$0xff]  ;;  %v67_v48 = vld [vmem:[%s8739_s0 + $0xc8] sm:$0xff]  ;;  %p6316_p1 = scmp.lt.s32.totalorder %s4431_s25, %s4431_s25 }
  0x22   :  { %v68_v49 = vld [vmem:[%s8739_s0 + $0xd0] sm:$0xff]  ;;  %v534_v50 = vld [vmem:[%s8740_s1 + $0x68] sm:$0xff]  ;;  %v69_v51 = vld [vmem:[%s8739_s0 + $0xd8] sm:$0xff] }
  0x23   :  { %5162 = vmatmul.mubr.msk.f32.gmra.mrb[12].mxu1 %vm89_vm4, %v527_v29  ;;  %v70_v52 = vld [vmem:[%s8739_s0 + $0xe0] sm:$0xff]  ;;  %v535_v53 = vld [vmem:[%s8740_s1 + $0x70] sm:$0xff]  ;;  %v71_v54 = vld [vmem:[%s8739_s0 + $0xe8] sm:$0xff] }
  0x24   :  { %5100 = vmatmul.mubr.msk.f32.gmra.mrb[12].mxu0 %vm89_vm4, %v55_v30  ;;  %5164 = vmatprep.mubr.msk.f32.mxu1 %vm6337_vm3, %v8754_v8  ;;  %v72_v55 = vld [vmem:[%s8739_s0 + $0xf0] sm:$0xff]  ;;  %v536_v56 = vld [vmem:[%s8740_s1 + $0x78] sm:$0xff]  ;;  %v74_v58 = vld [vmem:[%s8739_s0 + $0x100] sm:$0xff] }
  0x25   :  { %5102 = vmatprep.mubr.msk.f32.mxu0 %vm89_vm4, %v56_v31  ;;  %v73_v57 = vld [vmem:[%s8739_s0 + $0xf8] sm:$0xff]  ;;  %v537_v59 = vld [vmem:[%s8740_s1 + $0x80] sm:$0xff]  ;;  %v75_v60 = vld [vmem:[%s8739_s0 + $0x108] sm:$0xff] }
  0x26   :  { %v76_v61 = vld [vmem:[%s8739_s0 + $0x110] sm:$0xff]  ;;  %v538_v62 = vld [vmem:[%s8740_s1 + $0x88] sm:$0xff]  ;;  %v77_v63 = vld [vmem:[%s8739_s0 + $0x118] sm:$0x3f] }
  0x27   :  { %5165 = vmatmul.mubr.msk.f32.gmra.mrb[14].mxu1 %vm89_vm4, %v528_v32  ;;  %v539_v0 = vld [vmem:[%s8740_s1 + $0x90] sm:$0xff]  ;;  %v540_v1 = vld [vmem:[%s8740_s1 + $0x98] sm:$0xff]  ;;  %v541_v2 = vld [vmem:[%s8740_s1 + $0xa0] sm:$0xff] }
  0x28   :  { %5103 = vmatmul.mubr.msk.f32.gmra.mrb[14].mxu0 %vm89_vm4, %v57_v33  ;;  %5167 = vmatprep.mubr.msk.f32.mxu1 %vm6337_vm3, %v8754_v8  ;;  %v542_v4 = vld [vmem:[%s8740_s1 + $0xa8] sm:$0xff]  ;;  %v543_v5 = vld [vmem:[%s8740_s1 + $0xb0] sm:$0xff]  ;;  %v544_v6 = vld [vmem:[%s8740_s1 + $0xb8] sm:$0xff] }
  0x29   :  { %5105 = vmatprep.mubr.msk.f32.mxu0 %vm89_vm4, %v58_v34  ;;  %v545_v7 = vld [vmem:[%s8740_s1 + $0xc0] sm:$0xff]  ;;  %v546_v9 = vld [vmem:[%s8740_s1 + $0xc8] sm:$0xff]  ;;  %v547_v10 = vld [vmem:[%s8740_s1 + $0xd0] sm:$0xff] }
  0x2a   :  { %v548_v11 = vld [vmem:[%s8740_s1 + $0xd8] sm:$0xff]  ;;  %v549_v12 = vld [vmem:[%s8740_s1 + $0xe0] sm:$0xff]  ;;  %v550_v13 = vld [vmem:[%s8740_s1 + $0xe8] sm:$0xff] }
  0x2b   :  { %5168 = vmatmul.mubr.msk.f32.gmra.mrb[16].mxu1 %vm89_vm4, %v529_v35  ;;  %v551_v14 = vld [vmem:[%s8740_s1 + $0xf0] sm:$0xff]  ;;  %v552_v15 = vld [vmem:[%s8740_s1 + $0xf8] sm:$0xff]  ;;  %v553_v16 = vld [vmem:[%s8740_s1 + $0x100] sm:$0xf] }
  0x2c   :  { %5106 = vmatmul.mubr.msk.f32.gmra.mrb[16].mxu0 %vm89_vm4, %v59_v36  ;;  %5170 = vmatprep.mubr.msk.f32.mxu1 %vm6337_vm3, %v8754_v8  ;;  %v980_v17 = vld [vmem:[%s8743_s4 + $0x80] sm:$0xff]  ;;  %v981_v18 = vld [vmem:[%s8743_s4 + $0x88] sm:$0xff]  ;;  %v982_v23 = vld [vmem:[%s8743_s4 + $0x90] sm:$0xff] }
  0x2d   :  { %5108 = vmatprep.mubr.msk.f32.mxu0 %vm89_vm4, %v60_v37  ;;  %v6774_v19 = vpack.c.bf16 %v981_v18, %v980_v17  ;;  %v964_v20 = vld [vmem:[%s8743_s4] sm:$0xff]  ;;  %v965_v21 = vld [vmem:[%s8743_s4 + $0x8] sm:$0xff]  ;;  %v983_v24 = vld [vmem:[%s8743_s4 + $0x98] sm:$0xff] }
  0x2e   :  { %v6782_v22 = vpack.c.bf16 %v965_v21, %v964_v20  ;;  %v6794_v25 = vpack.c.bf16 %v983_v24, %v982_v23  ;;  %v966_v26 = vld [vmem:[%s8743_s4 + $0x10] sm:$0xff]  ;;  %v967_v27 = vld [vmem:[%s8743_s4 + $0x18] sm:$0xff]  ;;  %v984_v29 = vld [vmem:[%s8743_s4 + $0xa0] sm:$0xff] }
  0x2f   :  { %5171 = vmatmul.mubr.msk.f32.gmra.mrb[18].mxu1 %vm89_vm4, %v530_v38  ;;  %5416 = vmatprep.subr.bf16.mxu0 %v6774_v19  ;;  %v6802_v28 = vpack.c.bf16 %v967_v27, %v966_v26  ;;  %v985_v30 = vld [vmem:[%s8743_s4 + $0xa8] sm:$0xff]  ;;  %v968_v32 = vld [vmem:[%s8743_s4 + $0x20] sm:$0xff]  ;;  %v986_v35 = vld [vmem:[%s8743_s4 + $0xb0] sm:$0xff] }
  0x30   :  { %5109 = vmatmul.mubr.msk.f32.gmra.mrb[18].mxu0 %vm89_vm4, %v61_v39  ;;  %5173 = vmatprep.mubr.msk.f32.mxu1 %vm6337_vm3, %v8754_v8  ;;  %v6814_v31 = vpack.c.bf16 %v985_v30, %v984_v29  ;;  %v969_v33 = vld [vmem:[%s8743_s4 + $0x28] sm:$0xff]  ;;  %v987_v36 = vld [vmem:[%s8743_s4 + $0xb8] sm:$0xff]  ;;  %v6839_v38 = vld [vmem:[%s8742_s3] ss:$0 sm:$0xff] }
  0x31   :  { %5111 = vmatprep.mubr.msk.f32.mxu0 %vm89_vm4, %v62_v40  ;;  %5492 = vmatprep.subr.bf16.mxu1 %v6774_v19  ;;  %v6822_v34 = vpack.c.bf16 %v969_v33, %v968_v32  ;;  %v6831_v37 = vpack.c.bf16 %v987_v36, %v986_v35  ;;  %v970_v39 = vld [vmem:[%s8743_s4 + $0x30] sm:$0xff]  ;;  %v971_v40 = vld [vmem:[%s8743_s4 + $0x38] sm:$0xff]  ;;  %v993_v17 = vld [vmem:[%s8743_s4 + $0xe8] sm:$0xff] }
  0x32   :  { %5418 = vmatpush3.bf16.msra.mxu0 %v6782_v22  ;;  %5494 = vmatpush3.bf16.msra.mxu1 %v6782_v22  ;;  %v976_v23 = vld [vmem:[%s8743_s4 + $0x60] sm:$0xff]  ;;  %v977_v24 = vld [vmem:[%s8743_s4 + $0x68] sm:$0xff] }
  0x33   :  { %5174 = vmatmul.mubr.msk.f32.gmra.mrb[20].mxu1 %vm89_vm4, %v531_v41  ;;  %5420 = vmatprep.subr.bf16.mxu0 %v6794_v25  ;;  %v6849_v41 = vpack.c.bf16 %v971_v40, %v970_v39  ;;  %v6922_v29 = vpack.c.bf16 %v977_v24, %v976_v23 }
  0x34   :  { %5112 = vmatmul.mubr.msk.f32.gmra.mrb[20].mxu0 %vm89_vm4, %v63_v42  ;;  %5176 = vmatprep.mubr.msk.f32.mxu1 %vm6337_vm3, %v8754_v8  ;;  %v988_v42 = vld [vmem:[%s8743_s4 + $0xc0] sm:$0xff] }
  0x35   :  { %5114 = vmatprep.mubr.msk.f32.mxu0 %vm89_vm4, %v64_v43  ;;  %5496 = vmatprep.subr.bf16.mxu1 %v6794_v25  ;;  %v989_v43 = vld [vmem:[%s8743_s4 + $0xc8] sm:$0xff] }
  0x36   :  { %5422 = vmatpush3.bf16.msra.mxu0 %v6802_v28  ;;  %5498 = vmatpush3.bf16.msra.mxu1 %v6802_v28 }
  0x37   :  { %5177 = vmatmul.mubr.msk.f32.gmra.mrb[22].mxu1 %vm89_vm4, %v532_v44  ;;  %5424 = vmatprep.subr.bf16.mxu0 %v6814_v31 }
  0x38   :  { %5115 = vmatmul.mubr.msk.f32.gmra.mrb[22].mxu0 %vm89_vm4, %v65_v45  ;;  %5179 = vmatprep.mubr.msk.f32.mxu1 %vm6337_vm3, %v8754_v8  ;;  %v6857_v45 = vpack.c.bf16 %v989_v43, %v988_v42 }
  0x39   :  { %5117 = vmatprep.mubr.msk.f32.mxu0 %vm89_vm4, %v66_v46  ;;  %5500 = vmatprep.subr.bf16.mxu1 %v6814_v31 }
  0x3a   :  { %5426 = vmatpush3.bf16.msra.mxu0 %v6822_v34  ;;  %5502 = vmatpush3.bf16.msra.mxu1 %v6822_v34 }
  0x3b   :  { %5180 = vmatmul.mubr.msk.f32.gmra.mrb[24].mxu1 %vm89_vm4, %v533_v47  ;;  %5428 = vmatprep.subr.bf16.mxu0 %v6831_v37 }
  0x3c   :  { %5118 = vmatmul.mubr.msk.f32.gmra.mrb[24].mxu0 %vm89_vm4, %v67_v48  ;;  %5182 = vmatprep.mubr.msk.f32.mxu1 %vm6337_vm3, %v8754_v8 }
  0x3d   :  { %5120 = vmatprep.mubr.msk.f32.mxu0 %vm89_vm4, %v68_v49  ;;  %5504 = vmatprep.subr.bf16.mxu1 %v6831_v37 }
  0x3e   :  { %5430 = vmatpush3.bf16.msra.mxu0 %v6849_v41  ;;  %5506 = vmatpush3.bf16.msra.mxu1 %v6849_v41 }
  0x3f   :  { %5183 = vmatmul.mubr.msk.f32.gmra.mrb[26].mxu1 %vm89_vm4, %v534_v50  ;;  %5432 = vmatprep.subr.bf16.mxu0 %v6857_v45 }
  0x40   :  { %5121 = vmatmul.mubr.msk.f32.gmra.mrb[26].mxu0 %vm89_vm4, %v69_v51  ;;  %5185 = vmatprep.mubr.msk.f32.mxu1 %vm6337_vm3, %v8754_v8  ;;  %v972_v51 = vld [vmem:[%s8743_s4 + $0x40] sm:$0xff] }
  0x41   :  { %5123 = vmatprep.mubr.msk.f32.mxu0 %vm89_vm4, %v70_v52  ;;  %v973_v52 = vld [vmem:[%s8743_s4 + $0x48] sm:$0xff]  ;;  %5508 = vmatprep.subr.bf16.mxu1 %v6857_v45 }
  0x43   :  { %5186 = vmatmul.mubr.msk.f32.gmra.mrb[28].mxu1 %vm89_vm4, %v535_v53 }
  0x44   :  { %5124 = vmatmul.mubr.msk.f32.gmra.mrb[28].mxu0 %vm89_vm4, %v71_v54  ;;  %5188 = vmatprep.mubr.msk.f32.mxu1 %vm6337_vm3, %v8754_v8 }
  0x45   :  { %5126 = vmatprep.mubr.msk.f32.mxu0 %vm89_vm4, %v72_v55  ;;  %v6872_v55 = vpack.c.bf16 %v973_v52, %v972_v51 }
  0x47   :  { %5189 = vmatmul.mubr.msk.f32.gmra.mrb[30].mxu1 %vm89_vm4, %v536_v56  ;;  %5434 = vmatpush3.bf16.msra.mxu0 %v6872_v55 }
  0x48   :  { %5127 = vmatmul.mubr.msk.f32.gmra.mrb[30].mxu0 %vm89_vm4, %v73_v57  ;;  %5191 = vmatprep.mubr.msk.f32.mxu1 %vm6337_vm3, %v8754_v8 }
  0x49   :  { %5129 = vmatprep.mubr.msk.f32.mxu0 %vm89_vm4, %v74_v58  ;;  %5510 = vmatpush3.bf16.msra.mxu1 %v6872_v55 }
  0x4b   :  { %5192 = vmatmul.mubr.msk.f32.gmra.mrb[32].mxu1 %vm89_vm4, %v537_v59 }
  0x4c   :  { %5130 = vmatmul.mubr.msk.f32.gmra.mrb[32].mxu0 %vm89_vm4, %v75_v60  ;;  %5194 = vmatprep.mubr.msk.f32.mxu1 %vm6337_vm3, %v8754_v8 }
  0x4d   :  { %5132 = vmatprep.mubr.msk.f32.mxu0 %vm89_vm4, %v76_v61 }
  0x4f   :  { %5195 = vmatmul.mubr.msk.f32.gmra.mrb[34].mxu1 %vm89_vm4, %v538_v62  ;;  %v990_v62 = vld [vmem:[%s8743_s4 + $0xd0] sm:$0xff] }
  0x50   :  { %5133 = vmatmul.mubr.msk.f32.gmra.mrb[34].mxu0 %vm89_vm4, %v77_v63  ;;  %5197 = vmatprep.mubr.msk.f32.mxu1 %vm6337_vm3, %v8754_v8  ;;  %v991_v63 = vld [vmem:[%s8743_s4 + $0xd8] sm:$0xff] }
  0x53   :  { %5198 = vmatmul.mubr.msk.f32.gmra.mrb[36].mxu1 %vm89_vm4, %v539_v0 }
  0x54   :  { %5200 = vmatprep.mubr.msk.f32.mxu1 %vm6337_vm3, %v8754_v8 }
  0x57   :  { %5201 = vmatmul.mubr.msk.f32.gmra.mrb[38].mxu1 %vm89_vm4, %v540_v1 }
  0x58   :  { %5203 = vmatprep.mubr.msk.f32.mxu1 %vm6337_vm3, %v8754_v8 }
  0x5b   :  { %5204 = vmatmul.mubr.msk.f32.gmra.mrb[40].mxu1 %vm89_vm4, %v541_v2  ;;  %v6886_v2 = vpack.c.bf16 %v991_v63, %v990_v62 }
  0x5c   :  { %5206 = vmatprep.mubr.msk.f32.mxu1 %vm6337_vm3, %v8754_v8 }
  0x5d   :  { %5436 = vmatprep.subr.bf16.mxu0 %v6886_v2  ;;  %5512 = vmatprep.subr.bf16.mxu1 %v6886_v2 }
  0x5f   :  { %5207 = vmatmul.mubr.msk.f32.gmra.mrb[42].mxu1 %vm89_vm4, %v542_v4  ;;  %v974_v4 = vld [vmem:[%s8743_s4 + $0x50] sm:$0xff] }
  0x60   :  { %5209 = vmatprep.mubr.msk.f32.mxu1 %vm6337_vm3, %v8754_v8 }
  0x63   :  { %5210 = vmatmul.mubr.msk.f32.gmra.mrb[44].mxu1 %vm89_vm4, %v543_v5  ;;  %v975_v5 = vld [vmem:[%s8743_s4 + $0x58] sm:$0xff] }
  0x64   :  { %5212 = vmatprep.mubr.msk.f32.mxu1 %vm6337_vm3, %v8754_v8 }
  0x67   :  { %5213 = vmatmul.mubr.msk.f32.gmra.mrb[46].mxu1 %vm89_vm4, %v544_v6 }
  0x68   :  { %5215 = vmatprep.mubr.msk.f32.mxu1 %vm6337_vm3, %v8754_v8 }
  0x6b   :  { %5216 = vmatmul.mubr.msk.f32.gmra.mrb[48].mxu1 %vm89_vm4, %v545_v7 }
  0x6c   :  { %5218 = vmatprep.mubr.msk.f32.mxu1 %vm6337_vm3, %v8754_v8 }
  0x6f   :  { %5219 = vmatmul.mubr.msk.f32.gmra.mrb[50].mxu1 %vm89_vm4, %v546_v9  ;;  %v6896_v9 = vpack.c.bf16 %v975_v5, %v974_v4 }
  0x70   :  { %5221 = vmatprep.mubr.msk.f32.mxu1 %vm6337_vm3, %v8754_v8 }
  0x71   :  { %5438 = vmatpush3.bf16.msra.mxu0 %v6896_v9  ;;  %5514 = vmatpush3.bf16.msra.mxu1 %v6896_v9 }
  0x73   :  { %5222 = vmatmul.mubr.msk.f32.gmra.mrb[52].mxu1 %vm89_vm4, %v547_v10 }
  0x74   :  { %5224 = vmatprep.mubr.msk.f32.mxu1 %vm6337_vm3, %v8754_v8 }
  0x77   :  { %5225 = vmatmul.mubr.msk.f32.gmra.mrb[54].mxu1 %vm89_vm4, %v548_v11 }
  0x78   :  { %5227 = vmatprep.mubr.msk.f32.mxu1 %vm6337_vm3, %v8754_v8 }
  0x7b   :  { %5228 = vmatmul.mubr.msk.f32.gmra.mrb[56].mxu1 %vm89_vm4, %v549_v12 }
  0x7c   :  { %5230 = vmatprep.mubr.msk.f32.mxu1 %vm6337_vm3, %v8754_v8 }
  0x7f   :  { %5231 = vmatmul.mubr.msk.f32.gmra.mrb[58].mxu1 %vm89_vm4, %v550_v13 }
  0x80   :  { %5233 = vmatprep.mubr.msk.f32.mxu1 %vm6337_vm3, %v8754_v8 }
  0x83   :  { %5234 = vmatmul.mubr.msk.f32.gmra.mrb[60].mxu1 %vm89_vm4, %v551_v14 }
  0x84   :  { %5236 = vmatprep.mubr.msk.f32.mxu1 %vm6337_vm3, %v8754_v8 }
  0x87   :  { %5237 = vmatmul.mubr.msk.f32.gmra.mrb[62].mxu1 %vm89_vm4, %v552_v15 }
  0x88   :  { %5239 = vmatprep.mubr.msk.f32.mxu1 %vm6337_vm3, %v8754_v8 }
  0x8b   :  { %5240 = vmatmul.mubr.msk.f32.gmra.mrb[64].mxu1 %vm89_vm4, %v553_v16  ;;  %v992_v16 = vld [vmem:[%s8743_s4 + $0xe0] sm:$0xff] }
  0x8c   :  { %v6912_v21 = vpack.c.bf16 %v993_v17, %v992_v16 }
  0x8e   :  { %5440 = vmatprep.subr.bf16.mxu0 %v6912_v21  ;;  %5516 = vmatprep.subr.bf16.mxu1 %v6912_v21 }
  0x8f   :  { %5442 = vmatpush3.bf16.msra.mxu0 %v6922_v29  ;;  %5518 = vmatpush3.bf16.msra.mxu1 %v6922_v29 }
  0xde   :  { %v733_v44 = vpop.f32.mrb[0].mxu1 }
  0xdf   :  { %v734_v46 = vadd.f32 %v6839_v38, %v733_v44  ;;  %v5145_v47 = vpop.f32.mrb[1].mxu1  ;;  %v5083_v48 = vpop.f32.mrb[0].mxu0 }
  0xe0   :  { %v274_v49 = vadd.f32 %v5083_v48, %v6839_v38  ;;  %v268_v50 = vpop.f32.mrb[1].mxu0  ;;  %v994_v47 = vld [vmem:[%s8743_s4 + $0xf0] sm:$0xff]  ;;  %v995_v48 = vld [vmem:[%s8743_s4 + $0xf8] sm:$0xff] }
  0xe1   :  { %v897_v53 = vmax.f32 %v734_v46, 0.0  ;;  %v269_v54 = vadd.f32 %v6839_v38, %v268_v50  ;;  %v6943_v52 = vpack.c.bf16 %v995_v48, %v994_v47 }
  0xe2   :  { %v448_v56 = vmax.f32 %v274_v49, 0.0  ;;  %v738_v57 = vpop.f32.mrb[2].mxu1  ;;  %v978_v49 = vld [vmem:[%s8743_s4 + $0x70] sm:$0xff] }
  0xe3   :  { %930 = vst.msk [vmem:[#allocation3] sm:$0xff] %vm483_vm5, %v897_v53  ;;  %v447_v58 = vmax.f32 %v269_v54, 0.0  ;;  %v739_v59 = vadd.f32 %v6839_v38, %v738_v57  ;;  %v5086_v60 = vpop.f32.mrb[2].mxu0  ;;  %v5148_v61 = vpop.f32.mrb[3].mxu1  ;;  %v979_v53 = vld [vmem:[%s8743_s4 + $0x78] sm:$0xff]  ;;  %5444 = vmatprep.subr.bf16.mxu0 %v6943_v52  ;;  %5520 = vmatprep.subr.bf16.mxu1 %v6943_v52 }
  0xe4   :  { %485 = vst.msk [vmem:[#allocation2 + $0x8] sm:$0xff] %vm483_vm5, %v448_v56  ;;  %v284_v0 = vadd.f32 %v5086_v60, %v6839_v38  ;;  %v278_v1 = vpop.f32.mrb[3].mxu0  ;;  %v6950_v61 = vpack.c.bf16 %v979_v53, %v978_v49 }
  0xe5   :  { %484 = vst.msk [vmem:[#allocation2] sm:$0xff] %vm483_vm5, %v447_v58  ;;  %v898_v6 = vmax.f32 %v739_v59, 0.0  ;;  %v279_v7 = vadd.f32 %v6839_v38, %v278_v1 }
  0xe6   :  { %v450_v10 = vmax.f32 %v284_v0, 0.0  ;;  %v743_v11 = vpop.f32.mrb[4].mxu1  ;;  %5446 = vmatpush3.bf16.msra.mxu0 %v6950_v61  ;;  %5522 = vmatpush3.bf16.msra.mxu1 %v6950_v61 }
  0xe7   :  { %931 = vst.msk [vmem:[#allocation3 + $0x8] sm:$0xff] %vm483_vm5, %v898_v6  ;;  %v449_v12 = vmax.f32 %v279_v7, 0.0  ;;  %v744_v13 = vadd.f32 %v6839_v38, %v743_v11  ;;  %v5151_v14 = vpop.f32.mrb[5].mxu1  ;;  %v5089_v15 = vpop.f32.mrb[4].mxu0  ;;  %5447 = vmatprep.subr.bf16.mxu0 %v8752_v3  ;;  %5530 = vmatprep.subr.bf16.mxu1 %v6774_v19 }
  0xe8   :  { %487 = vst.msk [vmem:[#allocation2 + $0x18] sm:$0xff] %vm483_vm5, %v450_v10  ;;  %v294_v18 = vadd.f32 %v5089_v15, %v6839_v38  ;;  %v288_v20 = vpop.f32.mrb[5].mxu0 }
  0xe9   :  { %486 = vst.msk [vmem:[#allocation2 + $0x10] sm:$0xff] %vm483_vm5, %v449_v12  ;;  %v899_v26 = vmax.f32 %v744_v13, 0.0  ;;  %v289_v27 = vadd.f32 %v6839_v38, %v288_v20 }
  0xea   :  { %v452_v30 = vmax.f32 %v294_v18, 0.0  ;;  %v748_v32 = vpop.f32.mrb[6].mxu1  ;;  %v1003_v58 = vld [vmem:[#allocation3] sm:$0xff] }
  0xeb   :  { %932 = vst.msk [vmem:[#allocation3 + $0x10] sm:$0xff] %vm483_vm5, %v899_v26  ;;  %v451_v33 = vmax.f32 %v289_v27, 0.0  ;;  %v749_v35 = vadd.f32 %v6839_v38, %v748_v32  ;;  %v5154_v36 = vpop.f32.mrb[7].mxu1  ;;  %v5092_v39 = vpop.f32.mrb[6].mxu0  ;;  %v1006_v40 = vld [vmem:[#allocation2 + $0x9] sm:$0x3] }
  0xec   :  { %489 = vst.msk [vmem:[#allocation2 + $0x28] sm:$0xff] %vm483_vm5, %v452_v30  ;;  %v304_v42 = vadd.f32 %v5092_v39, %v6839_v38  ;;  %v298_v43 = vpop.f32.mrb[7].mxu0  ;;  %v1005_v4 = vld [vmem:[#allocation2 + $0x1] sm:$0xff] }
  0xed   :  { %488 = vst.msk [vmem:[#allocation2 + $0x20] sm:$0xff] %vm483_vm5, %v451_v33  ;;  %v900_v44 = vmax.f32 %v749_v35, 0.0  ;;  %v299_v46 = vadd.f32 %v6839_v38, %v298_v43 }
  0xee   :  { %v753_v50 = vpop.f32.mrb[8].mxu1  ;;  %v454_v51 = vmax.f32 %v304_v42, 0.0  ;;  %v1004_v17 = vld [vmem:[#allocation3 + $0x8] sm:$0x3] }
  0xef   :  { %933 = vst.msk [vmem:[#allocation3 + $0x18] sm:$0xff] %vm483_vm5, %v900_v44  ;;  %v754_v54 = vadd.f32 %v6839_v38, %v753_v50  ;;  %v5157_v56 = vpop.f32.mrb[9].mxu1  ;;  %v1014_v57 = vld [vmem:[#allocation2 + $0x1e] sm:$0x3]  ;;  %v453_v59 = vmax.f32 %v299_v46, 0.0  ;;  %v5095_v60 = vpop.f32.mrb[8].mxu0 }
  0xf0   :  { %v5819_v62 = vpack.i.bf16 %v1006_v40, %v1014_v57  ;;  %491 = vst.msk [vmem:[#allocation2 + $0x38] sm:$0xff] %vm483_vm5, %v454_v51  ;;  %v1011_v63 = vld [vmem:[#allocation2 + $0xc] sm:$0xff]  ;;  %v314_v0 = vadd.f32 %v5095_v60, %v6839_v38  ;;  %v308_v1 = vpop.f32.mrb[9].mxu0  ;;  %v1013_v5 = vld [vmem:[#allocation2 + $0x16] sm:$0xff]  ;;  %v1012_v11 = vld [vmem:[#allocation2 + $0x14] sm:$0x3] }
  0xf1   :  { %v901_v6 = vmax.f32 %v754_v54, 0.0  ;;  %v5824_v7 = vpack.i.bf16 %v1003_v58, %v1011_v63  ;;  %490 = vst.msk [vmem:[#allocation2 + $0x30] sm:$0xff] %vm483_vm5, %v453_v59  ;;  %v309_v10 = vadd.f32 %v6839_v38, %v308_v1  ;;  %v5829_v18 = vpack.i.bf16 %v1005_v4, %v1013_v5  ;;  %v1007_v24 = vld [vmem:[#allocation2 + $0xb] sm:$0xff]  ;;  %v1008_v32 = vld [vmem:[#allocation2 + $0x13] sm:$0x3] }
  0xf2   :  { %v758_v12 = vpop.f32.mrb[10].mxu1  ;;  %5820 = vrot.lane.b32.xlu1 %v5819_v62, %s6339_s16  ;;  %v456_v13 = vmax.f32 %v314_v0, 0.0  ;;  %v5834_v23 = vpack.i.bf16 %v1004_v17, %v1012_v11 }
  0xf3   :  { %934 = vst.msk [vmem:[#allocation3 + $0x20] sm:$0xff] %vm483_vm5, %v901_v6  ;;  %v759_v14 = vadd.f32 %v6839_v38, %v758_v12  ;;  %v5160_v15 = vpop.f32.mrb[11].mxu1  ;;  %5825 = vrot.lane.b32.xlu0 %v5824_v7, %s6340_s17  ;;  %v455_v16 = vmax.f32 %v309_v10, 0.0  ;;  %v5098_v20 = vpop.f32.mrb[10].mxu0 }
  0xf4   :  { %493 = vst.msk [vmem:[#allocation2 + $0x48] sm:$0xff] %vm483_vm5, %v456_v13  ;;  %v324_v26 = vadd.f32 %v5098_v20, %v6839_v38  ;;  %v318_v27 = vpop.f32.mrb[11].mxu0 }
  0xf5   :  { %v902_v30 = vmax.f32 %v759_v14, 0.0  ;;  %492 = vst.msk [vmem:[#allocation2 + $0x40] sm:$0xff] %vm483_vm5, %v455_v16  ;;  %v319_v33 = vadd.f32 %v6839_v38, %v318_v27 }
  0xf6   :  { %v763_v35 = vpop.f32.mrb[12].mxu1  ;;  %5835 = vrot.lane.b32.xlu1 %v5834_v23, %s6340_s17  ;;  %v6971_v36 = vld [vmem:[#allocation3 + $0x14] sm:$0xff]  ;;  %v1016_v39 = vld [vmem:[#allocation3 + $0x1c] sm:$0x3]  ;;  %v458_v40 = vmax.f32 %v324_v26, 0.0 }
  0xf7   :  { %935 = vst.msk [vmem:[#allocation3 + $0x28] sm:$0xff] %vm483_vm5, %v902_v30  ;;  %v764_v42 = vadd.f32 %v6839_v38, %v763_v35  ;;  %v5163_v43 = vpop.f32.mrb[13].mxu1  ;;  %5830 = vrot.lane.b32.xlu0 %v5829_v18, %s6339_s16  ;;  %v5839_v44 = vpack.i.bf16 %v1007_v24, %v6971_v36  ;;  %v457_v46 = vmax.f32 %v319_v33, 0.0  ;;  %v5101_v47 = vpop.f32.mrb[12].mxu0  ;;  %v5844_v51 = vpack.i.bf16 %v1008_v32, %v1016_v39 }
  0xf8   :  { %495 = vst.msk [vmem:[#allocation2 + $0x58] sm:$0xff] %vm483_vm5, %v458_v40  ;;  %v334_v48 = vadd.f32 %v5101_v47, %v6839_v38  ;;  %v328_v49 = vpop.f32.mrb[13].mxu0 }
  0xf9   :  { %v903_v50 = vmax.f32 %v764_v42, 0.0  ;;  %494 = vst.msk [vmem:[#allocation2 + $0x50] sm:$0xff] %vm483_vm5, %v457_v46  ;;  %v329_v53 = vadd.f32 %v6839_v38, %v328_v49 }
  0xfa   :  { %v768_v54 = vpop.f32.mrb[14].mxu1  ;;  %5840 = vrot.lane.b32.xlu1 %v5839_v44, %s6341_s18  ;;  %v460_v56 = vmax.f32 %v334_v48, 0.0 }
  0xfb   :  { %936 = vst.msk [vmem:[#allocation3 + $0x30] sm:$0xff] %vm483_vm5, %v903_v50  ;;  %v769_v57 = vadd.f32 %v6839_v38, %v768_v54  ;;  %v5166_v58 = vpop.f32.mrb[15].mxu1  ;;  %5845 = vrot.lane.b32.xlu0 %v5844_v51, %s6341_s18  ;;  %v459_v59 = vmax.f32 %v329_v53, 0.0  ;;  %v5104_v60 = vpop.f32.mrb[14].mxu0 }
  0xfc   :  { %497 = vst.msk [vmem:[#allocation2 + $0x68] sm:$0xff] %vm483_vm5, %v460_v56  ;;  %v344_v62 = vadd.f32 %v5104_v60, %v6839_v38  ;;  %v338_v63 = vpop.f32.mrb[15].mxu0 }
  0xfd   :  { %v904_v0 = vmax.f32 %v769_v57, 0.0  ;;  %496 = vst.msk [vmem:[#allocation2 + $0x60] sm:$0xff] %vm483_vm5, %v459_v59  ;;  %v339_v1 = vadd.f32 %v6839_v38, %v338_v63 }
  0xfe   :  { %v773_v4 = vpop.f32.mrb[16].mxu1  ;;  %v462_v5 = vmax.f32 %v344_v62, 0.0 }
  0xff   :  { %937 = vst.msk [vmem:[#allocation3 + $0x38] sm:$0xff] %vm483_vm5, %v904_v0  ;;  %v774_v6 = vadd.f32 %v6839_v38, %v773_v4  ;;  %v5169_v7 = vpop.f32.mrb[17].mxu1  ;;  %v461_v10 = vmax.f32 %v339_v1, 0.0  ;;  %v5107_v11 = vpop.f32.mrb[16].mxu0 }
 0x100   :  { %499 = vst.msk [vmem:[#allocation2 + $0x78] sm:$0xff] %vm483_vm5, %v462_v5  ;;  %v354_v12 = vadd.f32 %v5107_v11, %v6839_v38  ;;  %v348_v13 = vpop.f32.mrb[17].mxu0 }
 0x101   :  { %v905_v14 = vmax.f32 %v774_v6, 0.0  ;;  %498 = vst.msk [vmem:[#allocation2 + $0x70] sm:$0xff] %vm483_vm5, %v461_v10  ;;  %v349_v15 = vadd.f32 %v6839_v38, %v348_v13 }
 0x102   :  { %v778_v16 = vpop.f32.mrb[18].mxu1  ;;  %v464_v17 = vmax.f32 %v354_v12, 0.0 }
 0x103   :  { %938 = vst.msk [vmem:[#allocation3 + $0x40] sm:$0xff] %vm483_vm5, %v905_v14  ;;  %v779_v18 = vadd.f32 %v6839_v38, %v778_v16  ;;  %v5172_v20 = vpop.f32.mrb[19].mxu1  ;;  %v463_v23 = vmax.f32 %v349_v15, 0.0  ;;  %v5110_v24 = vpop.f32.mrb[18].mxu0 }
 0x104   :  { %501 = vst.msk [vmem:[#allocation2 + $0x88] sm:$0xff] %vm483_vm5, %v464_v17  ;;  %v364_v26 = vadd.f32 %v5110_v24, %v6839_v38  ;;  %v358_v27 = vpop.f32.mrb[19].mxu0 }
 0x105   :  { %v906_v30 = vmax.f32 %v779_v18, 0.0  ;;  %500 = vst.msk [vmem:[#allocation2 + $0x80] sm:$0xff] %vm483_vm5, %v463_v23  ;;  %v359_v32 = vadd.f32 %v6839_v38, %v358_v27 }
 0x106   :  { %v466_v33 = vmax.f32 %v364_v26, 0.0  ;;  %v783_v35 = vpop.f32.mrb[20].mxu1 }
 0x107   :  { %939 = vst.msk [vmem:[#allocation3 + $0x48] sm:$0xff] %vm483_vm5, %v906_v30  ;;  %v465_v39 = vmax.f32 %v359_v32, 0.0  ;;  %v784_v40 = vadd.f32 %v6839_v38, %v783_v35  ;;  %v5113_v42 = vpop.f32.mrb[20].mxu0  ;;  %v5175_v43 = vpop.f32.mrb[21].mxu1 }
 0x108   :  { %503 = vst.msk [vmem:[#allocation2 + $0x98] sm:$0xff] %vm483_vm5, %v466_v33  ;;  %v374_v44 = vadd.f32 %v5113_v42, %v6839_v38  ;;  %v368_v46 = vpop.f32.mrb[21].mxu0 }
 0x109   :  { %502 = vst.msk [vmem:[#allocation2 + $0x90] sm:$0xff] %vm483_vm5, %v465_v39  ;;  %v907_v47 = vmax.f32 %v784_v40, 0.0  ;;  %v369_v48 = vadd.f32 %v6839_v38, %v368_v46 }
 0x10a   :  { %v468_v49 = vmax.f32 %v374_v44, 0.0  ;;  %v788_v50 = vpop.f32.mrb[22].mxu1 }
 0x10b   :  { %940 = vst.msk [vmem:[#allocation3 + $0x50] sm:$0xff] %vm483_vm5, %v907_v47  ;;  %v467_v51 = vmax.f32 %v369_v48, 0.0  ;;  %v789_v53 = vadd.f32 %v6839_v38, %v788_v50  ;;  %v5178_v54 = vpop.f32.mrb[23].mxu1  ;;  %v5116_v56 = vpop.f32.mrb[22].mxu0 }
 0x10c   :  { %505 = vst.msk [vmem:[#allocation2 + $0xa8] sm:$0xff] %vm483_vm5, %v468_v49  ;;  %v384_v57 = vadd.f32 %v5116_v56, %v6839_v38  ;;  %v378_v58 = vpop.f32.mrb[23].mxu0 }
 0x10d   :  { %504 = vst.msk [vmem:[#allocation2 + $0xa0] sm:$0xff] %vm483_vm5, %v467_v51  ;;  %v908_v59 = vmax.f32 %v789_v53, 0.0  ;;  %v379_v60 = vadd.f32 %v6839_v38, %v378_v58 }
 0x10e   :  { %v470_v62 = vmax.f32 %v384_v57, 0.0  ;;  %v793_v63 = vpop.f32.mrb[24].mxu1 }
 0x10f   :  { %941 = vst.msk [vmem:[#allocation3 + $0x58] sm:$0xff] %vm483_vm5, %v908_v59  ;;  %v469_v0 = vmax.f32 %v379_v60, 0.0  ;;  %v794_v1 = vadd.f32 %v6839_v38, %v793_v63  ;;  %v5119_v4 = vpop.f32.mrb[24].mxu0  ;;  %v5181_v5 = vpop.f32.mrb[25].mxu1 }
 0x110   :  { %507 = vst.msk [vmem:[#allocation2 + $0xb8] sm:$0xff] %vm483_vm5, %v470_v62  ;;  %v394_v6 = vadd.f32 %v5119_v4, %v6839_v38  ;;  %v388_v7 = vpop.f32.mrb[25].mxu0  ;;  %v1085_v14 = vld [vmem:[#allocation2 + $0x90] sm:$0xff] }
 0x111   :  { %506 = vst.msk [vmem:[#allocation2 + $0xb0] sm:$0xff] %vm483_vm5, %v469_v0  ;;  %v909_v10 = vmax.f32 %v794_v1, 0.0  ;;  %v389_v11 = vadd.f32 %v6839_v38, %v388_v7 }
 0x112   :  { %v472_v12 = vmax.f32 %v394_v6, 0.0  ;;  %v798_v13 = vpop.f32.mrb[26].mxu1 }
 0x113   :  { %942 = vst.msk [vmem:[#allocation3 + $0x60] sm:$0xff] %vm483_vm5, %v909_v10  ;;  %v471_v15 = vmax.f32 %v389_v11, 0.0  ;;  %v799_v16 = vadd.f32 %v6839_v38, %v798_v13  ;;  %v5122_v17 = vpop.f32.mrb[26].mxu0  ;;  %v5184_v18 = vpop.f32.mrb[27].mxu1 }
 0x114   :  { %509 = vst.msk [vmem:[#allocation2 + $0xc8] sm:$0xff] %vm483_vm5, %v472_v12  ;;  %v404_v20 = vadd.f32 %v5122_v17, %v6839_v38  ;;  %v398_v23 = vpop.f32.mrb[27].mxu0  ;;  %v1093_v24 = vld [vmem:[#allocation2 + $0xa5] sm:$0xff] }
 0x115   :  { %508 = vst.msk [vmem:[#allocation2 + $0xc0] sm:$0xff] %vm483_vm5, %v471_v15  ;;  %v910_v26 = vmax.f32 %v799_v16, 0.0  ;;  %v399_v27 = vadd.f32 %v6839_v38, %v398_v23  ;;  %v5849_v30 = vpack.i.bf16 %v1085_v14, %v1093_v24 }
 0x116   :  { %v474_v32 = vmax.f32 %v404_v20, 0.0  ;;  %v803_v33 = vpop.f32.mrb[28].mxu1 }
 0x117   :  { %943 = vst.msk [vmem:[#allocation3 + $0x68] sm:$0xff] %vm483_vm5, %v910_v26  ;;  %v473_v35 = vmax.f32 %v399_v27, 0.0  ;;  %v804_v39 = vadd.f32 %v6839_v38, %v803_v33  ;;  %v5125_v40 = vpop.f32.mrb[28].mxu0  ;;  %v5187_v42 = vpop.f32.mrb[29].mxu1  ;;  %5850 = vrot.lane.b32.xlu0 %v5849_v30, %s6339_s16 }
 0x118   :  { %511 = vst.msk [vmem:[#allocation2 + $0xd8] sm:$0xff] %vm483_vm5, %v474_v32  ;;  %v414_v43 = vadd.f32 %v5125_v40, %v6839_v38  ;;  %v408_v44 = vpop.f32.mrb[29].mxu0  ;;  %v1091_v42 = vld [vmem:[#allocation2 + $0x9b] sm:$0xff] }
 0x119   :  { %510 = vst.msk [vmem:[#allocation2 + $0xd0] sm:$0xff] %vm483_vm5, %v473_v35  ;;  %v911_v46 = vmax.f32 %v804_v39, 0.0  ;;  %v409_v47 = vadd.f32 %v6839_v38, %v408_v44 }
 0x11a   :  { %v476_v48 = vmax.f32 %v414_v43, 0.0  ;;  %v808_v49 = vpop.f32.mrb[30].mxu1 }
 0x11b   :  { %944 = vst.msk [vmem:[#allocation3 + $0x70] sm:$0xff] %vm483_vm5, %v911_v46  ;;  %v475_v50 = vmax.f32 %v409_v47, 0.0  ;;  %v809_v51 = vadd.f32 %v6839_v38, %v808_v49  ;;  %v5128_v53 = vpop.f32.mrb[30].mxu0  ;;  %v5190_v54 = vpop.f32.mrb[31].mxu1 }
 0x11c   :  { %513 = vst.msk [vmem:[#allocation2 + $0xe8] sm:$0xff] %vm483_vm5, %v476_v48  ;;  %v424_v56 = vadd.f32 %v5128_v53, %v6839_v38  ;;  %v418_v57 = vpop.f32.mrb[31].mxu0 }
 0x11d   :  { %512 = vst.msk [vmem:[#allocation2 + $0xe0] sm:$0xff] %vm483_vm5, %v475_v50  ;;  %v912_v58 = vmax.f32 %v809_v51, 0.0  ;;  %v419_v59 = vadd.f32 %v6839_v38, %v418_v57  ;;  %v1092_v51 = vld [vmem:[#allocation2 + $0xa3] sm:$0x3] }
 0x11e   :  { %v478_v60 = vmax.f32 %v424_v56, 0.0  ;;  %v813_v62 = vpop.f32.mrb[32].mxu1 }
 0x11f   :  { %945 = vst.msk [vmem:[#allocation3 + $0x78] sm:$0xff] %vm483_vm5, %v912_v58  ;;  %v477_v63 = vmax.f32 %v419_v59, 0.0  ;;  %v814_v0 = vadd.f32 %v6839_v38, %v813_v62  ;;  %v5131_v1 = vpop.f32.mrb[32].mxu0  ;;  %v5193_v4 = vpop.f32.mrb[33].mxu1  ;;  %v1088_v59 = vld [vmem:[#allocation2 + $0xa2] sm:$0x3] }
 0x120   :  { %515 = vst.msk [vmem:[#allocation2 + $0xf8] sm:$0xff] %vm483_vm5, %v478_v60  ;;  %v434_v5 = vadd.f32 %v5131_v1, %v6839_v38  ;;  %v428_v6 = vpop.f32.mrb[33].mxu0 }
 0x121   :  { %514 = vst.msk [vmem:[#allocation2 + $0xf0] sm:$0xff] %vm483_vm5, %v477_v63  ;;  %v913_v7 = vmax.f32 %v814_v0, 0.0  ;;  %v429_v10 = vadd.f32 %v6839_v38, %v428_v6  ;;  %v1087_v63 = vld [vmem:[#allocation2 + $0x9a] sm:$0xff] }
 0x122   :  { %v480_v11 = vmax.f32 %v434_v5, 0.0  ;;  %v818_v12 = vpop.f32.mrb[34].mxu1  ;;  %v7065_v6 = vld [vmem:[#allocation2 + $0x17] sm:$0xff] }
 0x123   :  { %946 = vst.msk [vmem:[#allocation3 + $0x80] sm:$0xff] %vm483_vm5, %v913_v7  ;;  %v479_v13 = vmax.f32 %v429_v10, 0.0  ;;  %v819_v14 = vadd.f32 %v6839_v38, %v818_v12  ;;  %v5134_v15 = vpop.f32.mrb[34].mxu0  ;;  %v5196_v16 = vpop.f32.mrb[35].mxu1  ;;  %v1086_v12 = vld [vmem:[#allocation2 + $0x98] sm:$0x3] }
 0x124   :  { %517 = vst.msk [vmem:[#allocation2 + $0x108] sm:$0xff] %vm483_vm5, %v480_v11  ;;  %v444_v17 = vadd.f32 %v5134_v15, %v6839_v38  ;;  %v438_v18 = vpop.f32.mrb[35].mxu0  ;;  %v1376_v11 = vld [vmem:[#allocation2 + $0x2c] sm:$0xff] }
 0x125   :  { %516 = vst.msk [vmem:[#allocation2 + $0x100] sm:$0xff] %vm483_vm5, %v479_v13  ;;  %v914_v20 = vmax.f32 %v819_v14, 0.0  ;;  %v439_v23 = vadd.f32 %v6839_v38, %v438_v18  ;;  %v1094_v13 = vld [vmem:[#allocation2 + $0xad] sm:$0x3]  ;;  %v5884_v16 = vpack.i.bf16 %v7065_v6, %v1376_v11 }
 0x126   :  { %v482_v24 = vmax.f32 %v444_v17, 0.0  ;;  %v823_v26 = vpop.f32.mrb[36].mxu1  ;;  %v5869_v17 = vpack.i.bf16 %v1086_v12, %v1094_v13 }
 0x127   :  { %947 = vst.msk [vmem:[#allocation3 + $0x88] sm:$0xff] %vm483_vm5, %v914_v20  ;;  %v481_v27 = vmax.f32 %v439_v23, 0.0  ;;  %v824_v30 = vadd.f32 %v6839_v38, %v823_v26  ;;  %v5199_v32 = vpop.f32.mrb[37].mxu1  ;;  %v1370_v23 = vld [vmem:[#allocation2 + $0x21] sm:$0xff] }
 0x128   :  { %520 = vst.msk [vmem:[#allocation2 + $0x118] sm:$0x3f] %vm519_vm6, %v482_v24  ;;  %v7073_v24 = vld [vmem:[#allocation3 + $0x28] sm:$0xff] }
 0x129   :  { %518 = vst.msk [vmem:[#allocation2 + $0x110] sm:$0xff] %vm483_vm5, %v481_v27  ;;  %v915_v33 = vmax.f32 %v824_v30, 0.0  ;;  %v1374_v26 = vld [vmem:[#allocation2 + $0x22] sm:$0xff]  ;;  %v5889_v32 = vpack.i.bf16 %v1370_v23, %v7073_v24 }
 0x12a   :  { %v828_v35 = vpop.f32.mrb[38].mxu1 }
 0x12b   :  { %948 = vst.msk [vmem:[#allocation3 + $0x90] sm:$0xff] %vm483_vm5, %v915_v33  ;;  %v829_v39 = vadd.f32 %v6839_v38, %v828_v35  ;;  %v5202_v40 = vpop.f32.mrb[39].mxu1  ;;  %v5879_v33 = vpack.i.bf16 %v6971_v36, %v1374_v26 }
 0x12c   :  { %v1367_v40 = vld [vmem:[#allocation3 + $0x1c] sm:$0x3] }
 0x12d   :  { %v916_v43 = vmax.f32 %v829_v39, 0.0 }
 0x12e   :  { %v1083_v44 = vld [vmem:[#allocation3 + $0x82] sm:$0xff]  ;;  %v833_v46 = vpop.f32.mrb[40].mxu1  ;;  %v1084_v50 = vld [vmem:[#allocation3 + $0x8a] sm:$0x3] }
 0x12f   :  { %949 = vst.msk [vmem:[#allocation3 + $0x98] sm:$0xff] %vm483_vm5, %v916_v43  ;;  %v5854_v47 = vpack.i.bf16 %v1083_v44, %v1091_v42  ;;  %v834_v48 = vadd.f32 %v6839_v38, %v833_v46  ;;  %v5205_v49 = vpop.f32.mrb[41].mxu1  ;;  %v5859_v56 = vpack.i.bf16 %v1084_v50, %v1092_v51  ;;  %v1375_v42 = vld [vmem:[#allocation2 + $0x2a] sm:$0x3]  ;;  %v1454_v43 = vld [vmem:[#allocation2 + $0xbb] sm:$0xff] }
 0x130   :  { %v7083_v46 = vld [vmem:[#allocation2 + $0xa6] sm:$0xff]  ;;  %v1369_v51 = vld [vmem:[#allocation2 + $0x1f] sm:$0x3] }
 0x131   :  { %5855 = vrot.lane.b32.xlu1 %v5854_v47, %s6340_s17  ;;  %v917_v53 = vmax.f32 %v834_v48, 0.0  ;;  %v5899_v48 = vpack.i.bf16 %v1367_v40, %v1375_v42  ;;  %v5894_v49 = vpack.i.bf16 %v7083_v46, %v1454_v43 }
 0x132   :  { %v838_v54 = vpop.f32.mrb[42].mxu1 }
 0x133   :  { %950 = vst.msk [vmem:[#allocation3 + $0xa0] sm:$0xff] %vm483_vm5, %v917_v53  ;;  %v839_v57 = vadd.f32 %v6839_v38, %v838_v54  ;;  %v5208_v58 = vpop.f32.mrb[43].mxu1  ;;  %v1377_v53 = vld [vmem:[#allocation2 + $0x34] sm:$0x3]  ;;  %v1371_v54 = vld [vmem:[#allocation2 + $0x29] sm:$0x3] }
 0x135   :  { %5860 = vrot.lane.b32.xlu1 %v5859_v56, %s6340_s17  ;;  %v918_v60 = vmax.f32 %v839_v57, 0.0  ;;  %v1379_v56 = vld [vmem:[#allocation3 + $0x30] sm:$0x3] }
 0x136   :  { %v1096_v62 = vld [vmem:[#allocation3 + $0x9e] sm:$0x3]  ;;  %v7061_v0 = vld [vmem:[#allocation3 + $0x96] sm:$0xff]  ;;  %v843_v1 = vpop.f32.mrb[44].mxu1 }
 0x137   :  { %v5874_v4 = vpack.i.bf16 %v1088_v59, %v1096_v62  ;;  %v5864_v5 = vpack.i.bf16 %v1087_v63, %v7061_v0  ;;  %951 = vst.msk [vmem:[#allocation3 + $0xa8] sm:$0xff] %vm483_vm5, %v918_v60  ;;  %v844_v7 = vadd.f32 %v6839_v38, %v843_v1  ;;  %v5211_v10 = vpop.f32.mrb[45].mxu1  ;;  %v5904_v62 = vpack.i.bf16 %v1369_v51, %v1377_v53  ;;  %v1445_v1 = vld [vmem:[#allocation3 + $0x9e] sm:$0x3] }
 0x138   :  { %v5909_v63 = vpack.i.bf16 %v1371_v54, %v1379_v56 }
 0x139   :  { %5875 = vrot.lane.b32.xlu1 %v5874_v4, %s6341_s18  ;;  %5865 = vrot.lane.b32.xlu0 %v5864_v5, %s6341_s18  ;;  %v919_v14 = vmax.f32 %v844_v7, 0.0  ;;  %v1453_v4 = vld [vmem:[#allocation2 + $0xb9] sm:$0x3]  ;;  %v1452_v5 = vld [vmem:[#allocation2 + $0xb1] sm:$0xff] }
 0x13a   :  { %v848_v15 = vpop.f32.mrb[46].mxu1  ;;  %v5919_v12 = vpack.i.bf16 %v1445_v1, %v1453_v4  ;;  %v5914_v13 = vpack.i.bf16 %v7061_v0, %v1452_v5 }
 0x13b   :  { %952 = vst.msk [vmem:[#allocation3 + $0xb0] sm:$0xff] %vm483_vm5, %v919_v14  ;;  %v849_v18 = vadd.f32 %v6839_v38, %v848_v15  ;;  %v5214_v20 = vpop.f32.mrb[47].mxu1  ;;  %v1449_v15 = vld [vmem:[#allocation2 + $0xb8] sm:$0x3] }
 0x13d   :  { %5885 = vrot.lane.b32.xlu1 %v5884_v16, %s6339_s16  ;;  %5870 = vrot.lane.b32.xlu0 %v5869_v17, %s6339_s16  ;;  %v920_v27 = vmax.f32 %v849_v18, 0.0  ;;  %v1448_v17 = vld [vmem:[#allocation2 + $0xb0] sm:$0xff] }
 0x13e   :  { %v853_v30 = vpop.f32.mrb[48].mxu1 }
 0x13f   :  { %953 = vst.msk [vmem:[#allocation3 + $0xb8] sm:$0xff] %vm483_vm5, %v920_v27  ;;  %v854_v35 = vadd.f32 %v6839_v38, %v853_v30  ;;  %v5217_v39 = vpop.f32.mrb[49].mxu1 }
 0x140   :  { %v1455_v39 = vld [vmem:[#allocation2 + $0xc3] sm:$0x3] }
 0x141   :  { %5890 = vrot.lane.b32.xlu1 %v5889_v32, %s6341_s18  ;;  %5880 = vrot.lane.b32.xlu0 %v5879_v33, %s6340_s17  ;;  %v921_v44 = vmax.f32 %v854_v35, 0.0  ;;  %v1722_v32 = vld [vmem:[#allocation2 + $0x2d] sm:$0xff]  ;;  %v1730_v33 = vld [vmem:[#allocation2 + $0x42] sm:$0xff] }
 0x142   :  { %v858_v47 = vpop.f32.mrb[50].mxu1  ;;  %v1457_v16 = vld [vmem:[#allocation3 + $0xb2] sm:$0x3]  ;;  %v7097_v18 = vld [vmem:[#allocation3 + $0xaa] sm:$0xff] }
 0x143   :  { %954 = vst.msk [vmem:[#allocation3 + $0xc0] sm:$0xff] %vm483_vm5, %v921_v44  ;;  %v859_v36 = vadd.f32 %v6839_v38, %v858_v47  ;;  %v5220_v50 = vpop.f32.mrb[51].mxu1  ;;  %v5939_v30 = vpack.i.bf16 %v1449_v15, %v1457_v16  ;;  %v5924_v0 = vpack.i.bf16 %v1448_v17, %v7097_v18  ;;  %v1447_v35 = vld [vmem:[#allocation2 + $0xae] sm:$0x3]  ;;  %v5944_v44 = vpack.i.bf16 %v1722_v32, %v1730_v33  ;;  %v7122_v15 = vld [vmem:[#allocation2 + $0xbc] sm:$0xff] }
 0x144   :  { %v5929_v47 = vpack.i.bf16 %v1447_v35, %v1455_v39  ;;  %v1728_v50 = vld [vmem:[#allocation2 + $0x38] sm:$0xff]  ;;  %v1733_v32 = vld [vmem:[#allocation3 + $0x44] sm:$0x3] }
 0x145   :  { %5900 = vrot.lane.b32.xlu1 %v5899_v48, %s6340_s17  ;;  %5895 = vrot.lane.b32.xlu0 %v5894_v49, %s6339_s16  ;;  %v922_v57 = vmax.f32 %v859_v36, 0.0  ;;  %v1721_v49 = vld [vmem:[#allocation3 + $0x30] sm:$0x3]  ;;  %v1729_v36 = vld [vmem:[#allocation2 + $0x40] sm:$0x3]  ;;  %v5934_v56 = vpack.i.bf16 %v7073_v24, %v1728_v50 }
 0x146   :  { %v863_v58 = vpop.f32.mrb[52].mxu1  ;;  %v5959_v54 = vpack.i.bf16 %v1721_v49, %v1729_v36 }
 0x147   :  { %955 = vst.msk [vmem:[#allocation3 + $0xc8] sm:$0xff] %vm483_vm5, %v922_v57  ;;  %v864_v59 = vadd.f32 %v6839_v38, %v863_v58  ;;  %v5223_v60 = vpop.f32.mrb[53].mxu1  ;;  %v1723_v57 = vld [vmem:[#allocation2 + $0x35] sm:$0x3] }
 0x148   :  { %v1731_v60 = vld [vmem:[#allocation2 + $0x4a] sm:$0x3] }
 0x149   :  { %v923_v7 = vmax.f32 %v864_v59, 0.0  ;;  %5905 = vrot.lane.b32.xlu1 %v5904_v62, %s6339_s16  ;;  %5910 = vrot.lane.b32.xlu0 %v5909_v63, %s6341_s18  ;;  %v1724_v62 = vld [vmem:[#allocation2 + $0x37] sm:$0xff]  ;;  %v5964_v5 = vpack.i.bf16 %v1723_v57, %v1731_v60 }
 0x14a   :  { %v868_v10 = vpop.f32.mrb[54].mxu1  ;;  %v7113_v63 = vld [vmem:[#allocation3 + $0x3c] sm:$0xff] }
 0x14b   :  { %956 = vst.msk [vmem:[#allocation3 + $0xd0] sm:$0xff] %vm483_vm5, %v923_v7  ;;  %v869_v11 = vadd.f32 %v6839_v38, %v868_v10  ;;  %v5226_v14 = vpop.f32.mrb[55].mxu1  ;;  %v5949_v7 = vpack.i.bf16 %v1724_v62, %v7113_v63 }
 0x14d   :  { %v924_v20 = vmax.f32 %v869_v11, 0.0  ;;  %5920 = vrot.lane.b32.xlu1 %v5919_v12, %s6340_s17  ;;  %5915 = vrot.lane.b32.xlu0 %v5914_v13, %s6340_s17  ;;  %v2430_v11 = vld [vmem:[#allocation2 + $0x59] sm:$0xff]  ;;  %v2438_v12 = vld [vmem:[#allocation2 + $0x6e] sm:$0xff] }
 0x14e   :  { %v873_v23 = vpop.f32.mrb[56].mxu1  ;;  %v1808_v13 = vld [vmem:[#allocation2 + $0xd1] sm:$0xff]  ;;  %v5984_v17 = vpack.i.bf16 %v2430_v11, %v2438_v12 }
 0x14f   :  { %957 = vst.msk [vmem:[#allocation3 + $0xd8] sm:$0xff] %vm483_vm5, %v924_v20  ;;  %v874_v26 = vadd.f32 %v6839_v38, %v873_v23  ;;  %v5229_v27 = vpop.f32.mrb[57].mxu1  ;;  %v5954_v20 = vpack.i.bf16 %v7122_v15, %v1808_v13  ;;  %v1725_v23 = vld [vmem:[#allocation2 + $0x3f] sm:$0x3] }
 0x150   :  { %v5969_v39 = vpack.i.bf16 %v1725_v23, %v1733_v32 }
 0x151   :  { %v925_v40 = vmax.f32 %v874_v26, 0.0  ;;  %5940 = vrot.lane.b32.xlu1 %v5939_v30, %s6341_s18  ;;  %5925 = vrot.lane.b32.xlu0 %v5924_v0, %s6341_s18  ;;  %v2432_v30 = vld [vmem:[#allocation2 + $0x63] sm:$0xff] }
 0x152   :  { %v878_v42 = vpop.f32.mrb[58].mxu1  ;;  %v7127_v0 = vld [vmem:[#allocation3 + $0x64] sm:$0xff] }
 0x153   :  { %958 = vst.msk [vmem:[#allocation3 + $0xe0] sm:$0xff] %vm483_vm5, %v925_v40  ;;  %v879_v43 = vadd.f32 %v6839_v38, %v878_v42  ;;  %v5232_v48 = vpop.f32.mrb[59].mxu1  ;;  %v5994_v35 = vpack.i.bf16 %v2432_v30, %v7127_v0  ;;  %v2516_v42 = vld [vmem:[#allocation2 + $0xfd] sm:$0xff]  ;;  %v997_v30 = vld [vmem:[%s8743_s4 + $0x108] sm:$0xff] }
 0x155   :  { %v926_v51 = vmax.f32 %v879_v43, 0.0  ;;  %5945 = vrot.lane.b32.xlu1 %v5944_v44, %s6339_s16  ;;  %5930 = vrot.lane.b32.xlu0 %v5929_v47, %s6339_s16  ;;  %v1801_v43 = vld [vmem:[#allocation2 + $0xc4] sm:$0x3]  ;;  %v1809_v44 = vld [vmem:[#allocation2 + $0xd9] sm:$0x3] }
 0x156   :  { %v883_v53 = vpop.f32.mrb[60].mxu1  ;;  %v7134_v47 = vld [vmem:[#allocation2 + $0x58] sm:$0xff]  ;;  %v5974_v49 = vpack.i.bf16 %v1801_v43, %v1809_v44 }
 0x157   :  { %959 = vst.msk [vmem:[#allocation3 + $0xe8] sm:$0xff] %vm483_vm5, %v926_v51  ;;  %v884_v58 = vadd.f32 %v6839_v38, %v883_v53  ;;  %v5235_v59 = vpop.f32.mrb[61].mxu1  ;;  %v5999_v48 = vpack.i.bf16 %v7134_v47, %v2516_v42  ;;  %v2508_v53 = vld [vmem:[#allocation2 + $0xe8] sm:$0xff] }
 0x159   :  { %5960 = vrot.lane.b32.xlu1 %v5959_v54, %s6340_s17  ;;  %5935 = vrot.lane.b32.xlu0 %v5934_v56, %s6340_s17  ;;  %v927_v1 = vmax.f32 %v884_v58, 0.0  ;;  %v7137_v54 = vld [vmem:[#allocation3 + $0x50] sm:$0xff]  ;;  %v2436_v56 = vld [vmem:[#allocation2 + $0x64] sm:$0xff] }
 0x15a   :  { %v888_v4 = vpop.f32.mrb[62].mxu1 }
 0x15b   :  { %960 = vst.msk [vmem:[#allocation3 + $0xf0] sm:$0xff] %vm483_vm5, %v927_v1  ;;  %v889_v24 = vadd.f32 %v6839_v38, %v888_v4  ;;  %v5238_v10 = vpop.f32.mrb[63].mxu1  ;;  %v1001_v1 = vld [vmem:[#allocation2] sm:$0xff]  ;;  %v1002_v4 = vld [vmem:[#allocation2 + $0x8] sm:$0x3] }
 0x15c   :  { %v7141_v10 = vld [vmem:[#allocation2 + $0x43] sm:$0xff] }
 0x15d   :  { %5965 = vrot.lane.b32.xlu1 %v5964_v5, %s6339_s16  ;;  %5950 = vrot.lane.b32.xlu0 %v5949_v7, %s6341_s18  ;;  %v928_v14 = vmax.f32 %v889_v24, 0.0  ;;  %v1010_v5 = vld [vmem:[#allocation3 + $0x12] sm:$0x3]  ;;  %v6009_v13 = vpack.i.bf16 %v7141_v10, %v2508_v53  ;;  %v2429_v53 = vld [vmem:[#allocation3 + $0x58] sm:$0x3] }
 0x15e   :  { %v893_v16 = vpop.f32.mrb[64].mxu1 }
 0x15f   :  { %961 = vst.msk [vmem:[#allocation3 + $0xf8] sm:$0xff] %vm483_vm5, %v928_v14  ;;  %v894_v26 = vadd.f32 %v6839_v38, %v893_v16  ;;  %v5241_v27 = vpop.f32.mrb[65].mxu1  ;;  %v5979_v14 = vpack.i.bf16 %v7137_v54, %v2436_v56  ;;  %v1009_v16 = vld [vmem:[#allocation3 + $0xa] sm:$0xff] }
 0x160   :  { %v996_v27 = vld [vmem:[%s8743_s4 + $0x100] sm:$0xff]  ;;  %v2437_v56 = vld [vmem:[#allocation2 + $0x6c] sm:$0x3] }
 0x161   :  { %5985 = vrot.lane.b32.xlu1 %v5984_v17, %s6339_s16  ;;  %5955 = vrot.lane.b32.xlu0 %v5954_v20, %s6339_s16  ;;  %v929_v33 = vmax.f32 %v894_v26, 0.0  ;;  %v2431_v17 = vld [vmem:[#allocation2 + $0x61] sm:$0x3]  ;;  %v2439_v20 = vld [vmem:[#allocation2 + $0x76] sm:$0x3] }
 0x162   :  { %v2514_v26 = vld [vmem:[#allocation2 + $0xf3] sm:$0xff] }
 0x163   :  { %963 = vst.msk [vmem:[#allocation3 + $0x100] sm:$0xf] %vm962_vm7, %v929_v33 }
 0x164   :  { %v5821_v40 = vpop.permute.xlu1 %5820 }
 0x165   :  { %v5826_v38 = vpop.permute.xlu0 %5825  ;;  %5995 = vrot.lane.b32.xlu1 %v5994_v35, %s6341_s18  ;;  %5970 = vrot.lane.b32.xlu0 %v5969_v39, %s6341_s18  ;;  %v5823_v36 = vunpack.i.h.bf16 %v5821_v40  ;;  %v5822_v50 = vunpack.i.l.bf16 %v5821_v40 }
 0x166   :  { %v5828_v57 = vunpack.i.h.bf16 %v5826_v38  ;;  %v5827_v58 = vunpack.i.l.bf16 %v5826_v38  ;;  %v6014_v38 = vpack.i.bf16 %v2431_v17, %v2439_v20  ;;  %v2160_v17 = vld [vmem:[#allocation2 + $0xdd] sm:$0xff]  ;;  %v2515_v20 = vld [vmem:[#allocation2 + $0xfb] sm:$0x3] }
 0x168   :  { %v5836_v51 = vpop.permute.xlu1 %5835  ;;  %v1067_v35 = vsel %vm483_vm5, %v1001_v1, %v5828_v57  ;;  %v1075_v42 = vsel %vm483_vm5, %v1009_v16, %v5827_v58  ;;  %v7167_v57 = vpack.c.bf16 %v997_v30, %v996_v27  ;;  %v998_v58 = vld [vmem:[%s8743_s4 + $0x110] sm:$0xff]  ;;  %v6004_v1 = vpack.i.bf16 %v2429_v53, %v2437_v56  ;;  %v2075_v16 = vld [vmem:[#allocation3 + $0x44] sm:$0x3]  ;;  %v1806_v27 = vld [vmem:[#allocation2 + $0xc7] sm:$0xff] }
 0x169   :  { %v5838_v59 = vunpack.i.h.bf16 %v5836_v51  ;;  %v5837_v60 = vunpack.i.l.bf16 %v5836_v51  ;;  %6000 = vrot.lane.b32.xlu1 %v5999_v48, %s6339_s16  ;;  %5975 = vrot.lane.b32.xlu0 %v5974_v49, %s6339_s16  ;;  %v5831_v62 = vpop.permute.xlu0 %5830  ;;  %v2082_v48 = vld [vmem:[#allocation2 + $0x4e] sm:$0xff]  ;;  %v2433_v51 = vld [vmem:[#allocation2 + $0x6b] sm:$0x3]  ;;  %v1810_v53 = vld [vmem:[#allocation3 + $0xbe] sm:$0xff] }
 0x16a   :  { %v5833_v7 = vunpack.i.h.bf16 %v5831_v62  ;;  %v5832_v24 = vunpack.i.l.bf16 %v5831_v62  ;;  %v2162_v30 = vld [vmem:[#allocation2 + $0xe7] sm:$0xff] }
 0x16b   :  { %v1068_v11 = vsel %vm483_vm5, %v1002_v4, %v5838_v59  ;;  %v1076_v12 = vsel %vm483_vm5, %v1010_v5, %v5837_v60  ;;  %v2441_v59 = vld [vmem:[#allocation3 + $0x6c] sm:$0x3]  ;;  %v999_v60 = vld [vmem:[%s8743_s4 + $0x118] sm:$0xff]  ;;  %v2509_v5 = vld [vmem:[#allocation2 + $0xf0] sm:$0x3] }
 0x16c   :  { %v5841_v23 = vpop.permute.xlu1 %5840  ;;  %v7154_v32 = vsel %vm1069_vm8, %v1076_v12, %v5822_v50  ;;  %v7157_v33 = vsel %vm1069_vm8, %v1068_v11, %v5823_v36  ;;  %v1070_v43 = vsel %vm1069_vm8, %v1067_v35, %v5833_v7  ;;  %v1077_v44 = vsel %vm1069_vm8, %v1075_v42, %v5832_v24  ;;  %v2510_v7 = vld [vmem:[#allocation2 + $0xf2] sm:$0xff]  ;;  %v2517_v35 = vld [vmem:[#allocation2 + $0x105] sm:$0x3]  ;;  %v1807_v42 = vld [vmem:[#allocation2 + $0xcf] sm:$0x3] }
 0x16d   :  { %v5843_v39 = vunpack.i.h.bf16 %v5841_v23  ;;  %v5842_v40 = vunpack.i.l.bf16 %v5841_v23  ;;  %6010 = vrot.lane.b32.xlu1 %v6009_v13, %s6339_s16  ;;  %5980 = vrot.lane.b32.xlu0 %v5979_v14, %s6340_s17  ;;  %v5989_v36 = vpack.i.bf16 %v2082_v48, %v2514_v26  ;;  %v6024_v62 = vpack.i.bf16 %v2433_v51, %v2441_v59  ;;  %v7183_v24 = vld [vmem:[#allocation2 + $0xd2] sm:$0xff]  ;;  %v1802_v51 = vld [vmem:[#allocation2 + $0xc6] sm:$0xff] }
 0x16e   :  { %v7178_v4 = vpack.c.bf16 %v999_v60, %v998_v58  ;;  %v2078_v11 = vld [vmem:[#allocation2 + $0x4d] sm:$0xff]  ;;  %v6039_v12 = vpack.i.bf16 %v7183_v24, %v2509_v5  ;;  %v2083_v14 = vld [vmem:[#allocation2 + $0x56] sm:$0x3]  ;;  %v6029_v26 = vpack.i.bf16 %v2160_v17, %v2515_v20  ;;  %v6064_v56 = vpack.i.bf16 %v1802_v51, %v1810_v53  ;;  %v2077_v59 = vld [vmem:[#allocation2 + $0x4b] sm:$0x3] }
 0x16f   :  { %v1079_v49 = vsel %vm1072_vm9, %v1077_v44, %v5842_v40  ;;  %v1073_v50 = vsel %vm1072_vm9, %v1070_v43, %v5843_v39  ;;  %v6019_v13 = vpack.i.bf16 %v2078_v11, %v2510_v7  ;;  %v6044_v23 = vpack.i.bf16 %v2075_v16, %v2083_v14  ;;  %v1799_v43 = vld [vmem:[#allocation3 + $0xb2] sm:$0x3]  ;;  %v2156_v44 = vld [vmem:[#allocation2 + $0xdc] sm:$0xff]  ;;  %v2079_v60 = vld [vmem:[#allocation2 + $0x55] sm:$0x3] }
 0x170   :  { %1261 = vmatprep.mubr.f32.mxu0 %v1079_v49  ;;  %v6054_v39 = vpack.i.bf16 %v7097_v18, %v1806_v27  ;;  %v6034_v40 = vpack.i.bf16 %v2162_v30, %v2517_v35  ;;  %v6059_v48 = vpack.i.bf16 %v1799_v43, %v1807_v42  ;;  %v2085_v58 = vld [vmem:[#allocation2 + $0x60] sm:$0x3]  ;;  %v2507_v7 = vld [vmem:[#allocation3 + $0xda] sm:$0x3]  ;;  %v2506_v11 = vld [vmem:[#allocation3 + $0xd2] sm:$0xff] }
 0x171   :  { %6015 = vrot.lane.b32.xlu1 %v6014_v38, %s6339_s16  ;;  %5990 = vrot.lane.b32.xlu0 %v5989_v36, %s6340_s17  ;;  %v2511_v38 = vld [vmem:[#allocation2 + $0xfa] sm:$0x3]  ;;  %v1803_v36 = vld [vmem:[#allocation2 + $0xce] sm:$0x3]  ;;  %v2153_v14 = vld [vmem:[#allocation3 + $0xc6] sm:$0x3] }
 0x172   :  { %1262 = vmatmul.mubr.f32.vlgmr.msra.gmra.mrb[36].mxu0 %v1073_v50  ;;  %v6049_v49 = vpack.i.bf16 %v2156_v44, %v2511_v38  ;;  %v1811_v50 = vld [vmem:[#allocation3 + $0xc6] sm:$0x3]  ;;  %v2165_v27 = vld [vmem:[#allocation3 + $0xda] sm:$0x3]  ;;  %v2519_v30 = vld [vmem:[#allocation3 + $0xee] sm:$0x3] }
 0x173   :  { %5449 = vmatpush3.bf16.msra.mxu0 %v7167_v57  ;;  %v6069_v18 = vpack.i.bf16 %v1803_v36, %v1811_v50  ;;  %v2161_v16 = vld [vmem:[#allocation2 + $0xe5] sm:$0x3]  ;;  %v2155_v42 = vld [vmem:[#allocation2 + $0xda] sm:$0x3]  ;;  %v2163_v43 = vld [vmem:[#allocation2 + $0xef] sm:$0x3] }
 0x174   :  { %5450 = vmatprep.subr.bf16.mxu0 %v8752_v3  ;;  %v2518_v17 = vld [vmem:[#allocation3 + $0xe6] sm:$0xff]  ;;  %v6094_v20 = vpack.i.bf16 %v2153_v14, %v2161_v16  ;;  %v6109_v38 = vpack.i.bf16 %v2155_v42, %v2163_v43  ;;  %v2787_v51 = vld [vmem:[#allocation2 + $0x81] sm:$0x3] }
 0x175   :  { %6025 = vrot.lane.b32.xlu1 %v6024_v62, %s6341_s18  ;;  %6005 = vrot.lane.b32.xlu0 %v6004_v1, %s6340_s17  ;;  %v2087_v62 = vld [vmem:[#allocation3 + $0x58] sm:$0x3]  ;;  %v6074_v1 = vpack.i.bf16 %v2077_v59, %v2085_v58  ;;  %v5846_v59 = vpop.permute.xlu0 %5845 }
 0x176   :  { %v6079_v5 = vpack.i.bf16 %v2079_v60, %v2087_v62 }
 0x177   :  { %5452 = vmatpush3.bf16.msra.mxu0 %v7178_v4 }
 0x178   :  { %5454 = vmatprep.subr.bf16.mxu0 %v6774_v19 }
 0x179   :  { %6040 = vrot.lane.b32.xlu1 %v6039_v12, %s6339_s16  ;;  %6020 = vrot.lane.b32.xlu0 %v6019_v13, %s6341_s18  ;;  %v6089_v12 = vpack.i.bf16 %v1810_v53, %v2507_v7  ;;  %v6084_v13 = vpack.i.bf16 %v7113_v63, %v2506_v11  ;;  %v2784_v63 = vld [vmem:[#allocation2 + $0x6f] sm:$0xff]  ;;  %v2795_v53 = vld [vmem:[#allocation3 + $0x80] sm:$0x3] }
 0x17a   :  { %v6139_v60 = vpack.i.bf16 %v2787_v51, %v2795_v53  ;;  %v2869_v7 = vld [vmem:[#allocation2 + $0x111] sm:$0x3] }
 0x17d   :  { %6045 = vrot.lane.b32.xlu1 %v6044_v23, %s6340_s17  ;;  %6030 = vrot.lane.b32.xlu0 %v6029_v26, %s6340_s17  ;;  %v6099_v23 = vpack.i.bf16 %v7137_v54, %v2518_v17  ;;  %v2157_v26 = vld [vmem:[#allocation2 + $0xe4] sm:$0x3]  ;;  %v2783_v54 = vld [vmem:[#allocation3 + $0x6c] sm:$0x3] }
 0x17e   :  { %v6114_v35 = vpack.i.bf16 %v2157_v26, %v2165_v27  ;;  %v1081_v26 = vld [vmem:[#allocation2 + $0x8f] sm:$0xff] }
 0x17f   :  { %v1089_v27 = vld [vmem:[#allocation3 + $0x8c] sm:$0xff] }
 0x181   :  { %6055 = vrot.lane.b32.xlu1 %v6054_v39, %s6340_s17  ;;  %6035 = vrot.lane.b32.xlu0 %v6034_v40, %s6339_s16  ;;  %v6104_v39 = vpack.i.bf16 %v2506_v11, %v2519_v30  ;;  %v2792_v40 = vld [vmem:[#allocation2 + $0x84] sm:$0xff] }
 0x182   :  { %v6124_v44 = vpack.i.bf16 %v2784_v63, %v2792_v40  ;;  %v5848_v63 = vunpack.i.h.bf16 %v5846_v59  ;;  %v5847_v40 = vunpack.i.l.bf16 %v5846_v59 }
 0x185   :  { %6060 = vrot.lane.b32.xlu1 %v6059_v48, %s6340_s17  ;;  %6050 = vrot.lane.b32.xlu0 %v6049_v49, %s6341_s18  ;;  %v2791_v48 = vld [vmem:[#allocation2 + $0x82] sm:$0x3]  ;;  %v2790_v49 = vld [vmem:[#allocation2 + $0x7a] sm:$0xff] }
 0x186   :  { %v6134_v36 = vpack.i.bf16 %v2783_v54, %v2791_v48  ;;  %v6119_v50 = vpack.i.bf16 %v7127_v0, %v2790_v49 }
 0x189   :  { %6070 = vrot.lane.b32.xlu1 %v6069_v18, %s6341_s18  ;;  %6065 = vrot.lane.b32.xlu0 %v6064_v56, %s6341_s18  ;;  %v2786_v18 = vld [vmem:[#allocation2 + $0x79] sm:$0xff] }
 0x18a   :  { %v2794_v56 = vld [vmem:[#allocation3 + $0x78] sm:$0xff] }
 0x18b   :  { %v6129_v62 = vpack.i.bf16 %v2786_v18, %v2794_v56  ;;  %v1082_v18 = vld [vmem:[#allocation2 + $0x97] sm:$0x3]  ;;  %v1090_v56 = vld [vmem:[#allocation3 + $0x94] sm:$0x3] }
 0x18d   :  { %6075 = vrot.lane.b32.xlu1 %v6074_v1, %s6339_s16  ;;  %6080 = vrot.lane.b32.xlu0 %v6079_v5, %s6341_s18  ;;  %v2868_v1 = vld [vmem:[#allocation2 + $0x109] sm:$0xff] }
 0x18e   :  { %v2861_v5 = vld [vmem:[#allocation3 + $0xee] sm:$0x3]  ;;  %v6144_v14 = vpack.i.bf16 %v2518_v17, %v2868_v1  ;;  %v1074_v1 = vsel %vm1072_vm9, %v7157_v33, %v5848_v63 }
 0x18f   :  { %v6149_v16 = vpack.i.bf16 %v2861_v5, %v2869_v7 }
 0x191   :  { %6090 = vrot.lane.b32.xlu1 %v6089_v12, %s6340_s17  ;;  %6085 = vrot.lane.b32.xlu0 %v6084_v13, %s6340_s17  ;;  %v5851_v12 = vpop.permute.xlu0 %5850 }
 0x192   :  { %v5853_v42 = vunpack.i.h.bf16 %v5851_v12  ;;  %v5852_v43 = vunpack.i.l.bf16 %v5851_v12 }
 0x195   :  { %6095 = vrot.lane.b32.xlu1 %v6094_v20, %s6340_s17  ;;  %6100 = vrot.lane.b32.xlu0 %v6099_v23, %s6341_s18  ;;  %v2864_v20 = vld [vmem:[#allocation2 + $0x108] sm:$0xff]  ;;  %v2872_v23 = vld [vmem:[#allocation3 + $0xfa] sm:$0xff] }
 0x199   :  { %6115 = vrot.lane.b32.xlu1 %v6114_v35, %s6341_s18  ;;  %6105 = vrot.lane.b32.xlu0 %v6104_v39, %s6341_s18  ;;  %v6154_v39 = vpack.i.bf16 %v2864_v20, %v2872_v23 }
 0x19d   :  { %6125 = vrot.lane.b32.xlu1 %v6124_v44, %s6339_s16  ;;  %6110 = vrot.lane.b32.xlu0 %v6109_v38, %s6339_s16 }
 0x1a1   :  { %6135 = vrot.lane.b32.xlu1 %v6134_v36, %s6340_s17  ;;  %6120 = vrot.lane.b32.xlu0 %v6119_v50, %s6340_s17 }
 0x1a3   :  { %v5856_v58 = vpop.permute.xlu1 %5855 }
 0x1a4   :  { %v5858_v0 = vunpack.i.h.bf16 %v5856_v58  ;;  %v5857_v11 = vunpack.i.l.bf16 %v5856_v58 }
 0x1a5   :  { %6140 = vrot.lane.b32.xlu1 %v6139_v60, %s6341_s18  ;;  %6130 = vrot.lane.b32.xlu0 %v6129_v62, %s6341_s18  ;;  %v1080_v60 = vsel %vm1072_vm9, %v7154_v32, %v5847_v40 }
 0x1a6   :  { %v1147_v30 = vsel %vm483_vm5, %v1081_v26, %v5858_v0  ;;  %v1153_v35 = vsel %vm483_vm5, %v1089_v27, %v5857_v11 }
 0x1a7   :  { %v5861_v13 = vpop.permute.xlu1 %5860  ;;  %v1149_v36 = vsel %vm1069_vm8, %v1147_v30, %v5853_v42  ;;  %v1155_v50 = vsel %vm1069_vm8, %v1153_v35, %v5852_v43 }
 0x1a8   :  { %v5863_v38 = vunpack.i.h.bf16 %v5861_v13  ;;  %v5862_v54 = vunpack.i.l.bf16 %v5861_v13 }
 0x1a9   :  { %6145 = vrot.lane.b32.xlu1 %v6144_v14, %s6340_s17  ;;  %6150 = vrot.lane.b32.xlu0 %v6149_v16, %s6340_s17 }
 0x1aa   :  { %v1148_v7 = vsel %vm483_vm5, %v1082_v18, %v5863_v38  ;;  %v1154_v0 = vsel %vm483_vm5, %v1090_v56, %v5862_v54  ;;  %v1168_v54 = vrot.slane %v7083_v46, 6 }
 0x1ab   :  { %v5876_v44 = vpop.permute.xlu1 %5875  ;;  %v5866_v17 = vpop.permute.xlu0 %5865 }
 0x1ac   :  { %v5868_v48 = vunpack.i.h.bf16 %v5866_v17  ;;  %v5867_v49 = vunpack.i.l.bf16 %v5866_v17  ;;  %v5878_v13 = vunpack.i.h.bf16 %v5876_v44  ;;  %v5877_v14 = vunpack.i.l.bf16 %v5876_v44 }
 0x1ad   :  { %6155 = vrot.lane.b32.xlu1 %v6154_v39, %s6341_s18 }
 0x1ae   :  { %v1151_v51 = vsel %vm1072_vm9, %v1149_v36, %v5868_v48  ;;  %v1157_v53 = vsel %vm1072_vm9, %v1155_v50, %v5867_v49  ;;  %v1098_v48 = vld [vmem:[#allocation2 + $0xae] sm:$0x3]  ;;  %v1372_v49 = vld [vmem:[#allocation3 + $0x1e] sm:$0xff] }
 0x1af   :  { %v7225_v59 = vpop.permute.xlu1 %5885  ;;  %v5871_v58 = vpop.permute.xlu0 %5870  ;;  %v1167_v62 = vrot.slane %v1157_v53, 6  ;;  %v1166_v5 = vrot.slane %v1151_v51, 6  ;;  %v1018_v51 = vld [vmem:[#allocation2 + $0x1f] sm:$0x3]  ;;  %v1173_v18 = vrot.slane %v1098_v48, 6 }
 0x1b0   :  { %v5873_v11 = vunpack.i.h.bf16 %v5871_v58  ;;  %v5872_v12 = vunpack.i.l.bf16 %v5871_v58  ;;  %v5887_v46 = vunpack.i.l.bf16 %v7225_v59 }
 0x1b1   :  { %v1181_v16 = vsel %vm1165_vm10, %v1080_v60, %v1167_v62  ;;  %v1180_v20 = vsel %vm1165_vm10, %v1074_v1, %v1166_v5  ;;  %v1174_v1 = vsel %vm1165_vm10, %v1168_v54, %v1173_v18 }
 0x1b2   :  { %v1150_v23 = vsel %vm1069_vm8, %v1148_v7, %v5873_v11  ;;  %v1156_v32 = vsel %vm1069_vm8, %v1154_v0, %v5872_v12  ;;  %1266 = vmatprep.mubr.f32.mxu0 %v1181_v16  ;;  %v1718_v16 = vld [vmem:[#allocation2 + $0x2c] sm:$0xff] }
 0x1b3   :  { %v7237_v26 = vpop.permute.xlu1 %5890  ;;  %v7239_v33 = vpop.permute.xlu0 %5880  ;;  %1267 = vmatmul.mubr.f32.gmra.mrb[38].mxu0 %v1180_v20  ;;  %v1158_v27 = vsel %vm1072_vm9, %v1156_v32, %v5877_v14  ;;  %v1152_v30 = vsel %vm1072_vm9, %v1150_v23, %v5878_v13  ;;  %v1726_v20 = vld [vmem:[#allocation3 + $0x32] sm:$0xff] }
 0x1b4   :  { %v1171_v35 = vrot.slane %v1158_v27, 6  ;;  %v1169_v39 = vrot.slane %v1152_v30, 6  ;;  %v5882_v44 = vunpack.i.l.bf16 %v7239_v33  ;;  %v5892_v58 = vunpack.i.l.bf16 %v7237_v26 }
 0x1b6   :  { %v1172_v42 = vsel %vm1165_vm10, %v1167_v62, %v1171_v35  ;;  %v1170_v43 = vsel %vm1165_vm10, %v1166_v5, %v1169_v39  ;;  %v1436_v53 = vsel %vm483_vm5, %v1372_v49, %v5882_v44  ;;  %v1450_v49 = vld [vmem:[#allocation3 + $0xa0] sm:$0xff] }
 0x1b7   :  { %v7243_v63 = vpop.permute.xlu1 %5900  ;;  %v7245_v40 = vpop.permute.xlu0 %5895  ;;  %1271 = vmatprep.mubr.f32.mxu0 %v1172_v42  ;;  %v1438_v56 = vsel %vm1069_vm8, %v1436_v53, %v5887_v46 }
 0x1b8   :  { %1272 = vmatmul.mubr.f32.gmra.mrb[40].mxu0 %v1170_v43  ;;  %v1440_v5 = vsel %vm1072_vm9, %v1438_v56, %v5892_v58  ;;  %v5883_v43 = vunpack.i.h.bf16 %v7239_v33  ;;  %v1364_v58 = vld [vmem:[#allocation2 + $0x16] sm:$0xff] }
 0x1b9   :  { %5250 = vmatprep.mubr.msk.f32.mxu0 %vm6337_vm3, %v8754_v8 }
 0x1bb   :  { %v7252_v17 = vpop.permute.xlu1 %5905  ;;  %v7254_v38 = vpop.permute.xlu0 %5910 }
 0x1bc   :  { %5251 = vmatmul.mubr.msk.f32.vlgmr.msra.gmra.mrb[42].mxu0 %vm483_vm5, %v7065_v6  ;;  %v1182_v6 = vsel %vm1165_vm10, %v1018_v51, %v1168_v54 }
 0x1bd   :  { %5456 = vmatpush3.bf16.msra.mxu0 %v6782_v22  ;;  %5253 = vmatprep.mubr.msk.f32.mxu0 %vm6337_vm3, %v8754_v8 }
 0x1be   :  { %5458 = vmatprep.subr.bf16.mxu0 %v6794_v25 }
 0x1bf   :  { %v7262_v36 = vpop.permute.xlu1 %5920  ;;  %v7264_v50 = vpop.permute.xlu0 %5915 }
 0x1c0   :  { %5254 = vmatmul.mubr.msk.f32.gmra.mrb[44].mxu0 %vm483_vm5, %v1182_v6  ;;  %v5917_v23 = vunpack.i.l.bf16 %v7264_v50  ;;  %v5922_v48 = vunpack.i.l.bf16 %v7262_v36  ;;  %v5918_v51 = vunpack.i.h.bf16 %v7264_v50 }
 0x1c1   :  { %5460 = vmatpush3.bf16.msra.mxu0 %v6802_v28  ;;  %5256 = vmatprep.mubr.msk.f32.mxu0 %vm6337_vm3, %v8754_v8 }
 0x1c2   :  { %5462 = vmatprep.subr.bf16.mxu0 %v6814_v31  ;;  %v1514_v6 = vsel %vm483_vm5, %v1450_v49, %v5917_v23  ;;  %v1451_v23 = vld [vmem:[#allocation3 + $0xa8] sm:$0x3] }
 0x1c3   :  { %v7274_v60 = vpop.permute.xlu1 %5940  ;;  %v7276_v62 = vpop.permute.xlu0 %5925 }
 0x1c4   :  { %5257 = vmatmul.mubr.msk.f32.gmra.mrb[46].mxu0 %vm483_vm5, %v1174_v1  ;;  %v5927_v18 = vunpack.i.l.bf16 %v7276_v62  ;;  %v5902_v1 = vunpack.i.l.bf16 %v7243_v63 }
 0x1c5   :  { %5464 = vmatpush3.bf16.msra.mxu0 %v6822_v34  ;;  %1615 = vmatprep.mubr.f32.mxu0 %v1440_v5  ;;  %v5897_v5 = vunpack.i.l.bf16 %v7245_v40 }
 0x1c6   :  { %5466 = vmatprep.subr.bf16.mxu0 %v6831_v37 }
 0x1c7   :  { %v5946_v7 = vpop.permute.xlu1 %5945  ;;  %v7285_v0 = vpop.permute.xlu0 %5930 }
 0x1c8   :  { %v5948_v30 = vunpack.i.h.bf16 %v5946_v7  ;;  %v5947_v35 = vunpack.i.l.bf16 %v5946_v7  ;;  %v5932_v50 = vunpack.i.l.bf16 %v7285_v0 }
 0x1c9   :  { %5468 = vmatpush3.bf16.msra.mxu0 %v6849_v41 }
 0x1ca   :  { %5470 = vmatprep.subr.bf16.mxu0 %v6857_v45 }
 0x1cb   :  { %v7289_v11 = vpop.permute.xlu1 %5960  ;;  %v5936_v12 = vpop.permute.xlu0 %5935 }
 0x1cc   :  { %v5938_v13 = vunpack.i.h.bf16 %v5936_v12  ;;  %v5937_v14 = vunpack.i.l.bf16 %v5936_v12 }
 0x1cd   :  { %5472 = vmatpush3.bf16.msra.mxu0 %v6872_v55 }
 0x1ce   :  { %v1784_v32 = vsel %vm483_vm5, %v1718_v16, %v5938_v13  ;;  %v1790_v27 = vsel %vm483_vm5, %v1726_v20, %v5937_v14  ;;  %5474 = vmatprep.subr.bf16.mxu0 %v6886_v2  ;;  %v5888_v13 = vunpack.i.h.bf16 %v7225_v59  ;;  %v1430_v14 = vsel %vm483_vm5, %v1364_v58, %v5883_v43  ;;  %v1442_v20 = vld [vmem:[#allocation2 + $0xa5] sm:$0xff] }
 0x1cf   :  { %v7296_v39 = vpop.permute.xlu1 %5965  ;;  %v5951_v42 = vpop.permute.xlu0 %5950  ;;  %v1792_v53 = vsel %vm1069_vm8, %v1790_v27, %v5947_v35  ;;  %v1786_v46 = vsel %vm1069_vm8, %v1784_v32, %v5948_v30  ;;  %v5907_v16 = vunpack.i.l.bf16 %v7252_v17  ;;  %v5923_v32 = vunpack.i.h.bf16 %v7262_v36 }
 0x1d0   :  { %v5953_v44 = vunpack.i.h.bf16 %v5951_v42  ;;  %v5952_v54 = vunpack.i.l.bf16 %v5951_v42  ;;  %v1508_v27 = vsel %vm483_vm5, %v1442_v20, %v5918_v51  ;;  %v5928_v30 = vunpack.i.h.bf16 %v7276_v62  ;;  %v1373_v42 = vld [vmem:[#allocation3 + $0x26] sm:$0x3] }
 0x1d1   :  { %5476 = vmatpush3.bf16.msra.mxu0 %v6896_v9  ;;  %v1516_v35 = vsel %vm1069_vm8, %v1514_v6, %v5897_v5  ;;  %v5898_v59 = vunpack.i.h.bf16 %v7245_v40  ;;  %v1515_v43 = vsel %vm483_vm5, %v1451_v23, %v5922_v48  ;;  %v5903_v36 = vunpack.i.h.bf16 %v7243_v63  ;;  %v1365_v5 = vld [vmem:[#allocation2 + $0x1e] sm:$0x3] }
 0x1d2   :  { %v1794_v56 = vsel %vm1072_vm9, %v1792_v53, %v5952_v54  ;;  %v1788_v33 = vsel %vm1072_vm9, %v1786_v46, %v5953_v44  ;;  %5478 = vmatprep.subr.bf16.mxu0 %v6912_v21  ;;  %v1518_v44 = vsel %vm1072_vm9, %v1516_v35, %v5927_v18  ;;  %v5933_v54 = vunpack.i.h.bf16 %v7285_v0  ;;  %v1443_v46 = vld [vmem:[#allocation2 + $0xad] sm:$0x3] }
 0x1d3   :  { %v7312_v7 = vpop.permute.xlu1 %5985  ;;  %v7314_v12 = vpop.permute.xlu0 %5955  ;;  %1969 = vmatprep.mubr.f32.mxu1 %v1794_v56  ;;  %v1437_v62 = vsel %vm483_vm5, %v1373_v42, %v5902_v1  ;;  %v1517_v49 = vsel %vm1069_vm8, %v1515_v43, %v5932_v50  ;;  %v1432_v40 = vsel %vm1069_vm8, %v1430_v14, %v5888_v13  ;;  %v5908_v0 = vunpack.i.h.bf16 %v7252_v17 }
 0x1d4   :  { %1970 = vmatmul.mubr.f32.vlgmr.msra.gmra.mrb[66].mxu1 %v1788_v33  ;;  %v5912_v48 = vunpack.i.l.bf16 %v7254_v38  ;;  %v5942_v6 = vunpack.i.l.bf16 %v7274_v60  ;;  %v1510_v63 = vsel %vm1069_vm8, %v1508_v27, %v5898_v59  ;;  %v1509_v18 = vsel %vm483_vm5, %v1443_v46, %v5923_v32 }
 0x1d5   :  { %5532 = vmatpush3.bf16.msra.mxu1 %v6782_v22  ;;  %5480 = vmatpush3.bf16.msra.mxu0 %v6922_v29  ;;  %v1512_v56 = vsel %vm1072_vm9, %v1510_v63, %v5928_v30  ;;  %v1439_v33 = vsel %vm1069_vm8, %v1437_v62, %v5907_v16  ;;  %v1527_v58 = vrot.slane %v1518_v44, 6  ;;  %v5893_v1 = vunpack.i.h.bf16 %v7237_v26 }
 0x1d6   :  { %5534 = vmatprep.subr.bf16.mxu1 %v6794_v25  ;;  %5482 = vmatprep.subr.bf16.mxu0 %v6943_v52  ;;  %v1511_v17 = vsel %vm1069_vm8, %v1509_v18, %v5933_v54  ;;  %v1519_v50 = vsel %vm1072_vm9, %v1517_v49, %v5942_v6  ;;  %v1431_v13 = vsel %vm483_vm5, %v1365_v5, %v5903_v36  ;;  %v5913_v14 = vunpack.i.h.bf16 %v7254_v38 }
 0x1d7   :  { %v7334_v51 = vpop.permute.xlu1 %5995  ;;  %v7336_v53 = vpop.permute.xlu0 %5970  ;;  %v5943_v16 = vunpack.i.h.bf16 %v7274_v60  ;;  %v1434_v26 = vsel %vm1072_vm9, %v1432_v40, %v5893_v1  ;;  %v1441_v32 = vsel %vm1072_vm9, %v1439_v33, %v5912_v48  ;;  %v1433_v27 = vsel %vm1069_vm8, %v1431_v13, %v5908_v0  ;;  %v1380_v33 = vld [vmem:[#allocation2 + $0x2d] sm:$0xff]  ;;  %v1459_v1 = vld [vmem:[#allocation2 + $0xc4] sm:$0x3] }
 0x1d8   :  { %v1526_v30 = vrot.slane %v1512_v56, 6  ;;  %v1541_v35 = vsel %vm1165_vm10, %v1441_v32, %v1527_v58  ;;  %v1531_v42 = vrot.slane %v1519_v50, 6  ;;  %v1435_v43 = vsel %vm1072_vm9, %v1433_v27, %v5913_v14  ;;  %v1381_v50 = vld [vmem:[#allocation2 + $0x35] sm:$0x3]  ;;  %v1813_v32 = vld [vmem:[#allocation2 + $0xda] sm:$0x3] }
 0x1d9   :  { %5536 = vmatpush3.bf16.msra.mxu1 %v6802_v28  ;;  %5484 = vmatpush3.bf16.msra.mxu0 %v6950_v61  ;;  %v1513_v38 = vsel %vm1072_vm9, %v1511_v17, %v5943_v16  ;;  %v5988_v62 = vunpack.i.h.bf16 %v7312_v7  ;;  %v5998_v0 = vunpack.i.h.bf16 %v7334_v51  ;;  %v1533_v13 = vrot.slane %v1459_v1, 6 }
 0x1da   :  { %5538 = vmatprep.subr.bf16.mxu1 %v6814_v31  ;;  %5485 = vmatprep.subr.bf16.mxu0 %v8752_v3  ;;  %v1540_v54 = vsel %vm1165_vm10, %v1435_v43, %v1526_v30  ;;  %v1529_v36 = vrot.slane %v1513_v38, 6  ;;  %v1532_v49 = vsel %vm1165_vm10, %v1527_v58, %v1531_v42  ;;  %v1528_v58 = vrot.slane %v7122_v15, 6  ;;  %v7437_v43 = vld [vmem:[#allocation2 + $0xe8] sm:$0xff] }
 0x1db   :  { %v7356_v20 = vpop.permute.xlu1 %6000  ;;  %v7358_v23 = vpop.permute.xlu0 %5975  ;;  %v5962_v42 = vunpack.i.l.bf16 %v7289_v11  ;;  %v1887_v38 = vrot.slane %v1813_v32, 6  ;;  %v1804_v32 = vld [vmem:[#allocation3 + $0xb4] sm:$0xff] }
 0x1dc   :  { %1616 = vmatmul.mubr.f32.vlgmr.msra.gmra.mrb[48].mxu0 %v1434_v26  ;;  %v1530_v63 = vsel %vm1165_vm10, %v1526_v30, %v1529_v36  ;;  %v1542_v15 = vsel %vm1165_vm10, %v1381_v50, %v1528_v58  ;;  %v1534_v26 = vsel %vm1165_vm10, %v1528_v58, %v1533_v13  ;;  %v5958_v13 = vunpack.i.h.bf16 %v7314_v12 }
 0x1dd   :  { %5540 = vmatpush3.bf16.msra.mxu1 %v6822_v34  ;;  %1620 = vmatprep.mubr.f32.mxu0 %v1541_v35  ;;  %v1882_v35 = vrot.slane %v7183_v24, 6  ;;  %v1727_v24 = vld [vmem:[#allocation3 + $0x3a] sm:$0x3] }
 0x1de   :  { %5487 = vmatpush3.bf16.msra.mxu0 %v7167_v57  ;;  %5542 = vmatprep.subr.bf16.mxu1 %v6831_v37 }
 0x1df   :  { %v7368_v60 = vpop.permute.xlu1 %6010  ;;  %v7370_v59 = vpop.permute.xlu0 %5980  ;;  %5488 = vmatprep.subr.bf16.mxu0 %v8752_v3  ;;  %v1888_v1 = vsel %vm1165_vm10, %v1882_v35, %v1887_v38 }
 0x1e0   :  { %v5983_v44 = vunpack.i.h.bf16 %v7370_v59  ;;  %1621 = vmatmul.mubr.f32.gmra.mrb[50].mxu0 %v1540_v54  ;;  %v5967_v54 = vunpack.i.l.bf16 %v7296_v39 }
 0x1e1   :  { %5544 = vmatpush3.bf16.msra.mxu1 %v6849_v41  ;;  %1625 = vmatprep.mubr.f32.mxu0 %v1532_v49  ;;  %v1735_v49 = vld [vmem:[#allocation2 + $0x4b] sm:$0x3] }
 0x1e2   :  { %v2492_v40 = vsel %vm483_vm5, %v7134_v47, %v5983_v44  ;;  %5490 = vmatpush3.bf16.msra.mxu0 %v7178_v4  ;;  %5546 = vmatprep.subr.bf16.mxu1 %v6857_v45  ;;  %v5963_v44 = vunpack.i.h.bf16 %v7289_v11  ;;  %v2236_v11 = vrot.slane %v7437_v43, 6 }
 0x1e3   :  { %v7384_v48 = vpop.permute.xlu1 %6015  ;;  %v7386_v46 = vpop.permute.xlu0 %5990  ;;  %5523 = vmatprep.subr.bf16.mxu0 %v8752_v3  ;;  %v2494_v6 = vsel %vm1069_vm8, %v2492_v40, %v5988_v62 }
 0x1e4   :  { %1626 = vmatmul.mubr.f32.gmra.mrb[52].mxu0 %v1530_v63  ;;  %v7394_v47 = vsel %vm1072_vm9, %v2494_v6, %v5998_v0  ;;  %v1896_v6 = vsel %vm1165_vm10, %v1735_v49, %v1882_v35  ;;  %v1719_v63 = vld [vmem:[#allocation2 + $0x34] sm:$0x3]  ;;  %v1797_v35 = vld [vmem:[#allocation2 + $0xc3] sm:$0x3] }
 0x1e5   :  { %5548 = vmatpush3.bf16.msra.mxu1 %v6872_v55  ;;  %5267 = vmatprep.mubr.msk.f32.mxu0 %vm6337_vm3, %v8754_v8  ;;  %v1785_v50 = vsel %vm483_vm5, %v1719_v63, %v5963_v44  ;;  %v5972_v44 = vunpack.i.l.bf16 %v7336_v53 }
 0x1e6   :  { %5550 = vmatprep.subr.bf16.mxu1 %v6886_v2 }
 0x1e7   :  { %v7399_v18 = vpop.permute.xlu1 %6025  ;;  %v7401_v56 = vpop.permute.xlu0 %6005 }
 0x1e8   :  { %5268 = vmatmul.mubr.msk.f32.vlgmr.msra.gmra.mrb[54].mxu0 %vm483_vm5, %v1380_v33 }
 0x1e9   :  { %5552 = vmatpush3.bf16.msra.mxu1 %v6896_v9  ;;  %5525 = vmatpush3.bf16.msra.mxu0 %v7167_v57 }
 0x1ea   :  { %5270 = vmatprep.mubr.msk.f32.mxu0 %vm6337_vm3, %v8754_v8  ;;  %5526 = vmatprep.subr.bf16.mxu0 %v8752_v3 }
 0x1eb   :  { %v7409_v5 = vpop.permute.xlu1 %6040  ;;  %v7411_v17 = vpop.permute.xlu0 %6020  ;;  %5554 = vmatprep.subr.bf16.mxu1 %v6912_v21 }
 0x1ec   :  { %5271 = vmatmul.mubr.msk.f32.gmra.mrb[56].mxu0 %vm483_vm5, %v1542_v15  ;;  %v5968_v15 = vunpack.i.h.bf16 %v7296_v39  ;;  %v5973_v39 = vunpack.i.h.bf16 %v7336_v53 }
 0x1ed   :  { %5556 = vmatpush3.bf16.msra.mxu1 %v6922_v29  ;;  %5273 = vmatprep.mubr.msk.f32.mxu0 %vm6337_vm3, %v8754_v8 }
 0x1ee   :  { %5528 = vmatpush3.bf16.msra.mxu0 %v7178_v4  ;;  %5558 = vmatprep.subr.bf16.mxu1 %v6943_v52 }
 0x1ef   :  { %v7421_v14 = vpop.permute.xlu1 %6045  ;;  %v7423_v16 = vpop.permute.xlu0 %6030  ;;  %5561 = vmatprep.subr.bf16.mxu0 %v8752_v3 }
 0x1f0   :  { %5274 = vmatmul.mubr.msk.f32.gmra.mrb[58].mxu0 %vm483_vm5, %v1534_v26  ;;  %v1796_v26 = vld [vmem:[#allocation2 + $0xbb] sm:$0xff]  ;;  %v6048_v43 = vunpack.i.h.bf16 %v7421_v14 }
 0x1f1   :  { %5560 = vmatpush3.bf16.msra.mxu1 %v6950_v61  ;;  %5284 = vmatprep.mubr.msk.f32.mxu0 %vm6337_vm3, %v8754_v8 }
 0x1f2   :  { %5606 = vmatprep.subr.bf16.mxu1 %v6774_v19 }
 0x1f3   :  { %v6056_v27 = vpop.permute.xlu1 %6055  ;;  %v7432_v30 = vpop.permute.xlu0 %6035 }
 0x1f4   :  { %5285 = vmatmul.mubr.msk.f32.vlgmr.msra.gmra.mrb[60].mxu0 %vm483_vm5, %v7141_v10  ;;  %v6058_v36 = vunpack.i.h.bf16 %v6056_v27  ;;  %v6057_v62 = vunpack.i.l.bf16 %v6056_v27  ;;  %v1791_v10 = vsel %vm483_vm5, %v1727_v24, %v5962_v42  ;;  %v1805_v27 = vld [vmem:[#allocation3 + $0xbc] sm:$0x3] }
 0x1f5   :  { %5563 = vmatpush3.bf16.msra.mxu0 %v7167_v57  ;;  %5287 = vmatprep.mubr.msk.f32.mxu0 %vm6337_vm3, %v8754_v8  ;;  %v1793_v49 = vsel %vm1069_vm8, %v1791_v10, %v5967_v54  ;;  %v5977_v54 = vunpack.i.l.bf16 %v7358_v23 }
 0x1f6   :  { %5564 = vmatprep.subr.bf16.mxu0 %v8752_v3  ;;  %v5957_v3 = vunpack.i.l.bf16 %v7314_v12  ;;  %v1862_v42 = vsel %vm483_vm5, %v1796_v26, %v6058_v36  ;;  %v1868_v24 = vsel %vm483_vm5, %v1804_v32, %v6057_v62 }
 0x1f7   :  { %v6061_v40 = vpop.permute.xlu1 %6060  ;;  %v7446_v0 = vpop.permute.xlu0 %6050  ;;  %v1864_v32 = vsel %vm1069_vm8, %v1862_v42, %v5958_v13 }
 0x1f8   :  { %v6063_v33 = vunpack.i.h.bf16 %v6061_v40  ;;  %v6062_v58 = vunpack.i.l.bf16 %v6061_v40  ;;  %5288 = vmatmul.mubr.msk.f32.gmra.mrb[62].mxu0 %vm483_vm5, %v1896_v6  ;;  %v1870_v53 = vsel %vm1069_vm8, %v1868_v24, %v5957_v3  ;;  %v2088_v24 = vld [vmem:[#allocation2 + $0x59] sm:$0xff] }
 0x1f9   :  { %5290 = vmatprep.mubr.msk.f32.mxu0 %vm6337_vm3, %v8754_v8  ;;  %5566 = vmatpush3.bf16.msra.mxu0 %v7178_v4 }
 0x1fa   :  { %v1869_v38 = vsel %vm483_vm5, %v1805_v27, %v6062_v58  ;;  %v1863_v12 = vsel %vm483_vm5, %v1797_v35, %v6063_v33  ;;  %5568 = vmatprep.subr.bf16.mxu0 %v6774_v19  ;;  %v5978_v58 = vunpack.i.h.bf16 %v7358_v23  ;;  %v5982_v33 = vunpack.i.l.bf16 %v7370_v59 }
 0x1fb   :  { %v6071_v40 = vpop.permute.xlu1 %6070  ;;  %v6066_v36 = vpop.permute.xlu0 %6065  ;;  %v1871_v26 = vsel %vm1069_vm8, %v1869_v38, %v5977_v54  ;;  %v1795_v54 = vsel %vm1072_vm9, %v1793_v49, %v5972_v44  ;;  %v5987_v49 = vunpack.i.l.bf16 %v7312_v7 }
 0x1fc   :  { %v6073_v62 = vunpack.i.h.bf16 %v6071_v40  ;;  %v6072_v6 = vunpack.i.l.bf16 %v6071_v40  ;;  %v6068_v63 = vunpack.i.h.bf16 %v6066_v36  ;;  %v6067_v10 = vunpack.i.l.bf16 %v6066_v36  ;;  %5291 = vmatmul.mubr.msk.f32.gmra.mrb[64].mxu0 %vm483_vm5, %v1888_v1 }
 0x1fd   :  { %5301 = vmatprep.mubr.msk.f32.mxu0 %vm6337_vm3, %v8754_v8  ;;  %v1865_v23 = vsel %vm1069_vm8, %v1863_v12, %v5978_v58  ;;  %v1787_v1 = vsel %vm1069_vm8, %v1785_v50, %v5968_v15  ;;  %v2434_v58 = vld [vmem:[#allocation3 + $0x5a] sm:$0xff] }
 0x1fe   :  { %v1873_v27 = vsel %vm1072_vm9, %v1871_v26, %v6072_v6  ;;  %v1866_v19 = vsel %vm1072_vm9, %v1864_v32, %v6068_v63  ;;  %v1872_v35 = vsel %vm1072_vm9, %v1870_v53, %v6067_v10  ;;  %v1867_v59 = vsel %vm1072_vm9, %v1865_v23, %v6073_v62  ;;  %v2167_v10 = vld [vmem:[#allocation2 + $0xf0] sm:$0x3]  ;;  %v2089_v50 = vld [vmem:[#allocation2 + $0x61] sm:$0x3] }
 0x1ff   :  { %v7482_v38 = vpop.permute.xlu1 %6075  ;;  %v7484_v13 = vpop.permute.xlu0 %6080  ;;  %v1881_v3 = vrot.slane %v1872_v35, 6  ;;  %v1880_v42 = vrot.slane %v1866_v19, 6  ;;  %v1789_v40 = vsel %vm1072_vm9, %v1787_v1, %v5973_v39  ;;  %v1885_v36 = vrot.slane %v1873_v27, 6  ;;  %v2080_v27 = vld [vmem:[#allocation3 + $0x46] sm:$0xff]  ;;  %v2150_v35 = vld [vmem:[#allocation2 + $0xd1] sm:$0xff] }
 0x200   :  { %v5993_v6 = vunpack.i.h.bf16 %v7386_v46  ;;  %5302 = vmatmul.mubr.msk.f32.vlgmr.msra.gmra.mrb[66].mxu0 %vm483_vm5, %v2088_v24  ;;  %v2498_v15 = vsel %vm483_vm5, %v2434_v58, %v5982_v33  ;;  %v2250_v62 = vsel %vm1165_vm10, %v2089_v50, %v2236_v11  ;;  %v1883_v26 = vrot.slane %v1867_v59, 6  ;;  %v2072_v23 = vld [vmem:[#allocation2 + $0x42] sm:$0xff] }
 0x201   :  { %v1895_v12 = vsel %vm1165_vm10, %v1795_v54, %v1881_v3  ;;  %v1894_v63 = vsel %vm1165_vm10, %v1789_v40, %v1880_v42  ;;  %5570 = vmatpush3.bf16.msra.mxu0 %v6782_v22  ;;  %5304 = vmatprep.mubr.msk.f32.mxu0 %vm6337_vm3, %v8754_v8  ;;  %v1886_v7 = vsel %vm1165_vm10, %v1881_v3, %v1885_v36  ;;  %v2241_v33 = vrot.slane %v2167_v10, 6 }
 0x202   :  { %1974 = vmatprep.mubr.f32.mxu1 %v1895_v12  ;;  %5572 = vmatprep.subr.bf16.mxu0 %v6794_v25  ;;  %v5997_v19 = vunpack.i.l.bf16 %v7334_v51  ;;  %v2500_v1 = vsel %vm1069_vm8, %v2498_v15, %v5987_v49  ;;  %v2144_v59 = vsel %vm483_vm5, %v2080_v27, %v5993_v6  ;;  %v6003_v24 = vunpack.i.h.bf16 %v7356_v20 }
 0x203   :  { %v7500_v39 = vpop.permute.xlu1 %6090  ;;  %v7502_v44 = vpop.permute.xlu0 %6085  ;;  %1975 = vmatmul.mubr.f32.gmra.mrb[68].mxu1 %v1894_v63  ;;  %v6047_v54 = vunpack.i.l.bf16 %v7421_v14  ;;  %v6013_v51 = vunpack.i.h.bf16 %v7368_v60  ;;  %v6043_v36 = vunpack.i.h.bf16 %v7409_v5  ;;  %v6033_v12 = vunpack.i.h.bf16 %v7423_v16 }
 0x204   :  { %v6093_v32 = vunpack.i.h.bf16 %v7500_v39  ;;  %v6088_v53 = vunpack.i.h.bf16 %v7502_v44  ;;  %5305 = vmatmul.mubr.msk.f32.gmra.mrb[68].mxu0 %vm483_vm5, %v2250_v62  ;;  %1979 = vmatprep.mubr.f32.mxu1 %v1886_v7  ;;  %v1884_v63 = vsel %vm1165_vm10, %v1880_v42, %v1883_v26  ;;  %v2242_v50 = vsel %vm1165_vm10, %v2236_v11, %v2241_v33  ;;  %v2081_v62 = vld [vmem:[#allocation3 + $0x4e] sm:$0x3] }
 0x205   :  { %5574 = vmatpush3.bf16.msra.mxu0 %v6802_v28  ;;  %5307 = vmatprep.mubr.msk.f32.mxu0 %vm6337_vm3, %v8754_v8  ;;  %v2502_v15 = vsel %vm1072_vm9, %v2500_v1, %v5997_v19  ;;  %v2146_v49 = vsel %vm1069_vm8, %v2144_v59, %v6003_v24  ;;  %v6023_v26 = vunpack.i.h.bf16 %v7411_v17  ;;  %v2145_v11 = vsel %vm483_vm5, %v2081_v62, %v6047_v54  ;;  %v2158_v33 = vld [vmem:[#allocation3 + $0xc8] sm:$0xff]  ;;  %v2873_v62 = vld [vmem:[#allocation3 + $0x102] sm:$0x3] }
 0x206   :  { %v2216_v40 = vsel %vm483_vm5, %v2150_v35, %v6093_v32  ;;  %v2138_v3 = vsel %vm483_vm5, %v2072_v23, %v6088_v53  ;;  %5576 = vmatprep.subr.bf16.mxu0 %v6814_v31  ;;  %v6038_v32 = vunpack.i.h.bf16 %v7432_v30  ;;  %v6077_v53 = vunpack.i.l.bf16 %v7482_v38 }
 0x207   :  { %v7525_v6 = vpop.permute.xlu0 %6100  ;;  %v6096_v10 = vpop.permute.xlu1 %6095  ;;  %1980 = vmatmul.mubr.f32.gmra.mrb[70].mxu1 %v1884_v63  ;;  %v2218_v7 = vsel %vm1069_vm8, %v2216_v40, %v6043_v36  ;;  %v2140_v42 = vsel %vm1069_vm8, %v2138_v3, %v6013_v51  ;;  %v6053_v27 = vunpack.i.h.bf16 %v7446_v0  ;;  %v2222_v19 = vsel %vm483_vm5, %v2158_v33, %v6033_v12  ;;  %v2073_v3 = vld [vmem:[#allocation2 + $0x4a] sm:$0x3] }
 0x208   :  { %v6103_v58 = vunpack.i.h.bf16 %v7525_v6  ;;  %5308 = vmatmul.mubr.msk.f32.gmra.mrb[70].mxu0 %vm483_vm5, %v2242_v50  ;;  %v6078_v35 = vunpack.i.h.bf16 %v7482_v38  ;;  %v6082_v23 = vunpack.i.l.bf16 %v7484_v13  ;;  %v6098_v59 = vunpack.i.h.bf16 %v6096_v10 }
 0x209   :  { %5578 = vmatpush3.bf16.msra.mxu0 %v6822_v34  ;;  %2677 = vmatprep.mubr.f32.mxu0 %v2502_v15  ;;  %v2142_v54 = vsel %vm1072_vm9, %v2140_v42, %v6023_v26  ;;  %v7554_v40 = vsel %vm1072_vm9, %v2218_v7, %v6053_v27  ;;  %v2224_v38 = vsel %vm1069_vm8, %v2222_v19, %v6038_v32  ;;  %v6097_v51 = vunpack.i.l.bf16 %v6096_v10  ;;  %v2151_v32 = vld [vmem:[#allocation2 + $0xd9] sm:$0x3]  ;;  %v2159_v42 = vld [vmem:[#allocation3 + $0xd0] sm:$0x3] }
 0x20a   :  { %5580 = vmatprep.subr.bf16.mxu0 %v6831_v37  ;;  %v2148_v14 = vsel %vm1072_vm9, %v2146_v49, %v6103_v58  ;;  %v2147_v36 = vsel %vm1069_vm8, %v2145_v11, %v6077_v53  ;;  %v5992_v12 = vunpack.i.l.bf16 %v7386_v46  ;;  %v2139_v63 = vsel %vm483_vm5, %v2073_v3, %v6048_v43  ;;  %v2865_v49 = vld [vmem:[#allocation2 + $0x110] sm:$0x3] }
 0x20b   :  { %v7548_v1 = vpop.permute.xlu0 %6105  ;;  %2323 = vmatprep.mubr.f32.mxu1 %v2148_v14  ;;  %v6083_v58 = vunpack.i.h.bf16 %v7484_v13  ;;  %v6116_v50 = vpop.permute.xlu1 %6115  ;;  %v2141_v53 = vsel %vm1069_vm8, %v2139_v63, %v6078_v35  ;;  %v2234_v13 = vrot.slane %v7554_v40, 6  ;;  %v6159_v7 = vpack.i.bf16 %v2865_v49, %v2873_v62  ;;  %v6309_v49 = vld [vmem:[#allocation2 + $0xe7] sm:$0xff] }
 0x20c   :  { %v6108_v24 = vunpack.i.h.bf16 %v7548_v1  ;;  %2324 = vmatmul.mubr.f32.vlgmr.msra.gmra.mrb[72].mxu1 %v2142_v54  ;;  %v2217_v26 = vsel %vm483_vm5, %v2151_v32, %v6098_v59  ;;  %v2223_v33 = vsel %vm483_vm5, %v2159_v42, %v6097_v51  ;;  %v6118_v27 = vunpack.i.h.bf16 %v6116_v50  ;;  %v2512_v51 = vld [vmem:[#allocation3 + $0xdc] sm:$0xff] }
 0x20d   :  { %5582 = vmatpush3.bf16.msra.mxu0 %v6849_v41  ;;  %5608 = vmatpush3.bf16.msra.mxu1 %v6782_v22  ;;  %v2149_v22 = vsel %vm1072_vm9, %v2147_v36, %v6082_v23  ;;  %v6117_v19 = vunpack.i.l.bf16 %v6116_v50  ;;  %v2143_v23 = vsel %vm1072_vm9, %v2141_v53, %v6083_v58  ;;  %v6007_v36 = vunpack.i.l.bf16 %v7401_v56 }
 0x20e   :  { %v2226_v15 = vsel %vm1072_vm9, %v2224_v38, %v6108_v24  ;;  %5584 = vmatprep.subr.bf16.mxu0 %v6857_v45  ;;  %5610 = vmatprep.subr.bf16.mxu1 %v6794_v25  ;;  %v6087_v25 = vunpack.i.l.bf16 %v7502_v44  ;;  %v2248_v54 = vsel %vm1165_vm10, %v2143_v23, %v2234_v13  ;;  %v2576_v50 = vsel %vm483_vm5, %v2512_v51, %v5992_v12 }
 0x20f   :  { %v6111_v10 = vpop.permute.xlu0 %6110  ;;  %v2235_v46 = vrot.slane %v2226_v15, 6  ;;  %6160 = vrot.lane.b32.xlu1 %v6159_v7, %s6341_s18  ;;  %v7585_v3 = vpop.permute.xlu1 %6125  ;;  %v6092_v15 = vunpack.i.l.bf16 %v7500_v39  ;;  %v6102_v32 = vunpack.i.l.bf16 %v7525_v6  ;;  %v6012_v6 = vunpack.i.l.bf16 %v7368_v60  ;;  %v2435_v7 = vld [vmem:[#allocation3 + $0x62] sm:$0x3] }
 0x210   :  { %v6113_v43 = vunpack.i.h.bf16 %v6111_v10  ;;  %v6112_v11 = vunpack.i.l.bf16 %v6111_v10  ;;  %v2570_v62 = vsel %vm483_vm5, %v6309_v49, %v6087_v25  ;;  %v6032_v42 = vunpack.i.l.bf16 %v7423_v16 }
 0x211   :  { %v2249_v14 = vsel %vm1165_vm10, %v2149_v22, %v2235_v46  ;;  %5586 = vmatpush3.bf16.msra.mxu0 %v6872_v55  ;;  %5612 = vmatpush3.bf16.msra.mxu1 %v6802_v28  ;;  %v6002_v28 = vunpack.i.l.bf16 %v7356_v20  ;;  %v6127_v20 = vunpack.i.l.bf16 %v7585_v3  ;;  %v2572_v60 = vsel %vm1069_vm8, %v2570_v62, %v6012_v6 }
 0x212   :  { %v2219_v35 = vsel %vm1069_vm8, %v2217_v26, %v6113_v43  ;;  %v2225_v24 = vsel %vm1069_vm8, %v2223_v33, %v6112_v11  ;;  %2328 = vmatprep.mubr.f32.mxu1 %v2249_v14  ;;  %5588 = vmatprep.subr.bf16.mxu0 %v6886_v2  ;;  %v2499_v43 = vsel %vm483_vm5, %v2435_v7, %v6007_v36  ;;  %v2505_v11 = vld [vmem:[#allocation2 + $0xef] sm:$0x3]  ;;  %v2427_v33 = vld [vmem:[#allocation2 + $0x60] sm:$0x3]  ;;  %v6042_v25 = vunpack.i.l.bf16 %v7409_v5 }
 0x213   :  { %v7580_v59 = vpop.permute.xlu0 %6120  ;;  %v2227_v40 = vsel %vm1072_vm9, %v2225_v24, %v6117_v19  ;;  %v2221_v44 = vsel %vm1072_vm9, %v2219_v35, %v6118_v27  ;;  %2329 = vmatmul.mubr.f32.gmra.mrb[74].mxu1 %v2248_v54  ;;  %5614 = vmatprep.subr.bf16.mxu1 %v6814_v31  ;;  %v2788_v31 = vld [vmem:[#allocation3 + $0x6e] sm:$0xff]  ;;  %v6022_v27 = vunpack.i.l.bf16 %v7411_v17  ;;  %v2513_v19 = vld [vmem:[#allocation3 + $0xe4] sm:$0x3]  ;;  %v2571_v14 = vsel %vm483_vm5, %v2505_v11, %v6092_v15 }
 0x214   :  { %v6122_v38 = vunpack.i.l.bf16 %v7580_v59  ;;  %v2239_v63 = vrot.slane %v2227_v40, 6  ;;  %v2237_v58 = vrot.slane %v2221_v44, 6  ;;  %v6018_v54 = vunpack.i.h.bf16 %v7384_v48 }
 0x215   :  { %5590 = vmatpush3.bf16.msra.mxu0 %v6896_v9  ;;  %5616 = vmatpush3.bf16.msra.mxu1 %v6822_v34  ;;  %v6008_v34 = vunpack.i.h.bf16 %v7401_v56  ;;  %v6107_v56 = vunpack.i.l.bf16 %v7548_v1  ;;  %v2574_v17 = vsel %vm1072_vm9, %v2572_v60, %v6022_v27  ;;  %v6027_v40 = vunpack.i.l.bf16 %v7399_v18 }
 0x216   :  { %5592 = vmatprep.subr.bf16.mxu0 %v6912_v21  ;;  %v2240_v12 = vsel %vm1165_vm10, %v2235_v46, %v2239_v63  ;;  %5618 = vmatprep.subr.bf16.mxu1 %v6831_v37  ;;  %v2238_v39 = vsel %vm1165_vm10, %v2234_v13, %v2237_v58  ;;  %v2852_v53 = vsel %vm483_vm5, %v2788_v31, %v6122_v38  ;;  %v6037_v46 = vunpack.i.l.bf16 %v7432_v30 }
 0x217   :  { %v7599_v10 = vpop.permute.xlu0 %6130  ;;  %2333 = vmatprep.mubr.f32.mxu1 %v2240_v12  ;;  %v2578_v37 = vsel %vm1069_vm8, %v2576_v50, %v6002_v28  ;;  %v2854_v13 = vsel %vm1069_vm8, %v2852_v53, %v6127_v20  ;;  %v6017_v30 = vunpack.i.l.bf16 %v7384_v48  ;;  %v2493_v1 = vsel %vm483_vm5, %v2427_v33, %v6008_v34  ;;  %v2521_v20 = vld [vmem:[#allocation2 + $0x106] sm:$0x3]  ;;  %v2797_v34 = vld [vmem:[#allocation2 + $0x8d] sm:$0x3] }
 0x218   :  { %v6132_v26 = vunpack.i.l.bf16 %v7599_v10  ;;  %2334 = vmatmul.mubr.f32.gmra.mrb[76].mxu1 %v2238_v39  ;;  %v2580_v22 = vsel %vm1072_vm9, %v2578_v37, %v6102_v32  ;;  %v6052_v5 = vunpack.i.l.bf16 %v7446_v0  ;;  %v8757_v38 = vmov 0.0|0.0   ;;  %v2874_v39 = vld [vmem:[#allocation2 + $0x114] sm:$0xff]  ;;  %v2796_v53 = vld [vmem:[#allocation2 + $0x85] sm:$0xff] }
 0x219   :  { %5594 = vmatpush3.bf16.msra.mxu0 %v6922_v29  ;;  %5620 = vmatpush3.bf16.msra.mxu1 %v6849_v41  ;;  %v2577_v41 = vsel %vm483_vm5, %v2513_v19, %v6032_v42  ;;  %v2501_v24 = vsel %vm1069_vm8, %v2499_v43, %v6017_v30  ;;  %v2589_v23 = vrot.slane %v2580_v22, 6  ;;  %v2495_v48 = vsel %vm1069_vm8, %v2493_v1, %v6018_v54  ;;  %v7695_v22 = vld [vmem:[%s8744_s5] ss:$0 sm:$0xff] }
 0x21a   :  { %v2856_v16 = vsel %vm1072_vm9, %v2854_v13, %v6132_v26  ;;  %5596 = vmatprep.subr.bf16.mxu0 %v6943_v52  ;;  %5622 = vmatprep.subr.bf16.mxu1 %v6857_v45  ;;  %v2579_v35 = vsel %vm1069_vm8, %v2577_v41, %v6037_v46  ;;  %v2573_v45 = vsel %vm1069_vm8, %v2571_v14, %v6042_v25  ;;  %v2588_v51 = vrot.slane %v2574_v17, 6 }
 0x21b   :  { %3031 = vmatprep.mubr.f32.mxu1 %v2856_v16  ;;  %v2581_v44 = vsel %vm1072_vm9, %v2579_v35, %v6107_v56  ;;  %v2503_v28 = vsel %vm1072_vm9, %v2501_v24, %v6027_v40  ;;  %v6028_v36 = vunpack.i.h.bf16 %v7399_v18  ;;  %v2575_v0 = vsel %vm1072_vm9, %v2573_v45, %v6052_v5 }
 0x21c   :  { %v2603_v63 = vsel %vm1165_vm10, %v2503_v28, %v2589_v23  ;;  %v2593_v58 = vrot.slane %v2581_v44, 6  ;;  %v2591_v18 = vrot.slane %v2575_v0, 6  ;;  %v6133_v49 = vunpack.i.h.bf16 %v7599_v10  ;;  %v2870_v44 = vld [vmem:[#allocation2 + $0x113] sm:$0xff] }
 0x21d   :  { %5598 = vmatpush3.bf16.msra.mxu0 %v6950_v61  ;;  %5624 = vmatpush3.bf16.msra.mxu1 %v6872_v55  ;;  %v2497_v55 = vsel %vm1072_vm9, %v2495_v48, %v6028_v36  ;;  %v6128_v62 = vunpack.i.h.bf16 %v7585_v3  ;;  %v2443_v3 = vld [vmem:[#allocation2 + $0x77] sm:$0x3]  ;;  %v2944_v6 = vrot.slane %v2874_v39, 6 }
 0x21e   :  { %5599 = vmatprep.subr.bf16.mxu0 %v8757_v38  ;;  %5626 = vmatprep.subr.bf16.mxu1 %v6886_v2  ;;  %v2602_v2 = vsel %vm1165_vm10, %v2497_v55, %v2588_v51  ;;  %v2594_v50 = vsel %vm1165_vm10, %v2589_v23, %v2593_v58  ;;  %v2592_v15 = vsel %vm1165_vm10, %v2588_v51, %v2591_v18 }
 0x220   :  { %2678 = vmatmul.mubr.f32.vlgmr.msra.gmra.mrb[72].mxu0 %v7394_v47  ;;  %v6123_v47 = vunpack.i.h.bf16 %v7580_v59  ;;  %v7660_v59 = vld [vmem:[#allocation2 + $0xfe] sm:$0xff] }
 0x221   :  { %2682 = vmatprep.mubr.f32.mxu0 %v2603_v63  ;;  %5601 = vmatpush3.bf16.msra.mxu0 %v7167_v57  ;;  %v2590_v31 = vrot.slane %v7660_v59, 6 }
 0x222   :  { %5628 = vmatpush3.bf16.msra.mxu1 %v6896_v9  ;;  %5602 = vmatprep.subr.bf16.mxu0 %v8757_v38  ;;  %v2780_v9 = vld [vmem:[#allocation2 + $0x6e] sm:$0xff] }
 0x223   :  { %5630 = vmatprep.subr.bf16.mxu1 %v6912_v21  ;;  %v2846_v21 = vsel %vm483_vm5, %v2780_v9, %v6123_v47  ;;  %v2604_v10 = vsel %vm1165_vm10, %v2443_v3, %v2590_v31 }
 0x224   :  { %2683 = vmatmul.mubr.f32.gmra.mrb[74].mxu0 %v2602_v2  ;;  %v2848_v32 = vsel %vm1069_vm8, %v2846_v21, %v6128_v62 }
 0x225   :  { %2687 = vmatprep.mubr.f32.mxu0 %v2594_v50  ;;  %5604 = vmatpush3.bf16.msra.mxu0 %v7178_v4 }
 0x226   :  { %5632 = vmatpush3.bf16.msra.mxu1 %v6922_v29  ;;  %5637 = vmatprep.subr.bf16.mxu0 %v8757_v38  ;;  %v2442_v29 = vld [vmem:[#allocation2 + $0x6f] sm:$0xff] }
 0x227   :  { %5634 = vmatprep.subr.bf16.mxu1 %v6943_v52  ;;  %v2850_v52 = vsel %vm1072_vm9, %v2848_v32, %v6133_v49 }
 0x228   :  { %2688 = vmatmul.mubr.f32.gmra.mrb[76].mxu0 %v2592_v15 }
 0x229   :  { %5318 = vmatprep.mubr.msk.f32.mxu0 %vm6337_vm3, %v8754_v8 }
 0x22a   :  { %5636 = vmatpush3.bf16.msra.mxu1 %v6950_v61  ;;  %v2595_v61 = vrot.slane %v2521_v20, 6 }
 0x22c   :  { %5319 = vmatmul.mubr.msk.f32.vlgmr.msra.gmra.mrb[78].mxu0 %vm483_vm5, %v2442_v29  ;;  %v2596_v12 = vsel %vm1165_vm10, %v2590_v31, %v2595_v61 }
 0x22d   :  { %3032 = vmatmul.mubr.f32.vlgmr.msra.gmra.mrb[78].mxu1 %v2850_v52  ;;  %5321 = vmatprep.mubr.msk.f32.mxu0 %vm6337_vm3, %v8754_v8 }
 0x22e   :  { %5639 = vmatpush3.bf16.msra.mxu0 %v7167_v57  ;;  %v2875_v57 = vld [vmem:[#allocation2 + $0x11c] sm:$0x3] }
 0x22f   :  { %5640 = vmatprep.subr.bf16.mxu0 %v8757_v38  ;;  %v2949_v7 = vrot.slane %v2875_v57, 6 }
 0x230   :  { %5322 = vmatmul.mubr.msk.f32.gmra.mrb[80].mxu0 %vm483_vm5, %v2604_v10 }
 0x231   :  { %5324 = vmatprep.mubr.msk.f32.mxu0 %vm6337_vm3, %v8754_v8  ;;  %v2950_v42 = vsel %vm1165_vm10, %v2944_v6, %v2949_v7 }
 0x232   :  { %5642 = vmatpush3.bf16.msra.mxu0 %v7178_v4  ;;  %v2958_v4 = vsel %vm1165_vm10, %v2797_v34, %v2944_v6 }
 0x234   :  { %5325 = vmatmul.mubr.msk.f32.gmra.mrb[82].mxu0 %vm483_vm5, %v2596_v12 }
 0x235   :  { %5335 = vmatprep.mubr.msk.f32.mxu0 %vm6337_vm3, %v8754_v8 }
 0x238   :  { %5336 = vmatmul.mubr.msk.f32.vlgmr.msra.gmra.mrb[84].mxu0 %vm483_vm5, %v2796_v53 }
 0x239   :  { %5338 = vmatprep.mubr.msk.f32.mxu0 %vm6337_vm3, %v8754_v8 }
 0x23c   :  { %5339 = vmatmul.mubr.msk.f32.gmra.mrb[86].mxu0 %vm483_vm5, %v2958_v4 }
 0x23d   :  { %5341 = vmatprep.mubr.msk.f32.mxu0 %vm6337_vm3, %v8754_v8 }
 0x240   :  { %5342 = vmatmul.mubr.msk.f32.gmra.mrb[88].mxu0 %vm483_vm5, %v2950_v42 }
 0x245   :  { %v4644_v26 = vpop.f32.mrb[36].mxu0 }
 0x246   :  { %v4645_v43 = vpop.f32.mrb[37].mxu0 }
 0x247   :  { %v4646_v46 = vadd.f32 %v4645_v43, %v4644_v26 }
 0x249   :  { %v1264_v30 = vadd.f32 %v4646_v46, %v7695_v22 }
 0x286   :  { %v4647_v37 = vpop.f32.mrb[38].mxu0 }
 0x287   :  { %v4648_v13 = vpop.f32.mrb[39].mxu0 }
 0x288   :  { %v4649_v11 = vadd.f32 %v4648_v13, %v4647_v37 }
 0x28a   :  { %v1269_v1 = vadd.f32 %v4649_v11, %v7695_v22 }
 0x28b   :  { %v4650_v60 = vpop.f32.mrb[40].mxu0 }
 0x28c   :  { %v4651_v56 = vpop.f32.mrb[41].mxu0 }
 0x28d   :  { %v4652_v16 = vadd.f32 %v4651_v56, %v4650_v60 }
 0x28f   :  { %v1343_v33 = vpop.f32.mrb[42].mxu0  ;;  %v1274_v23 = vadd.f32 %v4652_v16, %v7695_v22 }
 0x290   :  { %v1344_v27 = vadd.f32 %v1343_v33, %v1264_v30  ;;  %v5252_v19 = vpop.f32.mrb[43].mxu0 }
 0x292   :  { %v1357_v14 = vmax.f32 %v1344_v27, 0.0 }
 0x293   :  { %v1348_v25 = vpop.f32.mrb[44].mxu0 }
 0x294   :  { %1360 = vst.msk [vmem:[#allocation4] sm:$0xff] %vm1069_vm8, %v1357_v14  ;;  %v1349_v41 = vadd.f32 %v1348_v25, %v1269_v1  ;;  %v5255_v35 = vpop.f32.mrb[45].mxu0 }
 0x296   :  { %v1358_v24 = vmax.f32 %v1349_v41, 0.0 }
 0x297   :  { %v1353_v17 = vpop.f32.mrb[46].mxu0 }
 0x298   :  { %1361 = vst.msk [vmem:[#allocation4 + $0x8] sm:$0xff] %vm1069_vm8, %v1358_v24  ;;  %v1354_v54 = vadd.f32 %v1353_v17, %v1274_v23  ;;  %v5258_v40 = vpop.f32.mrb[47].mxu0  ;;  %v3751_v17 = vld [vmem:[%s8745_s6 + $0x80] sm:$0xff] }
 0x299   :  { %v3752_v40 = vld [vmem:[%s8745_s6 + $0x88] sm:$0xff] }
 0x29a   :  { %v1359_v45 = vmax.f32 %v1354_v54, 0.0 }
 0x29b   :  { %v3135_v5 = vld [vmem:[#allocation4 + $0x1] sm:$0x1]  ;;  %v3163_v46 = vld [vmem:[#allocation4 + $0x3] sm:$0x1]  ;;  %v3185_v56 = vld [vmem:[#allocation4 + $0x5] sm:$0x1] }
 0x29c   :  { %1363 = vst.msk [vmem:[#allocation4 + $0x10] sm:$0xf] %vm1362_vm11, %v1359_v45  ;;  %v6164_v28 = vpack.i.bf16 %v3135_v5, %v2870_v44  ;;  %v5643_v44 = vpack.c.bf16 %v3752_v40, %v3751_v17 }
 0x29e   :  { %6165 = vrot.lane.b32.xlu1 %v6164_v28, %s6339_s16  ;;  %5644 = vmatprep.subr.bf16.mxu0 %v5643_v44 }
 0x29f   :  { %v3346_v35 = vld [vmem:[#allocation4 + $0xf] sm:$0x1] }
 0x2a7   :  { %v4740_v48 = vpop.f32.mrb[66].mxu1 }
 0x2a8   :  { %v4741_v51 = vpop.f32.mrb[67].mxu1 }
 0x2a9   :  { %v4742_v36 = vadd.f32 %v4741_v51, %v4740_v48 }
 0x2ab   :  { %v1972_v53 = vadd.f32 %v4742_v36, %v7695_v22 }
 0x2af   :  { %v4692_v63 = vpop.f32.mrb[48].mxu0 }
 0x2b0   :  { %v4693_v58 = vpop.f32.mrb[49].mxu0 }
 0x2b1   :  { %v4694_v0 = vadd.f32 %v4693_v58, %v4692_v63  ;;  %v3735_v58 = vld [vmem:[%s8745_s6] sm:$0xff] }
 0x2b3   :  { %v4695_v55 = vpop.f32.mrb[50].mxu0  ;;  %v1618_v15 = vadd.f32 %v4694_v0, %v7695_v22  ;;  %v3736_v0 = vld [vmem:[%s8745_s6 + $0x8] sm:$0xff] }
 0x2b4   :  { %v4696_v2 = vpop.f32.mrb[51].mxu0 }
 0x2b5   :  { %v4697_v18 = vadd.f32 %v4696_v2, %v4695_v55  ;;  %v3753_v55 = vld [vmem:[%s8745_s6 + $0x90] sm:$0xff]  ;;  %v5645_v2 = vpack.c.bf16 %v3736_v0, %v3735_v58 }
 0x2b7   :  { %v4698_v47 = vpop.f32.mrb[52].mxu0  ;;  %v1623_v32 = vadd.f32 %v4697_v18, %v7695_v22  ;;  %v3754_v18 = vld [vmem:[%s8745_s6 + $0x98] sm:$0xff]  ;;  %5646 = vmatpush3.bf16.msra.mxu0 %v5645_v2 }
 0x2b8   :  { %v4699_v50 = vpop.f32.mrb[53].mxu0 }
 0x2b9   :  { %v4700_v9 = vadd.f32 %v4699_v50, %v4698_v47  ;;  %v3738_v47 = vld [vmem:[%s8745_s6 + $0x18] sm:$0xff] }
 0x2bb   :  { %v1697_v21 = vpop.f32.mrb[54].mxu0  ;;  %v1628_v10 = vadd.f32 %v4700_v9, %v7695_v22 }
 0x2bc   :  { %v1698_v49 = vadd.f32 %v1697_v21, %v1618_v15  ;;  %v5269_v62 = vpop.f32.mrb[55].mxu0  ;;  %v5647_v15 = vpack.c.bf16 %v3754_v18, %v3753_v55  ;;  %v3755_v21 = vld [vmem:[%s8745_s6 + $0xa0] sm:$0xff] }
 0x2be   :  { %v1711_v29 = vmax.f32 %v1698_v49, 0.0  ;;  %v3756_v49 = vld [vmem:[%s8745_s6 + $0xa8] sm:$0xff]  ;;  %5648 = vmatprep.subr.bf16.mxu0 %v5647_v15 }
 0x2bf   :  { %v1702_v31 = vpop.f32.mrb[56].mxu0 }
 0x2c0   :  { %1715 = vst.msk [vmem:[#allocation4 + $0x18] sm:$0xff] %vm1069_vm8, %v1711_v29  ;;  %v1703_v52 = vadd.f32 %v1702_v31, %v1623_v32  ;;  %v5272_v20 = vpop.f32.mrb[57].mxu0  ;;  %v2785_v32 = vld [vmem:[#allocation2 + $0x77] sm:$0x3] }
 0x2c2   :  { %v1712_v3 = vmax.f32 %v1703_v52, 0.0 }
 0x2c3   :  { %v1707_v61 = vpop.f32.mrb[58].mxu0 }
 0x2c4   :  { %1716 = vst.msk [vmem:[#allocation4 + $0x20] sm:$0xff] %vm1069_vm8, %v1712_v3  ;;  %v1708_v12 = vadd.f32 %v1707_v61, %v1628_v10  ;;  %v5275_v39 = vpop.f32.mrb[59].mxu0  ;;  %v5651_v61 = vpack.c.bf16 %v3756_v49, %v3755_v21  ;;  %v3207_v21 = vld [vmem:[#allocation4 + $0x7] sm:$0x1]  ;;  %v3746_v49 = vld [vmem:[%s8745_s6 + $0x58] sm:$0xff] }
 0x2c5   :  { %v3740_v39 = vld [vmem:[%s8745_s6 + $0x28] sm:$0xff] }
 0x2c6   :  { %v1713_v57 = vmax.f32 %v1708_v12, 0.0  ;;  %v3739_v12 = vld [vmem:[%s8745_s6 + $0x20] sm:$0xff] }
 0x2c7   :  { %v2051_v6 = vpop.f32.mrb[60].mxu0  ;;  %v3137_v7 = vld [vmem:[#allocation4 + $0x18] sm:$0x1]  ;;  %v3166_v34 = vld [vmem:[#allocation4 + $0x1c] sm:$0x1] }
 0x2c8   :  { %1717 = vst.msk [vmem:[#allocation4 + $0x28] sm:$0xf] %vm1362_vm11, %v1713_v57  ;;  %v2052_v4 = vadd.f32 %v2051_v6, %v1972_v53  ;;  %v5286_v42 = vpop.f32.mrb[61].mxu0  ;;  %v6174_v26 = vpack.i.bf16 %v3137_v7, %v3166_v34  ;;  %v3139_v43 = vld [vmem:[#allocation4 + $0x1a] sm:$0x1] }
 0x2c9   :  { %v6169_v37 = vpack.i.bf16 %v3163_v46, %v3139_v43  ;;  %v3188_v13 = vld [vmem:[#allocation4 + $0x1e] sm:$0x1]  ;;  %v3187_v8 = vld [vmem:[#allocation4 + $0x1d] sm:$0x1] }
 0x2ca   :  { %v2065_v11 = vmax.f32 %v2052_v4, 0.0  ;;  %6175 = vrot.lane.b32.xlu0 %v6174_v26, %s6339_s16  ;;  %v6179_v30 = vpack.i.bf16 %v3188_v13, %v3185_v56  ;;  %v2863_v34 = vld [vmem:[#allocation2 + $0x106] sm:$0x3]  ;;  %v5653_v4 = vpack.c.bf16 %v3740_v39, %v3739_v12  ;;  %v3758_v13 = vld [vmem:[%s8745_s6 + $0xb8] sm:$0xff] }
 0x2cb   :  { %6170 = vrot.lane.b32.xlu1 %v6169_v37, %s6339_s16  ;;  %v2056_v60 = vpop.f32.mrb[62].mxu0  ;;  %v3210_v33 = vld [vmem:[#allocation4 + $0x20] sm:$0x1]  ;;  %v3300_v27 = vld [vmem:[#allocation4 + $0x24] sm:$0x1]  ;;  %v3757_v37 = vld [vmem:[%s8745_s6 + $0xb0] sm:$0xff] }
 0x2cc   :  { %2069 = vst.msk [vmem:[#allocation4 + $0x30] sm:$0xff] %vm1069_vm8, %v2065_v11  ;;  %v5289_v16 = vpop.f32.mrb[63].mxu0  ;;  %v6184_v1 = vpack.i.bf16 %v3210_v33, %v3300_v27  ;;  %v3741_v11 = vld [vmem:[%s8745_s6 + $0x30] sm:$0xff]  ;;  %v5655_v56 = vpack.c.bf16 %v3758_v13, %v3757_v37  ;;  %v3747_v12 = vld [vmem:[%s8745_s6 + $0x60] sm:$0xff]  ;;  %v3784_v37 = vld [vmem:[%s8745_s6 + $0x188] sm:$0xff] }
 0x2cd   :  { %v3742_v16 = vld [vmem:[%s8745_s6 + $0x38] sm:$0xff] }
 0x2ce   :  { %6180 = vrot.lane.b32.xlu0 %v6179_v30, %s6339_s16  ;;  %v5657_v33 = vpack.c.bf16 %v3742_v16, %v3741_v11  ;;  %v3767_v16 = vld [vmem:[%s8745_s6 + $0x100] sm:$0xff] }
 0x2cf   :  { %v2061_v19 = vpop.f32.mrb[64].mxu0  ;;  %v3349_v25 = vld [vmem:[#allocation4 + $0x28] sm:$0x1] }
 0x2d0   :  { %v5292_v14 = vpop.f32.mrb[65].mxu0  ;;  %v6189_v23 = vpack.i.bf16 %v3349_v25, %v3346_v35  ;;  %v3368_v35 = vld [vmem:[#allocation4 + $0x11] sm:$0x1] }
 0x2d1   :  { %v3760_v14 = vld [vmem:[%s8745_s6 + $0xc8] sm:$0xff] }
 0x2d2   :  { %6185 = vrot.lane.b32.xlu0 %v6184_v1, %s6339_s16  ;;  %v3743_v1 = vld [vmem:[%s8745_s6 + $0x40] sm:$0xff] }
 0x2d3   :  { %v7716_v41 = vpop.f32.mrb[66].mxu0  ;;  %v3141_v54 = vld [vmem:[#allocation4 + $0x31] sm:$0x1]  ;;  %v3189_v48 = vld [vmem:[#allocation4 + $0x35] sm:$0x1] }
 0x2d4   :  { %v5303_v24 = vpop.f32.mrb[67].mxu0  ;;  %v6194_v63 = vpack.i.bf16 %v3141_v54, %v7660_v59  ;;  %v3737_v59 = vld [vmem:[%s8745_s6 + $0x10] sm:$0xff]  ;;  %v6199_v10 = vpack.i.bf16 %v3189_v48, %v2785_v32  ;;  %v3211_v57 = vld [vmem:[#allocation4 + $0x37] sm:$0x1]  ;;  %v3167_v32 = vld [vmem:[#allocation4 + $0x33] sm:$0x1] }
 0x2d5   :  { %v5649_v31 = vpack.c.bf16 %v3738_v47, %v3737_v59  ;;  %v6204_v43 = vpack.i.bf16 %v2863_v34, %v3211_v57  ;;  %v3298_v24 = vld [vmem:[#allocation4 + $0x22] sm:$0x1]  ;;  %v3761_v47 = vld [vmem:[%s8745_s6 + $0xd0] sm:$0xff] }
 0x2d6   :  { %6190 = vrot.lane.b32.xlu0 %v6189_v23, %s6339_s16  ;;  %v4743_v45 = vpop.f32.mrb[68].mxu1 }
 0x2d7   :  { %v7725_v5 = vpop.f32.mrb[68].mxu0  ;;  %v4744_v28 = vpop.f32.mrb[69].mxu1  ;;  %5650 = vmatpush3.bf16.msra.mxu0 %v5649_v31 }
 0x2d8   :  { %v4745_v51 = vadd.f32 %v4744_v28, %v4743_v45  ;;  %v5306_v36 = vpop.f32.mrb[69].mxu0  ;;  %5652 = vmatprep.subr.bf16.mxu0 %v5651_v61 }
 0x2da   :  { %v1977_v50 = vadd.f32 %v4745_v51, %v7695_v22  ;;  %6195 = vrot.lane.b32.xlu0 %v6194_v63, %s6339_s16  ;;  %v4746_v9 = vpop.f32.mrb[70].mxu1 }
 0x2db   :  { %v7754_v62 = vpop.f32.mrb[70].mxu0  ;;  %v4747_v29 = vpop.f32.mrb[71].mxu1  ;;  %5654 = vmatpush3.bf16.msra.mxu0 %v5653_v4  ;;  %v3748_v4 = vld [vmem:[%s8745_s6 + $0x68] sm:$0xff] }
 0x2dc   :  { %v2057_v52 = vadd.f32 %v2056_v60, %v1977_v50  ;;  %v4748_v20 = vadd.f32 %v4747_v29, %v4746_v9  ;;  %v5309_v3 = vpop.f32.mrb[71].mxu0  ;;  %5656 = vmatprep.subr.bf16.mxu0 %v5655_v56  ;;  %v3762_v50 = vld [vmem:[%s8745_s6 + $0xd8] sm:$0xff]  ;;  %v3745_v9 = vld [vmem:[%s8745_s6 + $0x50] sm:$0xff] }
 0x2dd   :  { %v5665_v31 = vpack.c.bf16 %v3746_v49, %v3745_v9  ;;  %v3766_v56 = vld [vmem:[%s8745_s6 + $0xf8] sm:$0xff]  ;;  %v3773_v49 = vld [vmem:[%s8745_s6 + $0x130] sm:$0xff] }
 0x2de   :  { %v2066_v53 = vmax.f32 %v2057_v52, 0.0  ;;  %v1982_v6 = vadd.f32 %v4748_v20, %v7695_v22  ;;  %6200 = vrot.lane.b32.xlu0 %v6199_v10, %s6339_s16  ;;  %v3763_v52 = vld [vmem:[%s8745_s6 + $0xe0] sm:$0xff]  ;;  %v3764_v20 = vld [vmem:[%s8745_s6 + $0xe8] sm:$0xff] }
 0x2df   :  { %v4788_v7 = vpop.f32.mrb[72].mxu1  ;;  %5658 = vmatpush3.bf16.msra.mxu0 %v5657_v33  ;;  %v5667_v61 = vpack.c.bf16 %v3764_v20, %v3763_v52  ;;  %v3792_v52 = vld [vmem:[%s8745_s6 + $0x1c8] sm:$0xff] }
 0x2e0   :  { %2070 = vst.msk [vmem:[#allocation4 + $0x38] sm:$0xff] %vm1069_vm8, %v2066_v53  ;;  %v2062_v42 = vadd.f32 %v2061_v19, %v1982_v6  ;;  %v4789_v26 = vpop.f32.mrb[73].mxu1  ;;  %v3759_v19 = vld [vmem:[%s8745_s6 + $0xc0] sm:$0xff]  ;;  %v2793_v6 = vld [vmem:[#allocation2 + $0x8c] sm:$0x3] }
 0x2e1   :  { %v4790_v46 = vadd.f32 %v4789_v26, %v4788_v7  ;;  %v5659_v23 = vpack.c.bf16 %v3760_v14, %v3759_v19  ;;  %v3768_v14 = vld [vmem:[%s8745_s6 + $0x108] sm:$0xff] }
 0x2e2   :  { %v2067_v60 = vmax.f32 %v2062_v42, 0.0  ;;  %6205 = vrot.lane.b32.xlu0 %v6204_v43, %s6339_s16  ;;  %v2871_v43 = vld [vmem:[#allocation2 + $0x11b] sm:$0x3] }
 0x2e3   :  { %v2326_v30 = vadd.f32 %v4790_v46, %v7695_v22  ;;  %5660 = vmatprep.subr.bf16.mxu0 %v5659_v23  ;;  %v5669_v46 = vpack.c.bf16 %v3748_v4, %v3747_v12  ;;  %v3785_v23 = vld [vmem:[%s8745_s6 + $0x190] sm:$0xff] }
 0x2e4   :  { %2071 = vst.msk [vmem:[#allocation4 + $0x40] sm:$0xf] %vm1362_vm11, %v2067_v60  ;;  %v3765_v60 = vld [vmem:[%s8745_s6 + $0xf0] sm:$0xff] }
 0x2e5   :  { %v2406_v27 = vadd.f32 %v7716_v41, %v2326_v30  ;;  %v3744_v41 = vld [vmem:[%s8745_s6 + $0x48] sm:$0xff]  ;;  %v5671_v19 = vpack.c.bf16 %v3766_v56, %v3765_v60 }
 0x2e6   :  { %v4791_v25 = vpop.f32.mrb[74].mxu1  ;;  %v5661_v44 = vpack.c.bf16 %v3744_v41, %v3743_v1  ;;  %v3749_v1 = vld [vmem:[%s8745_s6 + $0x70] sm:$0xff]  ;;  %v3786_v41 = vld [vmem:[%s8745_s6 + $0x198] sm:$0xff] }
 0x2e7   :  { %v2419_v17 = vmax.f32 %v2406_v27, 0.0  ;;  %v4792_v54 = vpop.f32.mrb[75].mxu1  ;;  %v3350_v40 = vld [vmem:[#allocation4 + $0x3f] sm:$0x1]  ;;  %v3328_v45 = vld [vmem:[#allocation4 + $0x3d] sm:$0x1] }
 0x2e8   :  { %v4793_v28 = vadd.f32 %v4792_v54, %v4791_v25  ;;  %v6214_v48 = vpack.i.bf16 %v3368_v35, %v3350_v40  ;;  %v6209_v51 = vpack.i.bf16 %v3328_v45, %v3298_v24  ;;  %v3302_v58 = vld [vmem:[#allocation4 + $0x3b] sm:$0x1]  ;;  %5662 = vmatpush3.bf16.msra.mxu0 %v5661_v44  ;;  %v3750_v25 = vld [vmem:[%s8745_s6 + $0x78] sm:$0xff]  ;;  %v5677_v35 = vpack.c.bf16 %v3768_v14, %v3767_v16  ;;  %v3769_v44 = vld [vmem:[%s8745_s6 + $0x110] sm:$0xff] }
 0x2e9   :  { %2423 = vst.msk [vmem:[#allocation4 + $0x48] sm:$0xff] %vm1069_vm8, %v2419_v17  ;;  %v5673_v24 = vpack.c.bf16 %v3750_v25, %v3749_v1  ;;  %v5679_v45 = vpack.c.bf16 %v3786_v41, %v3785_v23  ;;  %v3777_v16 = vld [vmem:[%s8745_s6 + $0x150] sm:$0xff]  ;;  %v3796_v25 = vld [vmem:[%s8745_s6 + $0x1e8] sm:$0xff] }
 0x2ea   :  { %v2331_v36 = vadd.f32 %v4793_v28, %v7695_v22  ;;  %6215 = vrot.lane.b32.xlu0 %v6214_v48, %s6339_s16  ;;  %6210 = vrot.lane.b32.xlu1 %v6209_v51, %s6339_s16  ;;  %v3770_v51 = vld [vmem:[%s8745_s6 + $0x118] sm:$0xff]  ;;  %v3324_v14 = vld [vmem:[#allocation4 + $0xd] sm:$0x1] }
 0x2eb   :  { %v4794_v63 = vpop.f32.mrb[76].mxu1  ;;  %v3372_v0 = vld [vmem:[#allocation4 + $0x41] sm:$0x1] }
 0x2ec   :  { %v2411_v55 = vadd.f32 %v7725_v5, %v2331_v36  ;;  %v4795_v2 = vpop.f32.mrb[77].mxu1  ;;  %v6219_v18 = vpack.i.bf16 %v3372_v0, %v3302_v58  ;;  %v5663_v5 = vpack.c.bf16 %v3762_v50, %v3761_v47  ;;  %v3787_v58 = vld [vmem:[%s8745_s6 + $0x1a0] sm:$0xff]  ;;  %v3788_v0 = vld [vmem:[%s8745_s6 + $0x1a8] sm:$0xff]  ;;  %v3790_v50 = vld [vmem:[%s8745_s6 + $0x1b8] sm:$0xff] }
 0x2ed   :  { %v4796_v59 = vadd.f32 %v4795_v2, %v4794_v63  ;;  %v5681_v63 = vpack.c.bf16 %v3770_v51, %v3769_v44  ;;  %v3771_v2 = vld [vmem:[%s8745_s6 + $0x120] sm:$0xff]  ;;  %v3296_v44 = vld [vmem:[#allocation4 + $0xb] sm:$0x1]  ;;  %v3371_v51 = vld [vmem:[#allocation4 + $0x2a] sm:$0x1] }
 0x2ee   :  { %v2420_v15 = vmax.f32 %v2411_v55, 0.0  ;;  %6220 = vrot.lane.b32.xlu0 %v6219_v18, %s6339_s16  ;;  %5664 = vmatprep.subr.bf16.mxu0 %v5663_v5  ;;  %v5683_v55 = vpack.c.bf16 %v3788_v0, %v3787_v58  ;;  %v3772_v18 = vld [vmem:[%s8745_s6 + $0x128] sm:$0xff] }
 0x2ef   :  { %v2336_v29 = vadd.f32 %v4796_v59, %v7695_v22  ;;  %5666 = vmatpush3.bf16.msra.mxu0 %v5665_v31  ;;  %v3789_v59 = vld [vmem:[%s8745_s6 + $0x1b0] sm:$0xff]  ;;  %v3791_v31 = vld [vmem:[%s8745_s6 + $0x1c0] sm:$0xff] }
 0x2f0   :  { %2424 = vst.msk [vmem:[#allocation4 + $0x50] sm:$0xff] %vm1069_vm8, %v2420_v15  ;;  %v3229_v3 = vld [vmem:[#allocation4 + $0x48] sm:$0x1]  ;;  %v3251_v10 = vld [vmem:[#allocation4 + $0x4c] sm:$0x1]  ;;  %5668 = vmatprep.subr.bf16.mxu0 %v5667_v61  ;;  %v5685_v15 = vpack.c.bf16 %v3772_v18, %v3771_v2  ;;  %v5687_v5 = vpack.c.bf16 %v3790_v50, %v3789_v59  ;;  %v3780_v2 = vld [vmem:[%s8745_s6 + $0x168] sm:$0xff] }
 0x2f1   :  { %v2416_v39 = vadd.f32 %v7754_v62, %v2336_v29  ;;  %v6224_v57 = vpack.i.bf16 %v3229_v3, %v3207_v21  ;;  %v6234_v53 = vpack.i.bf16 %v3251_v10, %v3167_v32  ;;  %v3231_v7 = vld [vmem:[#allocation4 + $0x4a] sm:$0x1]  ;;  %v3266_v34 = vld [vmem:[#allocation4 + $0x4e] sm:$0x1]  ;;  %v3783_v62 = vld [vmem:[%s8745_s6 + $0x180] sm:$0xff] }
 0x2f2   :  { %v5675_v11 = vpack.c.bf16 %v3784_v37, %v3783_v62  ;;  %v6229_v33 = vpack.i.bf16 %v2793_v6, %v3231_v7  ;;  %v6239_v27 = vpack.i.bf16 %v2871_v43, %v3266_v34  ;;  %v3774_v29 = vld [vmem:[%s8745_s6 + $0x138] sm:$0xff]  ;;  %v3775_v43 = vld [vmem:[%s8745_s6 + $0x140] sm:$0xff]  ;;  %v3793_v62 = vld [vmem:[%s8745_s6 + $0x1d0] sm:$0xff] }
 0x2f3   :  { %v2421_v42 = vmax.f32 %v2416_v39, 0.0  ;;  %v4836_v26 = vpop.f32.mrb[72].mxu0  ;;  %6225 = vrot.lane.b32.xlu0 %v6224_v57, %s6339_s16  ;;  %6235 = vrot.lane.b32.xlu1 %v6234_v53, %s6339_s16  ;;  %v5689_v12 = vpack.c.bf16 %v3774_v29, %v3773_v49  ;;  %v5691_v57 = vpack.c.bf16 %v3792_v52, %v3791_v31  ;;  %v3800_v50 = vld [vmem:[%s8745_s6 + $0x208] sm:$0xff]  ;;  %v3781_v31 = vld [vmem:[%s8745_s6 + $0x170] sm:$0xff] }
 0x2f4   :  { %v4837_v13 = vpop.f32.mrb[73].mxu0  ;;  %5670 = vmatpush3.bf16.msra.mxu0 %v5669_v46  ;;  %5676 = vmatprep.subr.bf16.mxu1 %v5675_v11  ;;  %v3776_v46 = vld [vmem:[%s8745_s6 + $0x148] sm:$0xff]  ;;  %v3794_v11 = vld [vmem:[%s8745_s6 + $0x1d8] sm:$0xff] }
 0x2f5   :  { %2425 = vst.msk [vmem:[#allocation4 + $0x58] sm:$0xf] %vm1362_vm11, %v2421_v42  ;;  %v4838_v30 = vadd.f32 %v4837_v13, %v4836_v26  ;;  %5672 = vmatprep.subr.bf16.mxu0 %v5671_v19  ;;  %5678 = vmatpush3.bf16.msra.mxu1 %v5677_v35  ;;  %v5693_v13 = vpack.c.bf16 %v3776_v46, %v3775_v43  ;;  %v3327_v19 = vld [vmem:[#allocation4 + $0x26] sm:$0x1]  ;;  %v3782_v52 = vld [vmem:[%s8745_s6 + $0x178] sm:$0xff] }
 0x2f6   :  { %5680 = vmatprep.subr.bf16.mxu1 %v5679_v45  ;;  %v5695_v56 = vpack.c.bf16 %v3794_v11, %v3793_v62  ;;  %v7975_v11 = vld [vmem:[#allocation4 + $0x34] sm:$0x1] }
 0x2f7   :  { %v4839_v17 = vpop.f32.mrb[74].mxu0  ;;  %6230 = vrot.lane.b32.xlu0 %v6229_v33, %s6339_s16  ;;  %6240 = vrot.lane.b32.xlu1 %v6239_v27, %s6339_s16  ;;  %v3281_v54 = vld [vmem:[#allocation4 + $0x50] sm:$0x1]  ;;  %v3392_v40 = vld [vmem:[#allocation4 + $0x54] sm:$0x1]  ;;  %v2680_v32 = vadd.f32 %v4838_v30, %v7695_v22  ;;  %v3795_v33 = vld [vmem:[%s8745_s6 + $0x1e0] sm:$0xff] }
 0x2f8   :  { %v4840_v28 = vpop.f32.mrb[75].mxu0  ;;  %v6244_v48 = vpack.i.bf16 %v3281_v54, %v3392_v40  ;;  %5674 = vmatpush3.bf16.msra.mxu0 %v5673_v24  ;;  %v3778_v30 = vld [vmem:[%s8745_s6 + $0x158] sm:$0xff]  ;;  %v5699_v41 = vpack.c.bf16 %v3796_v25, %v3795_v33 }
 0x2f9   :  { %v4841_v36 = vadd.f32 %v4840_v28, %v4839_v17  ;;  %5682 = vmatpush3.bf16.msra.mxu1 %v5681_v63  ;;  %v5697_v1 = vpack.c.bf16 %v3778_v30, %v3777_v16  ;;  %v3779_v28 = vld [vmem:[%s8745_s6 + $0x160] sm:$0xff]  ;;  %v3465_v16 = vrot.slane %v7975_v11, 7  ;;  %v7982_v30 = vld [vmem:[#allocation4 + $0x36] sm:$0x1] }
 0x2fa   :  { %5684 = vmatprep.subr.bf16.mxu1 %v5683_v55  ;;  %v5701_v59 = vpack.c.bf16 %v3780_v2, %v3779_v28  ;;  %v2858_v2 = vld [vmem:[#allocation2 + $0xfd] sm:$0xff] }
 0x2fb   :  { %v4842_v47 = vpop.f32.mrb[76].mxu0  ;;  %6245 = vrot.lane.b32.xlu1 %v6244_v48, %s6339_s16  ;;  %v2685_v6 = vadd.f32 %v4841_v36, %v7695_v22 }
 0x2fc   :  { %v4843_v9 = vpop.f32.mrb[77].mxu0  ;;  %v3427_v49 = vld [vmem:[#allocation4 + $0x58] sm:$0x1] }
 0x2fd   :  { %v4844_v21 = vadd.f32 %v4843_v9, %v4842_v47  ;;  %5686 = vmatpush3.bf16.msra.mxu1 %v5685_v15  ;;  %v3799_v47 = vld [vmem:[%s8745_s6 + $0x200] sm:$0xff]  ;;  %v3390_v9 = vld [vmem:[#allocation4 + $0x52] sm:$0x1] }
 0x2fe   :  { %5688 = vmatprep.subr.bf16.mxu1 %v5687_v5  ;;  %v7944_v15 = vpack.c.bf16 %v3800_v50, %v3799_v47  ;;  %v3798_v5 = vld [vmem:[%s8745_s6 + $0x1f8] sm:$0xff] }
 0x2ff   :  { %v2759_v20 = vpop.f32.mrb[78].mxu0  ;;  %v2690_v26 = vadd.f32 %v4844_v21, %v7695_v22  ;;  %v3797_v21 = vld [vmem:[%s8745_s6 + $0x1f0] sm:$0xff] }
 0x300   :  { %v2760_v3 = vadd.f32 %v2759_v20, %v2680_v32  ;;  %v5320_v10 = vpop.f32.mrb[79].mxu0  ;;  %v4884_v61 = vpop.f32.mrb[78].mxu1  ;;  %v5703_v32 = vpack.c.bf16 %v3798_v5, %v3797_v21  ;;  %5708 = vmatprep.subr.bf16.mxu0 %v7944_v15  ;;  %v2859_v21 = vld [vmem:[#allocation2 + $0x105] sm:$0x3] }
 0x301   :  { %v4885_v39 = vpop.f32.mrb[79].mxu1  ;;  %5690 = vmatpush3.bf16.msra.mxu1 %v5689_v12  ;;  %v5705_v61 = vpack.c.bf16 %v3782_v52, %v3781_v31 }
 0x302   :  { %v2773_v53 = vmax.f32 %v2760_v3, 0.0  ;;  %5692 = vmatprep.subr.bf16.mxu1 %v5691_v57  ;;  %v3412_v39 = vld [vmem:[#allocation4 + $0x56] sm:$0x1] }
 0x303   :  { %v2764_v7 = vpop.f32.mrb[80].mxu0 }
 0x304   :  { %2777 = vst.msk [vmem:[#allocation4 + $0x60] sm:$0xff] %vm1069_vm8, %v2773_v53  ;;  %v2765_v34 = vadd.f32 %v2764_v7, %v2685_v6  ;;  %v5323_v4 = vpop.f32.mrb[81].mxu0  ;;  %v3442_v6 = vld [vmem:[#allocation4 + $0x5a] sm:$0x1] }
 0x305   :  { %5694 = vmatpush3.bf16.msra.mxu1 %v5693_v13  ;;  %v6151_v4 = vpop.permute.xlu0 %6150 }
 0x306   :  { %v2774_v42 = vmax.f32 %v2765_v34, 0.0  ;;  %5696 = vmatprep.subr.bf16.mxu1 %v5695_v56  ;;  %v6136_v34 = vpop.permute.xlu1 %6135 }
 0x307   :  { %v2769_v37 = vpop.f32.mrb[82].mxu0  ;;  %v6137_v33 = vunpack.i.l.bf16 %v6136_v34 }
 0x308   :  { %2778 = vst.msk [vmem:[#allocation4 + $0x68] sm:$0xff] %vm1069_vm8, %v2774_v42  ;;  %v2770_v22 = vadd.f32 %v2769_v37, %v2690_v26  ;;  %v5326_v60 = vpop.f32.mrb[83].mxu0 }
 0x309   :  { %5698 = vmatpush3.bf16.msra.mxu1 %v5697_v1  ;;  %v6138_v60 = vunpack.i.h.bf16 %v6136_v34 }
 0x30a   :  { %v2775_v27 = vmax.f32 %v2770_v22, 0.0  ;;  %5700 = vmatprep.subr.bf16.mxu1 %v5699_v41  ;;  %v7963_v42 = vpop.permute.xlu1 %6140  ;;  %v7996_v41 = vld [vmem:[#allocation4 + $0x32] sm:$0x1] }
 0x30b   :  { %v3113_v35 = vpop.f32.mrb[84].mxu0  ;;  %v3252_v24 = vld [vmem:[#allocation4 + $0x63] sm:$0x1]  ;;  %v3233_v23 = vld [vmem:[#allocation4 + $0x61] sm:$0x1] }
 0x30c   :  { %2779 = vst.msk [vmem:[#allocation4 + $0x70] sm:$0xf] %vm1362_vm11, %v2775_v27  ;;  %v5337_v17 = vpop.f32.mrb[85].mxu0  ;;  %v6254_v54 = vpack.i.bf16 %v3252_v24, %v3327_v19  ;;  %v6249_v40 = vpack.i.bf16 %v3324_v14, %v3233_v23  ;;  %v3267_v45 = vld [vmem:[#allocation4 + $0x65] sm:$0x1]  ;;  %v3480_v24 = vrot.slane %v7982_v30, 6 }
 0x30d   :  { %v6259_v0 = vpack.i.bf16 %v3296_v44, %v3267_v45  ;;  %v3282_v55 = vld [vmem:[#allocation4 + $0x67] sm:$0x1]  ;;  %5702 = vmatpush3.bf16.msra.mxu1 %v5701_v59  ;;  %v7984_v27 = vld [vmem:[#allocation4 + $0x38] sm:$0x1]  ;;  %v2781_v19 = vld [vmem:[#allocation2 + $0x76] sm:$0x3]  ;;  %v3664_v44 = vsel %vm198_vm0, %v7996_v41, %v3465_v16 }
 0x30e   :  { %6255 = vrot.lane.b32.xlu0 %v6254_v54, %s6339_s16  ;;  %6250 = vrot.lane.b32.xlu1 %v6249_v40, %s6339_s16  ;;  %v6264_v3 = vpack.i.bf16 %v3282_v55, %v3390_v9  ;;  %v6146_v43 = vpop.permute.xlu1 %6145  ;;  %v7988_v1 = vld [vmem:[#allocation4 + $0x62] sm:$0x1]  ;;  %v7991_v25 = vsel %vm483_vm5, %v2781_v19, %v6138_v60  ;;  %v7994_v23 = vld [vmem:[#allocation4 + $0x3e] sm:$0x1]  ;;  %v2789_v17 = vld [vmem:[#allocation3 + $0x76] sm:$0x3]  ;;  %v6153_v40 = vunpack.i.h.bf16 %v6151_v4 }
 0x30f   :  { %v3118_v48 = vpop.f32.mrb[86].mxu0  ;;  %v3394_v36 = vld [vmem:[#allocation4 + $0x6b] sm:$0x1]  ;;  %v3428_v18 = vld [vmem:[#allocation4 + $0x6f] sm:$0x1]  ;;  %5704 = vmatprep.subr.bf16.mxu1 %v5703_v32  ;;  %v6148_v35 = vunpack.i.h.bf16 %v6146_v43  ;;  %v6147_v54 = vunpack.i.l.bf16 %v6146_v43  ;;  %v3495_v28 = vrot.slane %v7984_v27, 5 }
 0x310   :  { %v5340_v63 = vpop.f32.mrb[87].mxu0  ;;  %v6269_v58 = vpack.i.bf16 %v3394_v36, %v3371_v51  ;;  %v6279_v20 = vpack.i.bf16 %v3428_v18, %v3427_v49  ;;  %v3413_v12 = vld [vmem:[#allocation4 + $0x6d] sm:$0x1]  ;;  %v7998_v45 = vld [vmem:[#allocation4 + $0x40] sm:$0x1]  ;;  %v8004_v48 = vsel %vm483_vm5, %v2789_v17, %v6137_v33  ;;  %v6152_v36 = vunpack.i.l.bf16 %v6151_v4 }
 0x311   :  { %5706 = vmatpush3.bf16.msra.mxu1 %v5705_v61  ;;  %v6274_v57 = vpack.i.bf16 %v3413_v12, %v3412_v39  ;;  %v2866_v51 = vld [vmem:[#allocation3 + $0xf0] sm:$0xff]  ;;  %v3510_v63 = vrot.slane %v7988_v1, 4  ;;  %v2867_v18 = vld [vmem:[#allocation3 + $0xf8] sm:$0x3]  ;;  %v3567_v50 = vrot.slane %v7994_v23, 7  ;;  %v8017_v9 = vsel %vm483_vm5, %v2858_v2, %v6148_v35 }
 0x312   :  { %6270 = vrot.lane.b32.xlu0 %v6269_v58, %s6339_s16  ;;  %6260 = vrot.lane.b32.xlu1 %v6259_v0, %s6339_s16  ;;  %v7971_v37 = vpop.permute.xlu1 %6155  ;;  %v8007_v58 = vld [vmem:[#allocation4 + $0x64] sm:$0x1]  ;;  %v3582_v49 = vrot.slane %v7998_v45, 6  ;;  %v8022_v32 = vld [vmem:[#allocation4 + $0x42] sm:$0x1]  ;;  %v2930_v31 = vsel %vm483_vm5, %v2866_v51, %v6147_v54  ;;  %v8026_v52 = vsel %vm483_vm5, %v2859_v21, %v6153_v40 }
 0x313   :  { %v3123_v29 = vpop.f32.mrb[88].mxu0  ;;  %v3443_v53 = vld [vmem:[#allocation4 + $0x71] sm:$0x1]  ;;  %v8034_v12 = vld [vmem:[#allocation4 + $0x3c] sm:$0x1] }
 0x314   :  { %v5343_v10 = vpop.f32.mrb[89].mxu0  ;;  %v6284_v7 = vpack.i.bf16 %v3442_v6, %v3443_v53  ;;  %v3669_v29 = vsel %vm1165_vm10, %v3664_v44, %v3480_v24  ;;  %v6157_v53 = vunpack.i.l.bf16 %v7971_v37  ;;  %v3704_v6 = vsel %vm198_vm0, %v8034_v12, %v3567_v50  ;;  %v8042_v34 = vld [vmem:[#allocation4 + $0x66] sm:$0x1]  ;;  %v8044_v4 = vld [vmem:[#allocation4 + $0x6c] sm:$0x1] }
 0x315   :  { %v8031_v10 = vsel %vm483_vm5, %v2867_v18, %v6152_v36  ;;  %v3709_v33 = vsel %vm1165_vm10, %v3704_v6, %v3582_v49  ;;  %v3134_v19 = vld [vmem:[#allocation4] sm:$0x1]  ;;  %v3164_v24 = vld [vmem:[#allocation4 + $0x4] sm:$0x1]  ;;  %v8054_v40 = vld [vmem:[#allocation4 + $0x6e] sm:$0x1] }
 0x316   :  { %6280 = vrot.lane.b32.xlu0 %v6279_v20, %s6339_s16  ;;  %6265 = vrot.lane.b32.xlu1 %v6264_v3, %s6339_s16  ;;  %v7977_v22 = vpop.permute.xlu1 %6160  ;;  %v3524_v20 = vrot.slane %v8007_v58, 3  ;;  %v3675_v3 = vsel %vm3670_vm12, %v3669_v29, %v3495_v28  ;;  %v3136_v28 = vld [vmem:[#allocation4 + $0x2] sm:$0x1]  ;;  %v8057_v51 = vld [vmem:[#allocation4 + $0x6] sm:$0x1]  ;;  %v3612_v2 = vrot.slane %v8044_v4, 4 }
 0x317   :  { %v3681_v39 = vsel %vm3676_vm13, %v3675_v3, %v3510_v63  ;;  %v3538_v63 = vrot.slane %v8042_v34, 2  ;;  %v3165_v50 = vld [vmem:[#allocation4 + $0x1b] sm:$0x1]  ;;  %v3801_v29 = vld [vmem:[%s8745_s6 + $0x210] sm:$0xff]  ;;  %v3804_v6 = vld [vmem:[%s8745_s6 + $0x228] sm:$0xff] }
 0x318   :  { %v3687_v44 = vsel %vm3682_vm14, %v3681_v39, %v3524_v20  ;;  %v3626_v39 = vrot.slane %v8054_v40, 3  ;;  %v3208_v18 = vld [vmem:[#allocation4 + $0x8] sm:$0x1] }
 0x31a   :  { %6275 = vrot.lane.b32.xlu1 %v6274_v57, %s6339_s16  ;;  %v7986_v14 = vpop.permute.xlu1 %6165  ;;  %v3138_v57 = vld [vmem:[#allocation4 + $0x19] sm:$0x1] }
 0x31b   :  { %v6167_v5 = vunpack.i.l.bf16 %v7986_v14  ;;  %v6168_v60 = vunpack.i.h.bf16 %v7986_v14 }
 0x31d   :  { %v2932_v16 = vsel %vm1069_vm8, %v2930_v31, %v6167_v5  ;;  %v3802_v31 = vld [vmem:[%s8745_s6 + $0x218] sm:$0xff]  ;;  %v3159_v20 = vsel %vm1069_vm8, %v3134_v19, %v6168_v60 }
 0x31e   :  { %6285 = vrot.lane.b32.xlu1 %v6284_v7, %s6339_s16  ;;  %v3597_v7 = vrot.slane %v8022_v32, 5  ;;  %v8068_v5 = vsel %vm1072_vm9, %v2932_v16, %v6157_v53  ;;  %v3803_v53 = vld [vmem:[%s8745_s6 + $0x220] sm:$0xff] }
 0x320   :  { %v3714_v49 = vsel %vm3670_vm12, %v3709_v33, %v3597_v7  ;;  %v8089_v7 = vsel %vm3688_vm15, %v3687_v44, %v3538_v63  ;;  %v8100_v44 = vpack.c.bf16 %v3802_v31, %v3801_v29 }
 0x321   :  { %8758 = vst [vmem:[#allocation8_spill] sm:$0xff] %v8089_v7  ;;  %v3719_v0 = vsel %vm3676_vm13, %v3714_v49, %v3612_v2 }
 0x322   :  { %v3724_v43 = vsel %vm3682_vm14, %v3719_v0, %v3626_v39 }
 0x33c   :  { %v7965_v26 = vpop.permute.xlu0 %6175 }
 0x33d   :  { %v8011_v59 = vpop.permute.xlu1 %6170  ;;  %v6177_v35 = vunpack.i.l.bf16 %v7965_v26  ;;  %v6178_v3 = vunpack.i.h.bf16 %v7965_v26 }
 0x33e   :  { %v8755_v61 = vunpack.i.l.bf16 %v8011_v59  ;;  %v6173_v17 = vunpack.i.h.bf16 %v8011_v59 }
 0x33f   :  { %v3183_v16 = vsel %vm1069_vm8, %v3165_v50, %v6177_v35  ;;  %v3204_v26 = vsel %vm1069_vm8, %v8057_v51, %v6177_v35  ;;  %v3160_v2 = vsel %vm1069_vm8, %v3136_v28, %v6178_v3 }
 0x340   :  { %v7967_v46 = vpop.permute.xlu0 %6180  ;;  %v3182_v14 = vsel %vm1069_vm8, %v3164_v24, %v8755_v61  ;;  %v3181_v60 = vsel %vm1069_vm8, %v3136_v28, %v6173_v17  ;;  %v8105_v17 = vpack.c.bf16 %v3804_v6, %v3803_v53  ;;  %v3463_v49 = vrot.slane %v3183_v16, 7 }
 0x341   :  { %v6182_v36 = vunpack.i.l.bf16 %v7967_v46  ;;  %v6183_v21 = vunpack.i.h.bf16 %v7967_v46  ;;  %v8080_v46 = vld [vmem:[#allocation4 + $0x70] sm:$0x1]  ;;  %v3462_v33 = vrot.slane %v3182_v14, 7  ;;  %v3805_v14 = vld [vmem:[%s8745_s6 + $0x230] sm:$0xff]  ;;  %v3461_v29 = vrot.slane %v3181_v60, 7 }
 0x342   :  { %v3640_v35 = vrot.slane %v8080_v46, 2  ;;  %v8759_v16 = vunpack.i.l.bf16 %v8011_v59 }
 0x343   :  { %v3203_v55 = vsel %vm1069_vm8, %v3164_v24, %v6182_v36  ;;  %v3205_v63 = vsel %vm1069_vm8, %v3187_v8, %v6183_v21  ;;  %v3226_v50 = vsel %vm1069_vm8, %v3208_v18, %v6183_v21  ;;  %v3806_v24 = vld [vmem:[%s8745_s6 + $0x238] sm:$0xff]  ;;  %v8113_v36 = vld [vmem:[#allocation4 + $0x68] sm:$0x1]  ;;  %v3477_v8 = vrot.slane %v3204_v26, 6 }
 0x344   :  { %v7969_v62 = vpop.permute.xlu0 %6185  ;;  %v8116_v18 = vld [vmem:[#allocation4 + $0x72] sm:$0x1]  ;;  %v3661_v21 = vsel %vm198_vm0, %v3160_v2, %v3462_v33  ;;  %v3476_v31 = vrot.slane %v3203_v55, 6  ;;  %v3478_v61 = vrot.slane %v3205_v63, 6  ;;  %v3492_v38 = vrot.slane %v3226_v50, 5 }
 0x345   :  { %v6188_v53 = vunpack.i.h.bf16 %v7969_v62  ;;  %v8125_v28 = vpack.c.bf16 %v3806_v24, %v3805_v14  ;;  %v3161_v26 = vsel %vm1069_vm8, %v3138_v57, %v8759_v16  ;;  %v6187_v55 = vunpack.i.l.bf16 %v7969_v62  ;;  %v3209_v63 = vld [vmem:[#allocation4 + $0x1f] sm:$0x1] }
 0x346   :  { %v3660_v0 = vsel %vm198_vm0, %v3159_v20, %v3461_v29  ;;  %v3662_v39 = vsel %vm198_vm0, %v3161_v26, %v3463_v49  ;;  %v3666_v50 = vsel %vm1165_vm10, %v3661_v21, %v3477_v8  ;;  %v8138_v14 = vsel %vm3688_vm15, %v3724_v43, %v3640_v35  ;;  %v3299_v20 = vld [vmem:[#allocation4 + $0x23] sm:$0x1]  ;;  %v8149_v49 = vld [vmem:[#allocation4 + $0xe] sm:$0x1] }
 0x347   :  { %v3665_v59 = vsel %vm1165_vm10, %v3660_v0, %v3476_v31  ;;  %v8142_v57 = vsel %vm1069_vm8, %v3209_v63, %v6188_v53  ;;  %v8147_v2 = vsel %vm1165_vm10, %v3662_v39, %v3478_v61  ;;  %v3672_v21 = vsel %vm3670_vm12, %v3666_v50, %v3492_v38  ;;  %v3369_v61 = vld [vmem:[#allocation4 + $0x12] sm:$0x1]  ;;  %v3140_v39 = vld [vmem:[#allocation4 + $0x30] sm:$0x1] }
 0x348   :  { %v7973_v13 = vpop.permute.xlu0 %6190  ;;  %v8157_v31 = vsel %vm1069_vm8, %v3299_v20, %v6187_v55 }
 0x349   :  { %v6193_v62 = vunpack.i.h.bf16 %v7973_v13  ;;  %v6192_v0 = vunpack.i.l.bf16 %v7973_v13 }
 0x34c   :  { %v7979_v56 = vpop.permute.xlu0 %6195 }
 0x34d   :  { %v6197_v60 = vunpack.i.l.bf16 %v7979_v56  ;;  %v6198_v24 = vunpack.i.h.bf16 %v7979_v56  ;;  %v8161_v56 = vsel %vm1069_vm8, %v8149_v49, %v6187_v55  ;;  %v8172_v55 = vsel %vm1069_vm8, %v3369_v61, %v6193_v62 }
 0x34f   :  { %v2926_v53 = vsel %vm1069_vm8, %v8017_v9, %v6197_v60  ;;  %v8175_v20 = vsel %vm1069_vm8, %v3140_v39, %v6198_v24 }
 0x350   :  { %v8013_v47 = vpop.permute.xlu0 %6200 }
 0x351   :  { %v6203_v8 = vunpack.i.h.bf16 %v8013_v47  ;;  %v6202_v43 = vunpack.i.l.bf16 %v8013_v47  ;;  %v3348_v47 = vld [vmem:[#allocation4 + $0x27] sm:$0x1] }
 0x352   :  { %v8169_v50 = vsel %vm1069_vm8, %v3348_v47, %v6193_v62  ;;  %v8760_v62 = vunpack.i.h.bf16 %v7971_v37 }
 0x353   :  { %v8181_v60 = vsel %vm1069_vm8, %v7975_v11, %v6203_v8  ;;  %v2849_v47 = vsel %vm1069_vm8, %v7991_v25, %v6202_v43 }
 0x354   :  { %v8052_v54 = vpop.permute.xlu0 %6205  ;;  %v2928_v24 = vsel %vm1072_vm9, %v2926_v53, %v8760_v62  ;;  %v8761_v53 = vunpack.i.h.bf16 %v7963_v42 }
 0x355   :  { %v6208_v38 = vunpack.i.h.bf16 %v8052_v54  ;;  %v6207_v3 = vunpack.i.l.bf16 %v8052_v54  ;;  %v3534_v54 = vrot.slane %v8181_v60, 2 }
 0x357   :  { %v2927_v8 = vsel %vm1069_vm8, %v8026_v52, %v6208_v38  ;;  %v3506_v52 = vrot.slane %v8175_v20, 4  ;;  %v2851_v38 = vsel %vm1072_vm9, %v2849_v47, %v8761_v53  ;;  %v8764_v47 = vunpack.i.l.bf16 %v7963_v42 }
 0x35c   :  { %v8095_v19 = vpop.permute.xlu0 %6215  ;;  %v8123_v7 = vpop.permute.xlu1 %6210 }
 0x360   :  { %v8120_v6 = vpop.permute.xlu0 %6220 }
 0x365   :  { %v6226_v35 = vpop.permute.xlu0 %6225  ;;  %v8153_v29 = vpop.permute.xlu1 %6235 }
 0x366   :  { %v6227_v16 = vunpack.i.l.bf16 %v6226_v35  ;;  %v6228_v63 = vunpack.i.h.bf16 %v6226_v35  ;;  %v6237_v61 = vunpack.i.l.bf16 %v8153_v29 }
 0x368   :  { %v3225_v9 = vsel %vm1069_vm8, %v8057_v51, %v6227_v16  ;;  %v3247_v26 = vsel %vm1069_vm8, %v7996_v41, %v6228_v63  ;;  %v2942_v63 = vrot.slane %v2928_v24, 6  ;;  %v8216_v62 = vsel %vm1069_vm8, %v7996_v41, %v6237_v61 }
 0x369   :  { %v6231_v33 = vpop.permute.xlu0 %6230  ;;  %v8184_v35 = vpop.permute.xlu1 %6240  ;;  %v3491_v13 = vrot.slane %v3225_v9, 5  ;;  %v3507_v9 = vrot.slane %v3247_v26, 4  ;;  %v8765_v24 = vunpack.i.l.bf16 %v7977_v22 }
 0x36a   :  { %v6233_v39 = vunpack.i.h.bf16 %v6231_v33  ;;  %v6232_v51 = vunpack.i.l.bf16 %v6231_v33  ;;  %v6243_v16 = vunpack.i.h.bf16 %v8184_v35  ;;  %v8766_v41 = vunpack.i.l.bf16 %v8184_v35 }
 0x36b   :  { %v2956_v42 = vsel %vm1165_vm10, %v2851_v38, %v2942_v63 }
 0x36c   :  { %v3262_v37 = vsel %vm1069_vm8, %v7975_v11, %v6232_v51  ;;  %v2933_v25 = vsel %vm1069_vm8, %v8031_v10, %v6243_v16  ;;  %v2855_v33 = vsel %vm1069_vm8, %v8004_v48, %v6233_v39  ;;  %v8762_v11 = vunpack.i.h.bf16 %v8153_v29 }
 0x36d   :  { %v8763_v48 = vunpack.i.h.bf16 %v7977_v22  ;;  %v3671_v16 = vsel %vm3670_vm12, %v3665_v59, %v3491_v13  ;;  %v3521_v43 = vrot.slane %v3262_v37, 3  ;;  %v2857_v26 = vsel %vm1072_vm9, %v2855_v33, %v8764_v47  ;;  %v3230_v37 = vld [vmem:[#allocation4 + $0x49] sm:$0x1] }
 0x36e   :  { %v3277_v10 = vsel %vm1069_vm8, %v7982_v30, %v8762_v11  ;;  %v2935_v53 = vsel %vm1072_vm9, %v2933_v25, %v8765_v24  ;;  %v8230_v11 = vsel %vm1069_vm8, %v7982_v30, %v6207_v3  ;;  %v3292_v61 = vsel %vm1069_vm8, %v7984_v27, %v8766_v41 }
 0x36f   :  { %v2929_v39 = vsel %vm1072_vm9, %v2927_v8, %v8763_v48  ;;  %v8767_v59 = vrot.slane %v8068_v5, 6  ;;  %v6213_v8 = vunpack.i.h.bf16 %v8123_v7  ;;  %v3520_v22 = vrot.slane %v8216_v62, 3 }
 0x370   :  { %v2947_v25 = vrot.slane %v2935_v53, 6  ;;  %v2945_v30 = vrot.slane %v2929_v39, 6  ;;  %v3535_v3 = vrot.slane %v3277_v10, 2  ;;  %v3248_v33 = vsel %vm1069_vm8, %v3230_v37, %v6232_v51  ;;  %v6246_v53 = vpop.permute.xlu1 %6245  ;;  %v3347_v37 = vld [vmem:[#allocation4 + $0x10] sm:$0x1] }
 0x371   :  { %v2957_v13 = vsel %vm1165_vm10, %v2857_v26, %v8767_v59  ;;  %v3678_v27 = vsel %vm3676_vm13, %v3672_v21, %v3507_v9  ;;  %v3677_v48 = vsel %vm3676_vm13, %v3671_v16, %v3506_v52  ;;  %v8768_v47 = vmov %v8767_v59 }
 0x372   :  { %3036 = vmatprep.mubr.f32.mxu1 %v2957_v13  ;;  %v2948_v38 = vsel %vm1165_vm10, %v8768_v47, %v2947_v25  ;;  %v3549_v26 = vrot.slane %v3292_v61, 1  ;;  %v3684_v24 = vsel %vm3682_vm14, %v3678_v27, %v3521_v43  ;;  %v3683_v41 = vsel %vm3682_vm14, %v3677_v48, %v3520_v22  ;;  %v3301_v25 = vld [vmem:[#allocation4 + $0x3a] sm:$0x1]  ;;  %v3265_v48 = vld [vmem:[#allocation4 + $0x4d] sm:$0x1] }
 0x373   :  { %3037 = vmatmul.mubr.f32.gmra.mrb[80].mxu1 %v2956_v42  ;;  %v8252_v39 = vsel %vm1069_vm8, %v8149_v49, %v6192_v0  ;;  %v3548_v51 = vrot.slane %v8230_v11, 1  ;;  %v3690_v21 = vsel %vm3688_vm15, %v3684_v24, %v3535_v3  ;;  %v3689_v52 = vsel %vm3688_vm15, %v3683_v41, %v3534_v54  ;;  %v3297_v47 = vld [vmem:[#allocation4 + $0xc] sm:$0x1] }
 0x374   :  { %3041 = vmatprep.mubr.f32.mxu1 %v2948_v38  ;;  %v6218_v5 = vunpack.i.h.bf16 %v8095_v19  ;;  %v6222_v9 = vunpack.i.l.bf16 %v8120_v6  ;;  %v3696_v10 = vsel %vm3694_vm1, %v3690_v21, %v3549_v26  ;;  %v2946_v43 = vsel %vm1165_vm10, %v2942_v63, %v2945_v30 }
 0x375   :  { %v3564_v16 = vrot.slane %v8161_v56, 7  ;;  %v6217_v49 = vunpack.i.l.bf16 %v8095_v19  ;;  %v3508_v0 = vrot.slane %v3248_v33, 4  ;;  %3884 = vmatprep.mubr.f32.mxu0 %v3696_v10  ;;  %v3695_v61 = vsel %vm3694_vm1, %v3689_v52, %v3548_v51  ;;  %v3250_v19 = vld [vmem:[#allocation4 + $0x4b] sm:$0x1] }
 0x376   :  { %v8769_v54 = vrot.slane %v8142_v57, 5  ;;  %v3580_v13 = vrot.slane %v8169_v50, 6  ;;  %v8271_v63 = vsel %vm1069_vm8, %v8034_v12, %v6213_v8  ;;  %v6223_v56 = vunpack.i.h.bf16 %v8120_v6  ;;  %3885 = vmatmul.mubr.f32.vlgmr.msra.gmra.mrb[90].mxu0 %v3695_v61  ;;  %v3391_v61 = vld [vmem:[#allocation4 + $0x53] sm:$0x1] }
 0x377   :  { %3042 = vmatmul.mubr.f32.gmra.mrb[82].mxu1 %v2946_v43  ;;  %v3594_v42 = vrot.slane %v8172_v55, 5  ;;  %v3578_v22 = vrot.slane %v8252_v39, 6  ;;  %v6212_v57 = vunpack.i.l.bf16 %v8123_v7  ;;  %5710 = vmatpush3.bf16.msra.mxu0 %v7944_v15  ;;  %v8282_v8 = vsel %vm1069_vm8, %v3347_v37, %v6218_v5  ;;  %v3280_v5 = vld [vmem:[#allocation4 + $0x4f] sm:$0x1] }
 0x378   :  { %v3673_v59 = vsel %vm3670_vm12, %v8147_v2, %v8769_v54  ;;  %v8770_v2 = vunpack.i.h.bf16 %v8153_v29  ;;  %v8285_v6 = vsel %vm1069_vm8, %v3301_v25, %v6222_v9  ;;  %v3464_v3 = vrot.slane %v8216_v62, 7  ;;  %5712 = vmatprep.subr.bf16.mxu0 %v8100_v44 }
 0x379   :  { %v6248_v33 = vunpack.i.h.bf16 %v6246_v53  ;;  %v3479_v7 = vrot.slane %v8181_v60, 6  ;;  %v8292_v29 = vsel %vm1069_vm8, %v7994_v23, %v6217_v49  ;;  %v3566_v27 = vrot.slane %v8271_v63, 7 }
 0x37a   :  { %v3263_v30 = vsel %vm1069_vm8, %v3250_v19, %v8770_v2  ;;  %v3679_v15 = vsel %vm3676_vm13, %v3673_v59, %v3508_v0  ;;  %v8298_v38 = vsel %vm1069_vm8, %v7998_v45, %v6223_v56  ;;  %v8771_v26 = vunpack.i.l.bf16 %v8184_v35 }
 0x37b   :  { %v3522_v62 = vrot.slane %v3263_v30, 3  ;;  %v6247_v60 = vunpack.i.l.bf16 %v6246_v53  ;;  %v3494_v41 = vrot.slane %v8230_v11, 5  ;;  %v3593_v51 = vrot.slane %v8282_v8, 5  ;;  %5714 = vmatpush3.bf16.msra.mxu0 %v8100_v44 }
 0x37c   :  { %v3278_v24 = vsel %vm1069_vm8, %v3265_v48, %v8771_v26  ;;  %v3321_v21 = vsel %vm1069_vm8, %v3297_v47, %v6212_v57  ;;  %v3703_v52 = vsel %vm198_vm0, %v8285_v6, %v3566_v27  ;;  %v3581_v9 = vrot.slane %v8292_v29, 6  ;;  %5716 = vmatprep.subr.bf16.mxu0 %v8105_v17  ;;  %v3326_v48 = vld [vmem:[#allocation4 + $0x25] sm:$0x1] }
 0x37d   :  { %v3663_v35 = vsel %vm198_vm0, %v8175_v20, %v3464_v3  ;;  %v3293_v10 = vsel %vm1069_vm8, %v3280_v5, %v6248_v33  ;;  %v3685_v43 = vsel %vm3682_vm14, %v3679_v15, %v3522_v62  ;;  %v3636_v11 = vrot.slane %v8292_v29, 2 }
 0x37e   :  { %v3622_v49 = vrot.slane %v8271_v63, 3  ;;  %v3596_v0 = vrot.slane %v8298_v38, 5  ;;  %v3536_v53 = vrot.slane %v3278_v24, 2  ;;  %v3701_v44 = vsel %vm198_vm0, %v3321_v21, %v3564_v16 }
 0x37f   :  { %v3708_v54 = vsel %vm1165_vm10, %v3703_v52, %v3581_v9  ;;  %v8321_v20 = vsel %vm1069_vm8, %v3391_v61, %v6247_v60  ;;  %v8325_v59 = vsel %vm1069_vm8, %v7994_v23, %v6247_v60  ;;  %v3608_v56 = vrot.slane %v8285_v6, 4  ;;  %5718 = vmatpush3.bf16.msra.mxu0 %v8105_v17  ;;  %v3232_v9 = vld [vmem:[#allocation4 + $0x60] sm:$0x1] }
 0x380   :  { %v3550_v19 = vrot.slane %v3293_v10, 1  ;;  %v6256_v57 = vpop.permute.xlu0 %6255  ;;  %v6251_v25 = vpop.permute.xlu1 %6250  ;;  %v3668_v2 = vsel %vm1165_vm10, %v3663_v35, %v3479_v7  ;;  %v3691_v30 = vsel %vm3688_vm15, %v3685_v43, %v3536_v53  ;;  %5720 = vmatprep.subr.bf16.mxu0 %v8125_v28  ;;  %v3610_v23 = vrot.slane %v8321_v20, 4  ;;  %v4133_v20 = vld [vmem:[%s8747_s8 + $0x80] sm:$0xff] }
 0x381   :  { %v6258_v16 = vunpack.i.h.bf16 %v6256_v57  ;;  %v6257_v3 = vunpack.i.l.bf16 %v6256_v57  ;;  %v6253_v33 = vunpack.i.h.bf16 %v6251_v25  ;;  %v6252_v27 = vunpack.i.l.bf16 %v6251_v25  ;;  %v3393_v57 = vld [vmem:[#allocation4 + $0x6a] sm:$0x1] }
 0x382   :  { %v3623_v15 = vrot.slane %v8325_v59, 3  ;;  %v3650_v62 = vrot.slane %v8298_v38, 1  ;;  %v8336_v26 = vsel %vm3670_vm12, %v3708_v54, %v3596_v0  ;;  %v3674_v60 = vsel %vm3670_vm12, %v3668_v2, %v3494_v41 }
 0x383   :  { %v3344_v7 = vsel %vm1069_vm8, %v3326_v48, %v6257_v3  ;;  %v3365_v17 = vsel %vm1069_vm8, %v3347_v37, %v6257_v3  ;;  %v3342_v24 = vsel %vm1069_vm8, %v3297_v47, %v6253_v33  ;;  %v3264_v21 = vsel %vm1069_vm8, %v7988_v1, %v6258_v16  ;;  %5722 = vmatpush3.bf16.msra.mxu0 %v8125_v28  ;;  %v3295_v1 = vld [vmem:[#allocation4 + $0xa] sm:$0x1]  ;;  %v3370_v3 = vld [vmem:[#allocation4 + $0x29] sm:$0x1] }
 0x384   :  { %v3565_v52 = vrot.slane %v3344_v7, 7  ;;  %v3579_v5 = vrot.slane %v3365_v17, 6  ;;  %v6271_v35 = vpop.permute.xlu0 %6270  ;;  %v6261_v10 = vpop.permute.xlu1 %6260  ;;  %v3697_v43 = vsel %vm3694_vm1, %v3691_v30, %v3550_v19  ;;  %v3249_v0 = vsel %vm1069_vm8, %v3232_v9, %v6252_v27 }
 0x385   :  { %v6273_v53 = vunpack.i.h.bf16 %v6271_v35  ;;  %v6272_v37 = vunpack.i.l.bf16 %v6271_v35  ;;  %v6263_v61 = vunpack.i.h.bf16 %v6261_v10  ;;  %v3563_v41 = vrot.slane %v3342_v24, 7 }
 0x386   :  { %v3706_v47 = vsel %vm1165_vm10, %v3701_v44, %v3579_v5  ;;  %v3509_v54 = vrot.slane %v3249_v0, 4  ;;  %v6262_v25 = vunpack.i.l.bf16 %v6261_v10  ;;  %v3523_v2 = vrot.slane %v3264_v21, 3  ;;  %v3426_v10 = vld [vmem:[#allocation4 + $0x57] sm:$0x1] }
 0x387   :  { %v3702_v16 = vsel %vm198_vm0, %v8157_v31, %v3565_v52  ;;  %v3410_v19 = vsel %vm1069_vm8, %v3393_v57, %v6273_v53  ;;  %v3320_v28 = vsel %vm1069_vm8, %v3295_v1, %v6263_v61  ;;  %v8353_v30 = vsel %vm1069_vm8, %v3370_v3, %v6272_v37 }
 0x388   :  { %v3279_v44 = vsel %vm1069_vm8, %v8007_v58, %v6262_v25  ;;  %v3700_v33 = vsel %vm198_vm0, %v3320_v28, %v3563_v41  ;;  %v6281_v27 = vpop.permute.xlu0 %6280  ;;  %v6266_v48 = vpop.permute.xlu1 %6265  ;;  %v3711_v7 = vsel %vm3670_vm12, %v3706_v47, %v3594_v42  ;;  %v3611_v31 = vrot.slane %v3410_v19, 4 }
 0x389   :  { %v3705_v17 = vsel %vm1165_vm10, %v3700_v33, %v3578_v22  ;;  %v6283_v24 = vunpack.i.h.bf16 %v6281_v27  ;;  %v6282_v21 = vunpack.i.l.bf16 %v6281_v27  ;;  %v3537_v52 = vrot.slane %v3279_v44, 2  ;;  %v3441_v33 = vld [vmem:[#allocation4 + $0x59] sm:$0x1] }
 0x38a   :  { %v6268_v5 = vunpack.i.h.bf16 %v6266_v48  ;;  %v6267_v9 = vunpack.i.l.bf16 %v6266_v48  ;;  %v3680_v58 = vsel %vm3676_vm13, %v3674_v60, %v3509_v54  ;;  %v3595_v35 = vrot.slane %v8353_v30, 5  ;;  %v3411_v54 = vld [vmem:[#allocation4 + $0x55] sm:$0x1] }
 0x38b   :  { %v3440_v55 = vsel %vm1069_vm8, %v8054_v40, %v6283_v24  ;;  %v3453_v42 = vsel %vm1069_vm8, %v8022_v32, %v6282_v21  ;;  %v3710_v39 = vsel %vm3670_vm12, %v3705_v17, %v3593_v51  ;;  %v3439_v22 = vsel %vm1069_vm8, %v3426_v10, %v6282_v21 }
 0x38c   :  { %v3294_v0 = vsel %vm1069_vm8, %v8042_v34, %v6268_v5  ;;  %v3408_v60 = vsel %vm1069_vm8, %v8034_v12, %v6267_v9  ;;  %v6276_v53 = vpop.permute.xlu1 %6275  ;;  %v3686_v37 = vsel %vm3682_vm14, %v3680_v58, %v3523_v2  ;;  %v3639_v32 = vrot.slane %v3440_v55, 2  ;;  %v4117_v5 = vld [vmem:[%s8747_s8] sm:$0xff]  ;;  %v4166_v58 = vld [vmem:[%s8747_s8 + $0x188] sm:$0xff] }
 0x38d   :  { %v3609_v61 = vrot.slane %v3408_v60, 4  ;;  %v6278_v40 = vunpack.i.h.bf16 %v6276_v53  ;;  %v6277_v47 = vunpack.i.l.bf16 %v6276_v53  ;;  %v3551_v41 = vrot.slane %v3294_v0, 1  ;;  %v4149_v55 = vld [vmem:[%s8747_s8 + $0x100] sm:$0xff]  ;;  %v4136_v0 = vld [vmem:[%s8747_s8 + $0x98] sm:$0xff]  ;;  %v4119_v60 = vld [vmem:[%s8747_s8 + $0x10] sm:$0xff] }
 0x38e   :  { %v3692_v8 = vsel %vm3688_vm15, %v3686_v37, %v3537_v52  ;;  %v3651_v51 = vrot.slane %v3453_v42, 1  ;;  %v3715_v57 = vsel %vm3676_vm13, %v3710_v39, %v3608_v56  ;;  %v3718_v6 = vsel %vm3676_vm13, %v8336_v26, %v3611_v31  ;;  %v4150_v42 = vld [vmem:[%s8747_s8 + $0x108] sm:$0xff]  ;;  %v4135_v39 = vld [vmem:[%s8747_s8 + $0x90] sm:$0xff]  ;;  %v4120_v53 = vld [vmem:[%s8747_s8 + $0x18] sm:$0xff] }
 0x38f   :  { %v3425_v34 = vsel %vm1069_vm8, %v8044_v4, %v6278_v40  ;;  %v3424_v12 = vsel %vm1069_vm8, %v3411_v54, %v6277_v47  ;;  %v3438_v1 = vsel %vm1069_vm8, %v7998_v45, %v6277_v47  ;;  %v3698_v25 = vsel %vm3694_vm1, %v3692_v8, %v3551_v41  ;;  %v4167_v40 = vld [vmem:[%s8747_s8 + $0x190] sm:$0xff]  ;;  %v4168_v47 = vld [vmem:[%s8747_s8 + $0x198] sm:$0xff]  ;;  %v4137_v8 = vld [vmem:[%s8747_s8 + $0xa0] sm:$0xff] }
 0x390   :  { %v3625_v2 = vrot.slane %v3425_v34, 3  ;;  %v3637_v3 = vrot.slane %v3438_v1, 2  ;;  %3959 = vmatprep.mubr.f32.mxu1 %v3698_v25  ;;  %v6286_v19 = vpop.permute.xlu1 %6285  ;;  %v3716_v28 = vsel %vm3676_vm13, %v3711_v7, %v3609_v61  ;;  %v3720_v45 = vsel %vm3682_vm14, %v3715_v57, %v3622_v49  ;;  %v4151_v41 = vld [vmem:[%s8747_s8 + $0x110] sm:$0xff]  ;;  %v4152_v54 = vld [vmem:[%s8747_s8 + $0x118] sm:$0xff]  ;;  %v4122_v1 = vld [vmem:[%s8747_s8 + $0x28] sm:$0xff] }
 0x391   :  { %v6288_v56 = vunpack.i.h.bf16 %v6286_v19  ;;  %v6287_v30 = vunpack.i.l.bf16 %v6286_v19  ;;  %3960 = vmatmul.mubr.f32.vlgmr.msra.gmra.mrb[84].mxu1 %v3697_v43  ;;  %v3721_v4 = vsel %vm3682_vm14, %v3716_v28, %v3623_v15  ;;  %v3624_v44 = vrot.slane %v3424_v12, 3  ;;  %v4121_v12 = vld [vmem:[%s8747_s8 + $0x20] sm:$0xff]  ;;  %v4154_v19 = vld [vmem:[%s8747_s8 + $0x128] sm:$0xff] }
 0x392   :  { %v3726_v27 = vsel %vm3688_vm15, %v3721_v4, %v3637_v3  ;;  %v3725_v48 = vsel %vm3688_vm15, %v3720_v45, %v3636_v11  ;;  %v3723_v26 = vsel %vm3682_vm14, %v3718_v6, %v3625_v2  ;;  %v3707_v63 = vsel %vm1165_vm10, %v3702_v16, %v3580_v13  ;;  %v4169_v25 = vld [vmem:[%s8747_s8 + $0x1a0] sm:$0xff]  ;;  %v4170_v2 = vld [vmem:[%s8747_s8 + $0x1a8] sm:$0xff]  ;;  %v4123_v4 = vld [vmem:[%s8747_s8 + $0x30] sm:$0xff] }
 0x393   :  { %v3454_v43 = vsel %vm1069_vm8, %v3441_v33, %v6288_v56  ;;  %v3455_v59 = vsel %vm1069_vm8, %v8080_v46, %v6287_v30  ;;  %v3731_v15 = vsel %vm3694_vm1, %v3726_v27, %v3651_v51  ;;  %v3730_v29 = vsel %vm3694_vm1, %v3725_v48, %v3650_v62  ;;  %v8773_v46 = vld [vmem:[#allocation8_spill] sm:$0xff]  ;;  %v4138_v51 = vld [vmem:[%s8747_s8 + $0xa8] sm:$0xff]  ;;  %v4139_v56 = vld [vmem:[%s8747_s8 + $0xb0] sm:$0xff] }
 0x394   :  { %3889 = vmatprep.mubr.f32.mxu0 %v3731_v15  ;;  %v3653_v49 = vrot.slane %v3455_v59, 1  ;;  %v3652_v11 = vrot.slane %v3454_v43, 1  ;;  %v3712_v7 = vsel %vm3670_vm12, %v3707_v63, %v3595_v35  ;;  %v3638_v31 = vrot.slane %v3439_v22, 2  ;;  %v4153_v3 = vld [vmem:[%s8747_s8 + $0x120] sm:$0xff]  ;;  %v4140_v30 = vld [vmem:[%s8747_s8 + $0xb8] sm:$0xff]  ;;  %v4171_v27 = vld [vmem:[%s8747_s8 + $0x1b0] sm:$0xff] }
 0x395   :  { %3890 = vmatmul.mubr.f32.gmra.mrb[92].mxu0 %v3730_v29  ;;  %v8772_v17 = vrot.slane %v8113_v36, 1  ;;  %v3728_v50 = vsel %vm3688_vm15, %v3723_v26, %v3639_v32  ;;  %v3717_v13 = vsel %vm3676_vm13, %v3712_v7, %v3610_v23  ;;  %v8774_v21 = vrot.slane %v8116_v18, 1  ;;  %v4134_v23 = vld [vmem:[%s8747_s8 + $0x88] sm:$0xff]  ;;  %v4124_v33 = vld [vmem:[%s8747_s8 + $0x38] sm:$0xff]  ;;  %v4155_v43 = vld [vmem:[%s8747_s8 + $0x130] sm:$0xff] }
 0x396   :  { %v3733_v38 = vsel %vm3694_vm1, %v3728_v50, %v3653_v49  ;;  %v3722_v62 = vsel %vm3682_vm14, %v3717_v13, %v3624_v44  ;;  %v5723_v9 = vpack.c.bf16 %v4134_v23, %v4133_v20  ;;  %v4118_v18 = vld [vmem:[%s8747_s8 + $0x8] sm:$0xff]  ;;  %v5757_v22 = vpack.c.bf16 %v4150_v42, %v4149_v55  ;;  %v4172_v48 = vld [vmem:[%s8747_s8 + $0x1b8] sm:$0xff]  ;;  %v4141_v15 = vld [vmem:[%s8747_s8 + $0xc0] sm:$0xff] }
 0x397   :  { %v3699_v24 = vsel %vm3694_vm1, %v8773_v46, %v8772_v17  ;;  %3964 = vmatprep.mubr.f32.mxu1 %v3733_v38  ;;  %v3727_v16 = vsel %vm3688_vm15, %v3722_v62, %v3638_v31  ;;  %v3734_v52 = vsel %vm3694_vm1, %v8138_v14, %v8774_v21  ;;  %v4165_v14 = vld [vmem:[%s8747_s8 + $0x180] sm:$0xff]  ;;  %v5725_v35 = vpack.c.bf16 %v4118_v18, %v4117_v5  ;;  %v4156_v59 = vld [vmem:[%s8747_s8 + $0x138] sm:$0xff]  ;;  %v4142_v63 = vld [vmem:[%s8747_s8 + $0xc8] sm:$0xff] }
 0x398   :  { %5360 = vmatprep.mubr.msk.f32.mxu0 %vm1069_vm8, %v3699_v24  ;;  %v3732_v36 = vsel %vm3694_vm1, %v3727_v16, %v3652_v11  ;;  %v5755_v10 = vpack.c.bf16 %v4166_v58, %v4165_v14  ;;  %5724 = vmatprep.subr.bf16.mxu1 %v5723_v9  ;;  %v5727_v37 = vpack.c.bf16 %v4136_v0, %v4135_v39  ;;  %v4173_v49 = vld [vmem:[%s8747_s8 + $0x1c0] sm:$0xff]  ;;  %v4174_v11 = vld [vmem:[%s8747_s8 + $0x1c8] sm:$0xff]  ;;  %v4143_v38 = vld [vmem:[%s8747_s8 + $0xd0] sm:$0xff] }
 0x399   :  { %3965 = vmatmul.mubr.f32.gmra.mrb[86].mxu1 %v3732_v36  ;;  %5361 = vmatmul.mubr.msk.f32.vlgmr.msra.gmra.mrb[94].mxu0 %vm1069_vm8, %v3734_v52  ;;  %v5729_v61 = vpack.c.bf16 %v4120_v53, %v4119_v60  ;;  %v5759_v32 = vpack.c.bf16 %v4168_v47, %v4167_v40  ;;  %v5761_v57 = vpack.c.bf16 %v4152_v54, %v4151_v41  ;;  %v4125_v17 = vld [vmem:[%s8747_s8 + $0x40] sm:$0xff]  ;;  %v4126_v46 = vld [vmem:[%s8747_s8 + $0x48] sm:$0xff]  ;;  %v4144_v62 = vld [vmem:[%s8747_s8 + $0xd8] sm:$0xff] }
 0x39a   :  { %5726 = vmatpush3.bf16.msra.mxu1 %v5725_v35  ;;  %5756 = vmatprep.subr.bf16.mxu0 %v5755_v10  ;;  %v5731_v34 = vpack.c.bf16 %v4138_v51, %v4137_v8  ;;  %v5733_v28 = vpack.c.bf16 %v4122_v1, %v4121_v12  ;;  %v5763_v6 = vpack.c.bf16 %v4170_v2, %v4169_v25  ;;  %v4157_v24 = vld [vmem:[%s8747_s8 + $0x140] sm:$0xff]  ;;  %v4158_v13 = vld [vmem:[%s8747_s8 + $0x148] sm:$0xff]  ;;  %v4175_v16 = vld [vmem:[%s8747_s8 + $0x1d0] sm:$0xff] }
 0x39b   :  { %5758 = vmatpush3.bf16.msra.mxu0 %v5757_v22  ;;  %5728 = vmatprep.subr.bf16.mxu1 %v5727_v37  ;;  %v5765_v45 = vpack.c.bf16 %v4154_v19, %v4153_v3  ;;  %v5735_v44 = vpack.c.bf16 %v4140_v30, %v4139_v56  ;;  %v5767_v26 = vpack.c.bf16 %v4172_v48, %v4171_v27  ;;  %v4176_v36 = vld [vmem:[%s8747_s8 + $0x1d8] sm:$0xff]  ;;  %v4127_v23 = vld [vmem:[%s8747_s8 + $0x50] sm:$0xff]  ;;  %v4530_v53 = vld [vmem:[%s8746_s7] ss:$0 sm:$0xff] }
 0x39c   :  { %5760 = vmatprep.subr.bf16.mxu0 %v5759_v32  ;;  %v5737_v29 = vpack.c.bf16 %v4124_v33, %v4123_v4  ;;  %v5769_v7 = vpack.c.bf16 %v4156_v59, %v4155_v43  ;;  %v5739_v31 = vpack.c.bf16 %v4142_v63, %v4141_v15  ;;  %v5771_v50 = vpack.c.bf16 %v4174_v11, %v4173_v49  ;;  %v4128_v5 = vld [vmem:[%s8747_s8 + $0x58] sm:$0xff]  ;;  %v4159_v18 = vld [vmem:[%s8747_s8 + $0x150] sm:$0xff]  ;;  %v4145_v19 = vld [vmem:[%s8747_s8 + $0xe0] sm:$0xff] }
 0x39d   :  { %v5741_v21 = vpack.c.bf16 %v4126_v46, %v4125_v17  ;;  %v5773_v52 = vpack.c.bf16 %v4158_v13, %v4157_v24  ;;  %v5743_v20 = vpack.c.bf16 %v4144_v62, %v4143_v38  ;;  %v5775_v9 = vpack.c.bf16 %v4176_v36, %v4175_v16  ;;  %v4160_v14 = vld [vmem:[%s8747_s8 + $0x158] sm:$0xff]  ;;  %v4130_v30 = vld [vmem:[%s8747_s8 + $0x68] sm:$0xff]  ;;  %v4177_v4 = vld [vmem:[%s8747_s8 + $0x1e0] sm:$0xff] }
 0x39e   :  { %5730 = vmatpush3.bf16.msra.mxu1 %v5729_v61  ;;  %v5745_v58 = vpack.c.bf16 %v4128_v5, %v4127_v23  ;;  %v5777_v35 = vpack.c.bf16 %v4160_v14, %v4159_v18  ;;  %v4161_v27 = vld [vmem:[%s8747_s8 + $0x160] sm:$0xff]  ;;  %v4162_v48 = vld [vmem:[%s8747_s8 + $0x168] sm:$0xff]  ;;  %v4147_v63 = vld [vmem:[%s8747_s8 + $0xf0] sm:$0xff]  ;;  %v8775_v14 = vmov 0.0|0.0  }
 0x39f   :  { %5762 = vmatpush3.bf16.msra.mxu0 %v5761_v57  ;;  %5732 = vmatprep.subr.bf16.mxu1 %v5731_v34  ;;  %v5781_v59 = vpack.c.bf16 %v4162_v48, %v4161_v27  ;;  %v4131_v49 = vld [vmem:[%s8747_s8 + $0x70] sm:$0xff]  ;;  %v4180_v17 = vld [vmem:[%s8747_s8 + $0x1f8] sm:$0xff] }
 0x3a0   :  { %5764 = vmatprep.subr.bf16.mxu0 %v5763_v6  ;;  %v4129_v6 = vld [vmem:[%s8747_s8 + $0x60] sm:$0xff]  ;;  %v4163_v38 = vld [vmem:[%s8747_s8 + $0x170] sm:$0xff]  ;;  %v4164_v62 = vld [vmem:[%s8747_s8 + $0x178] sm:$0xff] }
 0x3a1   :  { %v4331_v27 = vld [vmem:[%s8749_s10 + $0x10] sm:$0xff]  ;;  %v4332_v48 = vld [vmem:[%s8749_s10 + $0x18] sm:$0xff] }
 0x3a2   :  { %5734 = vmatpush3.bf16.msra.mxu1 %v5733_v28  ;;  %v4146_v28 = vld [vmem:[%s8747_s8 + $0xe8] sm:$0xff] }
 0x3a3   :  { %5766 = vmatpush3.bf16.msra.mxu0 %v5765_v45  ;;  %5736 = vmatprep.subr.bf16.mxu1 %v5735_v44  ;;  %v5747_v56 = vpack.c.bf16 %v4146_v28, %v4145_v19  ;;  %v4178_v45 = vld [vmem:[%s8747_s8 + $0x1e8] sm:$0xff] }
 0x3a4   :  { %5768 = vmatprep.subr.bf16.mxu0 %v5767_v26  ;;  %v5749_v26 = vpack.c.bf16 %v4130_v30, %v4129_v6  ;;  %v5779_v43 = vpack.c.bf16 %v4178_v45, %v4177_v4 }
 0x3a6   :  { %5738 = vmatpush3.bf16.msra.mxu1 %v5737_v29  ;;  %v4148_v29 = vld [vmem:[%s8747_s8 + $0xf8] sm:$0xff] }
 0x3a7   :  { %5770 = vmatpush3.bf16.msra.mxu0 %v5769_v7  ;;  %5740 = vmatprep.subr.bf16.mxu1 %v5739_v31  ;;  %v5751_v11 = vpack.c.bf16 %v4148_v29, %v4147_v63  ;;  %v4132_v7 = vld [vmem:[%s8747_s8 + $0x78] sm:$0xff]  ;;  %v4179_v31 = vld [vmem:[%s8747_s8 + $0x1f0] sm:$0xff]  ;;  %v5791_v63 = vpack.c.bf16 %v4332_v48, %v4331_v27  ;;  %v8776_v29 = vmov 0.0  }
 0x3a8   :  { %5772 = vmatprep.subr.bf16.mxu0 %v5771_v50  ;;  %v5783_v5 = vpack.c.bf16 %v4180_v17, %v4179_v31  ;;  %v4335_v31 = vld [vmem:[%s8749_s10 + $0x30] sm:$0xff]  ;;  %v4336_v17 = vld [vmem:[%s8749_s10 + $0x38] sm:$0xff] }
 0x3aa   :  { %5742 = vmatpush3.bf16.msra.mxu1 %v5741_v21  ;;  %v5753_v21 = vpack.c.bf16 %v4132_v7, %v4131_v49  ;;  %v4333_v49 = vld [vmem:[%s8749_s10 + $0x20] sm:$0xff] }
 0x3ab   :  { %5774 = vmatpush3.bf16.msra.mxu0 %v5773_v52  ;;  %5744 = vmatprep.subr.bf16.mxu1 %v5743_v20 }
 0x3ac   :  { %5776 = vmatprep.subr.bf16.mxu0 %v5775_v9  ;;  %v5785_v9 = vpack.c.bf16 %v4164_v62, %v4163_v38  ;;  %v4339_v38 = vld [vmem:[%s8749_s10 + $0x50] sm:$0xff]  ;;  %v4340_v62 = vld [vmem:[%s8749_s10 + $0x58] sm:$0xff] }
 0x3ae   :  { %5746 = vmatpush3.bf16.msra.mxu1 %v5745_v58 }
 0x3af   :  { %5778 = vmatpush3.bf16.msra.mxu0 %v5777_v35  ;;  %5748 = vmatprep.subr.bf16.mxu1 %v5747_v56 }
 0x3b0   :  { %5780 = vmatprep.subr.bf16.mxu0 %v5779_v43 }
 0x3b2   :  { %5750 = vmatpush3.bf16.msra.mxu1 %v5749_v26 }
 0x3b3   :  { %5782 = vmatpush3.bf16.msra.mxu0 %v5781_v59  ;;  %5752 = vmatprep.subr.bf16.mxu1 %v5751_v11  ;;  %v4334_v11 = vld [vmem:[%s8749_s10 + $0x28] sm:$0xff] }
 0x3b4   :  { %5784 = vmatprep.subr.bf16.mxu0 %v5783_v5  ;;  %v5794_v7 = vpack.c.bf16 %v4334_v11, %v4333_v49 }
 0x3b6   :  { %5754 = vmatpush3.bf16.msra.mxu1 %v5753_v21  ;;  %v4342_v21 = vld [vmem:[%s8749_s10 + $0x68] sm:$0xff] }
 0x3b7   :  { %5787 = vmatprep.subr.bf16.mxu1 %v8775_v14  ;;  %5786 = vmatpush3.bf16.msra.mxu0 %v5785_v9 }
 0x446   :  { %v4887_v10 = vpop.f32.mrb[80].mxu1 }
 0x447   :  { %v4888_v55 = vpop.f32.mrb[81].mxu1 }
 0x449   :  { %v4932_v39 = vpop.f32.mrb[90].mxu0 }
 0x44a   :  { %v4890_v42 = vpop.f32.mrb[82].mxu1  ;;  %v4933_v0 = vpop.f32.mrb[91].mxu0 }
 0x44b   :  { %v4891_v22 = vpop.f32.mrb[83].mxu1  ;;  %v4934_v60 = vadd.f32 %v4933_v0, %v4932_v39 }
 0x44d   :  { %v3887_v40 = vadd.f32 %v4934_v60, %v4530_v53 }
 0x464   :  { %v4970_v37 = vpop.f32.mrb[84].mxu1 }
 0x465   :  { %v4971_v61 = vpop.f32.mrb[85].mxu1 }
 0x466   :  { %v4972_v47 = vadd.f32 %v4971_v61, %v4970_v37 }
 0x468   :  { %v4935_v41 = vpop.f32.mrb[92].mxu0  ;;  %v3962_v32 = vadd.f32 %v4972_v47, %v3887_v40 }
 0x469   :  { %v4936_v54 = vpop.f32.mrb[93].mxu0 }
 0x46a   :  { %v4937_v8 = vadd.f32 %v4936_v54, %v4935_v41  ;;  %v4329_v41 = vld [vmem:[%s8749_s10] sm:$0xff] }
 0x46c   :  { %v3892_v51 = vadd.f32 %v4937_v8, %v4530_v53  ;;  %v4973_v57 = vpop.f32.mrb[86].mxu1  ;;  %v5362_v34 = vpop.f32.mrb[94].mxu0 }
 0x46d   :  { %v4974_v12 = vpop.f32.mrb[87].mxu1  ;;  %v4036_v1 = vpop.f32.mrb[95].mxu0 }
 0x46e   :  { %v4975_v25 = vadd.f32 %v4974_v12, %v4973_v57  ;;  %v4037_v2 = vadd.f32 %v4036_v1, %v3962_v32  ;;  %v4330_v32 = vld [vmem:[%s8749_s10 + $0x8] sm:$0xff] }
 0x46f   :  { %v5788_v56 = vpack.c.bf16 %v4330_v32, %v4329_v41 }
 0x470   :  { %v3967_v3 = vadd.f32 %v4975_v25, %v3892_v51  ;;  %v8597_v33 = vmax.f32 %v4037_v2, 0.0 }
 0x472   :  { %v4042_v44 = vadd.f32 %v5362_v34, %v3967_v3  ;;  %v4054_v50 = vrot.slane %v8597_v33, 3  ;;  %v4060_v16 = vrot.slane %v8597_v33, 5  ;;  %v4066_v36 = vrot.slane %v8597_v33, 7 }
 0x473   :  { %v4048_v18 = vrot.slane %v8597_v33, 1  ;;  %v4052_v37 = vrot.slane %v8597_v33, 2  ;;  %v4064_v12 = vrot.slane %v8597_v33, 6  ;;  %v4058_v30 = vrot.slane %v8597_v33, 4 }
 0x474   :  { %v8605_v15 = vmax.f32 %v4042_v44, 0.0  ;;  %v6304_v58 = vpack.i.bf16 %v4060_v16, %v4066_v36  ;;  %v5803_v16 = vpack.c.bf16 %v4340_v62, %v4339_v38  ;;  %v4341_v36 = vld [vmem:[%s8749_s10 + $0x60] sm:$0xff] }
 0x476   :  { %v4075_v46 = vrot.slane %v8605_v15, 1  ;;  %v4081_v24 = vrot.slane %v8605_v15, 3  ;;  %v4093_v13 = vrot.slane %v8605_v15, 7  ;;  %v4087_v23 = vrot.slane %v8605_v15, 5 }
 0x477   :  { %v4079_v10 = vrot.slane %v8605_v15, 2  ;;  %v4091_v42 = vrot.slane %v8605_v15, 6  ;;  %v4085_v8 = vrot.slane %v8605_v15, 4 }
 0x478   :  { %v6289_v52 = vpack.i.bf16 %v4075_v46, %v4081_v24  ;;  %v6294_v20 = vpack.i.bf16 %v4093_v13, %v4054_v50  ;;  %v6299_v35 = vpack.i.bf16 %v4087_v23, %v4048_v18  ;;  %v5797_v46 = vpack.c.bf16 %v4336_v17, %v4335_v31  ;;  %v4337_v24 = vld [vmem:[%s8749_s10 + $0x40] sm:$0xff]  ;;  %v4338_v50 = vld [vmem:[%s8749_s10 + $0x48] sm:$0xff]  ;;  %v4344_v23 = vld [vmem:[%s8749_s10 + $0x78] sm:$0xff] }
 0x479   :  { %v5800_v13 = vpack.c.bf16 %v4338_v50, %v4337_v24  ;;  %v4533_v18 = vld [vmem:[%s8748_s9] ss:$0 sm:$0xff]  ;;  %s6311_s9 = scalar_lea.vmem %s4431_s25, 32 }
 0x47a   :  { %6290 = vrot.lane.b32.xlu0 %v6289_v52, %s6339_s16  ;;  %6295 = vrot.lane.b32.xlu1 %v6294_v20, %s6339_s16  ;;  %v4343_v52 = vld [vmem:[%s8749_s10 + $0x70] sm:$0xff]  ;;  %v5806_v20 = vpack.c.bf16 %v4342_v21, %v4341_v36  ;;  %p6312_p0 = scmp.ne.s32.totalorder %s4431_s25, %s6311_s9  ;;  %p6317_p2 = scmp.lt.s32.totalorder %s6311_s9, %s6311_s9 }
 0x47b   :  { %v5809_v5 = vpack.c.bf16 %v4344_v23, %v4343_v52 }
 0x47c   :  { %p6318_p3 = por %p6317_p2, %p6316_p1 }
 0x47e   :  { %6305 = vrot.lane.b32.xlu1 %v6304_v58, %s6339_s16  ;;  %6300 = vrot.lane.b32.xlu0 %v6299_v35, %s6339_s16  ;;  %p6319_p4 = pnand %p6318_p3, %p6312_p0 }
 0x4ec   :  { %v6291_v55 = vpop.permute.xlu0 %6290  ;;  %v6296_v39 = vpop.permute.xlu1 %6295 }
 0x4ed   :  { %v6293_v22 = vunpack.i.h.bf16 %v6291_v55  ;;  %v6292_v0 = vunpack.i.l.bf16 %v6291_v55  ;;  %v6298_v60 = vunpack.i.h.bf16 %v6296_v39  ;;  %v6297_v53 = vunpack.i.l.bf16 %v6296_v39 }
 0x4ef   :  { %v4097_v61 = vsel %vm1069_vm8, %v8605_v15, %v6293_v22  ;;  %v4098_v40 = vsel %vm1069_vm8, %v4079_v10, %v6292_v0  ;;  %v4100_v47 = vsel %vm1069_vm8, %v4091_v42, %v6298_v60  ;;  %v4071_v57 = vsel %vm1069_vm8, %v4052_v37, %v6297_v53  ;;  %v4534_v60 = vld [vmem:[%s8750_s11] ss:$0 sm:$0xff] }
 0x4f0   :  { %v6306_v54 = vpop.permute.xlu1 %6305  ;;  %v6301_v51 = vpop.permute.xlu0 %6300  ;;  %v4106_v34 = vrot.slane %v4098_v40, 7  ;;  %v4105_v19 = vrot.slane %v4097_v61, 7  ;;  %v4108_v6 = vrot.slane %v4100_v47, 7 }
 0x4f1   :  { %v6308_v1 = vunpack.i.h.bf16 %v6306_v54  ;;  %v6307_v25 = vunpack.i.l.bf16 %v6306_v54  ;;  %v6303_v2 = vunpack.i.h.bf16 %v6301_v51  ;;  %v6302_v3 = vunpack.i.l.bf16 %v6301_v51 }
 0x4f2   :  { %v4114_v28 = vsel %vm198_vm0, %v4071_v57, %v4106_v34 }
 0x4f3   :  { %v4099_v4 = vsel %vm1069_vm8, %v4085_v8, %v6303_v2  ;;  %v4070_v45 = vsel %vm1069_vm8, %v8597_v33, %v6302_v3  ;;  %4252 = vmatprep.mubr.f32.mxu1 %v4114_v28  ;;  %v4073_v44 = vsel %vm1069_vm8, %v4064_v12, %v6307_v25  ;;  %v4072_v15 = vsel %vm1069_vm8, %v4058_v30, %v6308_v1 }
 0x4f4   :  { %v4107_v26 = vrot.slane %v4099_v4, 7  ;;  %v4113_v43 = vsel %vm198_vm0, %v4070_v45, %v4105_v19  ;;  %v4116_v59 = vsel %vm198_vm0, %v4073_v44, %v4108_v6 }
 0x4f5   :  { %4253 = vmatmul.mubr.f32.vlgmr.msra.gmra.mrb[88].mxu1 %v4113_v43  ;;  %4322 = vmatprep.mubr.f32.mxu0 %v4116_v59 }
 0x4f6   :  { %v4115_v33 = vsel %vm198_vm0, %v4072_v15, %v4107_v26  ;;  %5789 = vmatpush3.bf16.msra.mxu1 %v5788_v56  ;;  %5395 = vmatprep.mubr.msk.f32.mxu1 %vm6337_vm3, %v8776_v29  ;;  %vm4422_vm0 = vcmask 58368  }
 0x4f7   :  { %4323 = vmatmul.mubr.f32.vlgmr.msra.gmra.mrb[96].mxu0 %v4115_v33  ;;  %5790 = vmatprep.subr.bf16.mxu1 %v8775_v14 }
 0x4fa   :  { %5792 = vmatpush3.bf16.msra.mxu1 %v5791_v63 }
 0x4fb   :  { %5793 = vmatprep.subr.bf16.mxu1 %v8775_v14 }
 0x4fe   :  { %5795 = vmatpush3.bf16.msra.mxu1 %v5794_v7 }
 0x4ff   :  { %5796 = vmatprep.subr.bf16.mxu1 %v8775_v14 }
 0x502   :  { %5798 = vmatpush3.bf16.msra.mxu1 %v5797_v46 }
 0x503   :  { %5799 = vmatprep.subr.bf16.mxu1 %v8775_v14 }
 0x506   :  { %5801 = vmatpush3.bf16.msra.mxu1 %v5800_v13 }
 0x507   :  { %5802 = vmatprep.subr.bf16.mxu1 %v8775_v14 }
 0x50a   :  { %5804 = vmatpush3.bf16.msra.mxu1 %v5803_v16 }
 0x50b   :  { %5805 = vmatprep.subr.bf16.mxu1 %v8775_v14 }
 0x50e   :  { %5807 = vmatpush3.bf16.msra.mxu1 %v5806_v20 }
 0x50f   :  { %5808 = vmatprep.subr.bf16.mxu1 %v8775_v14 }
 0x512   :  { %5810 = vmatpush3.bf16.msra.mxu1 %v5809_v5 }
 0x5c8   :  { %v5018_v9 = vpop.f32.mrb[88].mxu1 }
 0x5c9   :  { %v5019_v58 = vpop.f32.mrb[89].mxu1 }
 0x5ca   :  { %v5020_v35 = vadd.f32 %v5019_v58, %v5018_v9  ;;  %v5053_v10 = vpop.f32.mrb[96].mxu0 }
 0x5cb   :  { %v5054_v55 = vpop.f32.mrb[97].mxu0 }
 0x5cc   :  { %v4255_v42 = vadd.f32 %v5020_v35, %v4533_v18  ;;  %v5055_v39 = vadd.f32 %v5054_v55, %v5053_v10 }
 0x5ce   :  { %v4325_v22 = vadd.f32 %v5055_v39, %v4255_v42 }
 0x5d0   :  { %v4328_v0 = vmax.f32 %v4325_v22, 0.0 }
 0x5d2   :  { %5396 = vmatmul.mubr.f32.vlgmr.msra.gmra.mrb[90].mxu1 %v4328_v0 }
 0x6a5   :  { %v4418_v14 = vpop.f32.mrb[90].mxu1 }
 0x6a6   :  { %v4419_v53 = vadd.f32 %v4534_v60, %v4418_v14  ;;  %v5397_v37 = vpop.f32.mrb[91].mxu1 }
 0x6a8   :  { %4423 = vst.msk [vmem:[#allocation5] sm:$0x3] %vm4422_vm0, %v4419_v53 }
 0x6a9   :  { %6322 = shalt.err (!%p6319_p4)
}
 0x6aa   :  { %s6323_s5 = scalar_lea.hbm %s8751_s12, 32 }
 0x6ab   :  { %p6324_p5 = scmp.ne.s32.totalorder %s8751_s12, %s6323_s5  ;;  %p6327_p6 = scmp.lt.u32.totalorder %s6323_s5, %s8751_s12 }
 0x6ad   :  { %p6329_p7 = pnand %p6327_p6, %p6324_p5 }
 0x6af   :  { %6332 = shalt.err (!%p6329_p7)
}
 0x6b0   :  { %4433 = dma.vmem_to_hbm [thread:$0]  %s4431_s25, 32, %s8751_s12, [#allocation6]  }
 0x6b1   :  { %6333 = dma.done.wait [#allocation6], 32  }
 0x6b2   :  { %6334 = vsyncadd [#allocation6], 4294967264 }
 0x6b3   :  { %4437 = vsyncpa [#allocation6], 1 }

</bundles_post_ra>
